<compile_context>
chip_gen: v5e
topology: v5e:2x2
jax: 0.10.0
libtpu: 0.0.40
codegen_flags: <defaults>
</compile_context>

<pallas_src>
import functools

import jax
import jax.numpy as jnp
from jax.experimental import pallas as pl
from jax.experimental.pallas import tpu as pltpu


NEG_SLOPE = 0.01   # nn.LeakyReLU default
LN_EPS = 1e-5      # nn.LayerNorm default
LANE = 128


def _round_up(x, m):
    return (x + m - 1) // m * m


def _pad_axis(a, target, axis):
    pad = target - a.shape[axis]
    if pad <= 0:
        return a
    widths = [(0, 0)] * a.ndim
    widths[axis] = (0, pad)
    return jnp.pad(a, widths)


def _block(x_lo, w_ref, b_ref, g_ref, be_ref, inv_d):
    """Linear -> LeakyReLU -> LayerNorm. Matmul in low precision, rest f32."""
    h = jnp.dot(x_lo, w_ref[...], preferred_element_type=jnp.float32) + b_ref[...]
    h = jnp.where(h >= 0, h, NEG_SLOPE * h)                      # LeakyReLU
    # Padded lanes of h are exactly zero (zero weight cols + zero bias and
    # LeakyReLU(0)=0), so summing over the padded width is exact; divide by
    # the true d_model, not the padded width.
    s = jnp.sum(h, axis=-1, keepdims=True)
    sq = jnp.sum(h * h, axis=-1, keepdims=True)
    mu = s * inv_d
    var = sq * inv_d - mu * mu
    inv_std = jax.lax.rsqrt(var + LN_EPS)
    # Padded gamma/beta lanes are zero -> padded output lanes stay exactly zero.
    return (h - mu) * inv_std * g_ref[...] + be_ref[...]


def _disc_kernel(x_ref,
                 w1_ref, b1_ref, g1_ref, be1_ref,
                 w2_ref, b2_ref, g2_ref, be2_ref,
                 wo_ref, bo_ref,
                 o_ref, *, inv_d, compute_dtype):
    x = x_ref[...].astype(compute_dtype)
    h = _block(x, w1_ref, b1_ref, g1_ref, be1_ref, inv_d)
    h = _block(h.astype(compute_dtype), w2_ref, b2_ref, g2_ref, be2_ref, inv_d)
    out = jnp.dot(h.astype(compute_dtype), wo_ref[...],
                  preferred_element_type=jnp.float32) + bo_ref[...]
    o_ref[...] = out.astype(o_ref.dtype)


def adversarial_discriminator(x, params, *, tile_b=512,
                              compute_dtype=jnp.bfloat16):
    """x: [B, d_model] f32; params: dict of unpadded weights (see init_params)."""
    B, d_model = x.shape
    n_cls = params["wo"].shape[1]

    d_pad = _round_up(d_model, LANE)
    n_pad = _round_up(n_cls, LANE)
    tile_b = min(tile_b, _round_up(B, 8))       # don't over-tile tiny batches
    b_pad = _round_up(B, tile_b)

    # Lane-dense zero padding; MXU operands cast to the compute dtype.
    xp = _pad_axis(_pad_axis(x, b_pad, 0), d_pad, 1).astype(compute_dtype)
    w1 = _pad_axis(_pad_axis(params["w1"], d_pad, 0), d_pad, 1).astype(compute_dtype)
    w2 = _pad_axis(_pad_axis(params["w2"], d_pad, 0), d_pad, 1).astype(compute_dtype)
    wo = _pad_axis(_pad_axis(params["wo"], d_pad, 0), n_pad, 1).astype(compute_dtype)
    b1 = _pad_axis(params["b1"], d_pad, 1)
    g1 = _pad_axis(params["g1"], d_pad, 1)
    be1 = _pad_axis(params["be1"], d_pad, 1)
    b2 = _pad_axis(params["b2"], d_pad, 1)
    g2 = _pad_axis(params["g2"], d_pad, 1)
    be2 = _pad_axis(params["be2"], d_pad, 1)
    bo = _pad_axis(params["bo"], n_pad, 1)

    grid = (b_pad // tile_b,)

    def resident(shape):
        # Constant block index -> fetched once, stays resident in VMEM.
        return pl.BlockSpec(shape, lambda i: (0, 0))

    in_specs = [
        pl.BlockSpec((tile_b, d_pad), lambda i: (i, 0)),   # x: streamed tiles
        resident((d_pad, d_pad)), resident((1, d_pad)),    # w1, b1
        resident((1, d_pad)), resident((1, d_pad)),        # g1, be1
        resident((d_pad, d_pad)), resident((1, d_pad)),    # w2, b2
        resident((1, d_pad)), resident((1, d_pad)),        # g2, be2
        resident((d_pad, n_pad)), resident((1, n_pad)),    # wo, bo
    ]
    out_specs = pl.BlockSpec((tile_b, n_pad), lambda i: (i, 0))

    # VMEM budget: double-buffered streamed tiles + resident weights + margin.
    itemsize = jnp.dtype(compute_dtype).itemsize
    vmem_bytes = (2 * tile_b * d_pad * itemsize                      # x tiles
                  + 2 * tile_b * n_pad * 4                           # out tiles
                  + 2 * (2 * d_pad * d_pad + d_pad * n_pad) * itemsize  # weights
                  + 2 * (6 * d_pad + n_pad) * 4                      # bias / LN rows
                  + (8 << 20))                                       # headroom
    vmem_bytes = int(min(max(vmem_bytes, 32 << 20), 60 << 20))       # v7x-safe

    kernel = functools.partial(_disc_kernel, inv_d=1.0 / d_model,
                               compute_dtype=compute_dtype)

    out = pl.pallas_call(
        kernel,
        out_shape=jax.ShapeDtypeStruct((b_pad, n_pad), jnp.float32),
        grid=grid,
        in_specs=in_specs,
        out_specs=out_specs,
        compiler_params=pltpu.CompilerParams(
            dimension_semantics=("parallel",),
            vmem_limit_bytes=vmem_bytes,
        ),
    )(xp, w1, b1, g1, be1, w2, b2, g2, be2, wo, bo)

    return out[:B, :n_cls]


def init_params(key, d_model, n_cls):
    """Deterministic synthetic init (Linear weights ~ U[-1/sqrt(fan_in), +]).

    Weights are stored [in, out] (transposed vs. PyTorch) so the kernel
    computes y = x @ W + b directly on the MXU.
    """
    ks = jax.random.split(key, 6)
    lim = 1.0 / jnp.sqrt(d_model)
    return {
        "w1": jax.random.uniform(ks[0], (d_model, d_model), jnp.float32, -lim, lim),
        "b1": jax.random.uniform(ks[1], (1, d_model), jnp.float32, -lim, lim),
        "g1": jnp.ones((1, d_model), jnp.float32),
        "be1": jnp.zeros((1, d_model), jnp.float32),
        "w2": jax.random.uniform(ks[2], (d_model, d_model), jnp.float32, -lim, lim),
        "b2": jax.random.uniform(ks[3], (1, d_model), jnp.float32, -lim, lim),
        "g2": jnp.ones((1, d_model), jnp.float32),
        "be2": jnp.zeros((1, d_model), jnp.float32),
        "wo": jax.random.uniform(ks[4], (d_model, n_cls), jnp.float32, -lim, lim),
        "bo": jax.random.uniform(ks[5], (1, n_cls), jnp.float32, -lim, lim),
    }


def reference_forward(x, p, compute_dtype=jnp.bfloat16):
    """Pure-JAX reference mirroring the PyTorch forward (same bf16 matmul casts)."""
    def block(h_in, w, b, g, be):
        h = jnp.dot(h_in.astype(compute_dtype), w.astype(compute_dtype),
                    preferred_element_type=jnp.float32) + b
        h = jnp.where(h >= 0, h, NEG_SLOPE * h)
        mu = jnp.mean(h, axis=-1, keepdims=True)
        var = jnp.mean((h - mu) ** 2, axis=-1, keepdims=True)
        return (h - mu) * jax.lax.rsqrt(var + LN_EPS) * g + be
    h = block(x, p["w1"], p["b1"], p["g1"], p["be1"])
    h = block(h, p["w2"], p["b2"], p["g2"], p["be2"])
    return jnp.dot(h.astype(compute_dtype), p["wo"].astype(compute_dtype),
                   preferred_element_type=jnp.float32) + p["bo"]


if __name__ == "__main__":
    # TODO(synk): reverse_grad (gradient reversal) is a backward-pass-only op;
    # its forward is identity, so it is omitted here.
    d_model, n_cls = 64, 4
    key = jax.random.PRNGKey(0)
    kx, kp = jax.random.split(key)
    params = init_params(kp, d_model, n_cls)

    # Batch larger than the tile: exercises the pipelined batch grid (grid=(2,)).
    batch = 512
    x = jax.random.normal(kx, (batch, d_model), jnp.float32)
    out = jax.block_until_ready(adversarial_discriminator(x, params, tile_b=256))
    ref = reference_forward(x, params)
    assert out.shape == (batch, n_cls)
    assert jnp.allclose(out, ref, atol=1e-2, rtol=1e-2), "mismatch (batch=512)"

    # Tiny batch: exercises batch padding / tile clamping.
    x_small = x[:8]
    out_small = jax.block_until_ready(adversarial_discriminator(x_small, params))
    assert out_small.shape == (8, n_cls)
    assert jnp.allclose(out_small, ref[:8], atol=1e-2, rtol=1e-2), "mismatch (batch=8)"

    print("KERNEL_OK")
</pallas_src>

<mosaic_0001>
module attributes {stable_mosaic.version = 11 : i64} {
  func.func @_disc_kernel(%arg0: i32, %arg1: memref<256x128xbf16, #tpu.memory_space<vmem>>, %arg2: memref<128x128xbf16, #tpu.memory_space<vmem>>, %arg3: memref<1x128xf32, #tpu.memory_space<vmem>>, %arg4: memref<1x128xf32, #tpu.memory_space<vmem>>, %arg5: memref<1x128xf32, #tpu.memory_space<vmem>>, %arg6: memref<128x128xbf16, #tpu.memory_space<vmem>>, %arg7: memref<1x128xf32, #tpu.memory_space<vmem>>, %arg8: memref<1x128xf32, #tpu.memory_space<vmem>>, %arg9: memref<1x128xf32, #tpu.memory_space<vmem>>, %arg10: memref<128x128xbf16, #tpu.memory_space<vmem>>, %arg11: memref<1x128xf32, #tpu.memory_space<vmem>>, %arg12: memref<256x128xf32, #tpu.memory_space<vmem>>) attributes {dimension_semantics = [#tpu.dimension_semantics<parallel>], iteration_bounds = array<i64: 2>, scalar_prefetch = 0 : i64, scratch_operands = 0 : i64, tpu.core_type = #tpu.core_type<tc>, window_params = [{transform_indices = @transform_0, window_bounds = array<i64: 256, 128>}, {pipeline_mode = #tpu.pipeline_mode<synchronous>, transform_indices = @transform_1, window_bounds = array<i64: 128, 128>}, {pipeline_mode = #tpu.pipeline_mode<synchronous>, transform_indices = @transform_2, window_bounds = array<i64: 1, 128>}, {pipeline_mode = #tpu.pipeline_mode<synchronous>, transform_indices = @transform_3, window_bounds = array<i64: 1, 128>}, {pipeline_mode = #tpu.pipeline_mode<synchronous>, transform_indices = @transform_4, window_bounds = array<i64: 1, 128>}, {pipeline_mode = #tpu.pipeline_mode<synchronous>, transform_indices = @transform_5, window_bounds = array<i64: 128, 128>}, {pipeline_mode = #tpu.pipeline_mode<synchronous>, transform_indices = @transform_6, window_bounds = array<i64: 1, 128>}, {pipeline_mode = #tpu.pipeline_mode<synchronous>, transform_indices = @transform_7, window_bounds = array<i64: 1, 128>}, {pipeline_mode = #tpu.pipeline_mode<synchronous>, transform_indices = @transform_8, window_bounds = array<i64: 1, 128>}, {pipeline_mode = #tpu.pipeline_mode<synchronous>, transform_indices = @transform_9, window_bounds = array<i64: 128, 128>}, {pipeline_mode = #tpu.pipeline_mode<synchronous>, transform_indices = @transform_10, window_bounds = array<i64: 1, 128>}, {transform_indices = @transform_11, window_bounds = array<i64: 256, 128>}]} {
    %c0 = arith.constant 0 : index
    %c0_0 = arith.constant 0 : index
    %0 = vector.load %arg1[%c0, %c0_0] : memref<256x128xbf16, #tpu.memory_space<vmem>>, vector<256x128xbf16>
    %c0_1 = arith.constant 0 : index
    %c0_2 = arith.constant 0 : index
    %1 = vector.load %arg2[%c0_1, %c0_2] : memref<128x128xbf16, #tpu.memory_space<vmem>>, vector<128x128xbf16>
    %cst = arith.constant dense<0.000000e+00> : vector<256x128xf32>
    %2 = tpu.matmul %0, %1, %cst {dimension_numbers = #tpu.dot_dimension_numbers<[1], [0], [0], [1], [0, 0, 1, 1], [], []>} : vector<256x128xbf16>, vector<128x128xbf16>, vector<256x128xf32> -> vector<256x128xf32>
    %c0_3 = arith.constant 0 : index
    %c0_4 = arith.constant 0 : index
    %3 = vector.load %arg3[%c0_3, %c0_4] : memref<1x128xf32, #tpu.memory_space<vmem>>, vector<1x128xf32>
    %4 = vector.broadcast %3 : vector<1x128xf32> to vector<256x128xf32>
    %5 = arith.addf %2, %4 : vector<256x128xf32>
    %cst_5 = arith.constant 0.000000e+00 : f32
    %6 = vector.broadcast %cst_5 : f32 to vector<256x128xf32>
    %7 = arith.cmpf oge, %5, %6 : vector<256x128xf32>
    %cst_6 = arith.constant 0.00999999977 : f32
    %8 = vector.broadcast %cst_6 : f32 to vector<256x128xf32>
    %9 = arith.mulf %8, %5 : vector<256x128xf32>
    %10 = arith.select %7, %5, %9 : vector<256x128xi1>, vector<256x128xf32>
    %cst_7 = arith.constant dense<0.000000e+00> : vector<256xf32>
    %11 = vector.multi_reduction <add>, %10, %cst_7 [1] : vector<256x128xf32> to vector<256xf32>
    %12 = vector.shape_cast %11 : vector<256xf32> to vector<256x1xf32>
    %13 = arith.mulf %10, %10 : vector<256x128xf32>
    %cst_8 = arith.constant dense<0.000000e+00> : vector<256xf32>
    %14 = vector.multi_reduction <add>, %13, %cst_8 [1] : vector<256x128xf32> to vector<256xf32>
    %15 = vector.shape_cast %14 : vector<256xf32> to vector<256x1xf32>
    %cst_9 = arith.constant 1.562500e-02 : f32
    %16 = vector.broadcast %cst_9 : f32 to vector<256x1xf32>
    %17 = arith.mulf %12, %16 : vector<256x1xf32>
    %cst_10 = arith.constant 1.562500e-02 : f32
    %18 = vector.broadcast %cst_10 : f32 to vector<256x1xf32>
    %19 = arith.mulf %15, %18 : vector<256x1xf32>
    %20 = arith.mulf %17, %17 : vector<256x1xf32>
    %21 = arith.subf %19, %20 : vector<256x1xf32>
    %cst_11 = arith.constant 9.99999974E-6 : f32
    %22 = vector.broadcast %cst_11 : f32 to vector<256x1xf32>
    %23 = arith.addf %21, %22 : vector<256x1xf32>
    %24 = math.rsqrt %23 : vector<256x1xf32>
    %25 = vector.broadcast %17 : vector<256x1xf32> to vector<256x128xf32>
    %26 = arith.subf %10, %25 : vector<256x128xf32>
    %27 = vector.broadcast %24 : vector<256x1xf32> to vector<256x128xf32>
    %28 = arith.mulf %26, %27 : vector<256x128xf32>
    %c0_12 = arith.constant 0 : index
    %c0_13 = arith.constant 0 : index
    %29 = vector.load %arg4[%c0_12, %c0_13] : memref<1x128xf32, #tpu.memory_space<vmem>>, vector<1x128xf32>
    %30 = vector.broadcast %29 : vector<1x128xf32> to vector<256x128xf32>
    %31 = arith.mulf %28, %30 : vector<256x128xf32>
    %c0_14 = arith.constant 0 : index
    %c0_15 = arith.constant 0 : index
    %32 = vector.load %arg5[%c0_14, %c0_15] : memref<1x128xf32, #tpu.memory_space<vmem>>, vector<1x128xf32>
    %33 = vector.broadcast %32 : vector<1x128xf32> to vector<256x128xf32>
    %34 = arith.addf %31, %33 : vector<256x128xf32>
    %35 = arith.truncf %34 : vector<256x128xf32> to vector<256x128xbf16>
    %c0_16 = arith.constant 0 : index
    %c0_17 = arith.constant 0 : index
    %36 = vector.load %arg6[%c0_16, %c0_17] : memref<128x128xbf16, #tpu.memory_space<vmem>>, vector<128x128xbf16>
    %cst_18 = arith.constant dense<0.000000e+00> : vector<256x128xf32>
    %37 = tpu.matmul %35, %36, %cst_18 {dimension_numbers = #tpu.dot_dimension_numbers<[1], [0], [0], [1], [0, 0, 1, 1], [], []>} : vector<256x128xbf16>, vector<128x128xbf16>, vector<256x128xf32> -> vector<256x128xf32>
    %c0_19 = arith.constant 0 : index
    %c0_20 = arith.constant 0 : index
    %38 = vector.load %arg7[%c0_19, %c0_20] : memref<1x128xf32, #tpu.memory_space<vmem>>, vector<1x128xf32>
    %39 = vector.broadcast %38 : vector<1x128xf32> to vector<256x128xf32>
    %40 = arith.addf %37, %39 : vector<256x128xf32>
    %cst_21 = arith.constant 0.000000e+00 : f32
    %41 = vector.broadcast %cst_21 : f32 to vector<256x128xf32>
    %42 = arith.cmpf oge, %40, %41 : vector<256x128xf32>
    %cst_22 = arith.constant 0.00999999977 : f32
    %43 = vector.broadcast %cst_22 : f32 to vector<256x128xf32>
    %44 = arith.mulf %43, %40 : vector<256x128xf32>
    %45 = arith.select %42, %40, %44 : vector<256x128xi1>, vector<256x128xf32>
    %cst_23 = arith.constant dense<0.000000e+00> : vector<256xf32>
    %46 = vector.multi_reduction <add>, %45, %cst_23 [1] : vector<256x128xf32> to vector<256xf32>
    %47 = vector.shape_cast %46 : vector<256xf32> to vector<256x1xf32>
    %48 = arith.mulf %45, %45 : vector<256x128xf32>
    %cst_24 = arith.constant dense<0.000000e+00> : vector<256xf32>
    %49 = vector.multi_reduction <add>, %48, %cst_24 [1] : vector<256x128xf32> to vector<256xf32>
    %50 = vector.shape_cast %49 : vector<256xf32> to vector<256x1xf32>
    %cst_25 = arith.constant 1.562500e-02 : f32
    %51 = vector.broadcast %cst_25 : f32 to vector<256x1xf32>
    %52 = arith.mulf %47, %51 : vector<256x1xf32>
    %cst_26 = arith.constant 1.562500e-02 : f32
    %53 = vector.broadcast %cst_26 : f32 to vector<256x1xf32>
    %54 = arith.mulf %50, %53 : vector<256x1xf32>
    %55 = arith.mulf %52, %52 : vector<256x1xf32>
    %56 = arith.subf %54, %55 : vector<256x1xf32>
    %cst_27 = arith.constant 9.99999974E-6 : f32
    %57 = vector.broadcast %cst_27 : f32 to vector<256x1xf32>
    %58 = arith.addf %56, %57 : vector<256x1xf32>
    %59 = math.rsqrt %58 : vector<256x1xf32>
    %60 = vector.broadcast %52 : vector<256x1xf32> to vector<256x128xf32>
    %61 = arith.subf %45, %60 : vector<256x128xf32>
    %62 = vector.broadcast %59 : vector<256x1xf32> to vector<256x128xf32>
    %63 = arith.mulf %61, %62 : vector<256x128xf32>
    %c0_28 = arith.constant 0 : index
    %c0_29 = arith.constant 0 : index
    %64 = vector.load %arg8[%c0_28, %c0_29] : memref<1x128xf32, #tpu.memory_space<vmem>>, vector<1x128xf32>
    %65 = vector.broadcast %64 : vector<1x128xf32> to vector<256x128xf32>
    %66 = arith.mulf %63, %65 : vector<256x128xf32>
    %c0_30 = arith.constant 0 : index
    %c0_31 = arith.constant 0 : index
    %67 = vector.load %arg9[%c0_30, %c0_31] : memref<1x128xf32, #tpu.memory_space<vmem>>, vector<1x128xf32>
    %68 = vector.broadcast %67 : vector<1x128xf32> to vector<256x128xf32>
    %69 = arith.addf %66, %68 : vector<256x128xf32>
    %70 = arith.truncf %69 : vector<256x128xf32> to vector<256x128xbf16>
    %c0_32 = arith.constant 0 : index
    %c0_33 = arith.constant 0 : index
    %71 = vector.load %arg10[%c0_32, %c0_33] : memref<128x128xbf16, #tpu.memory_space<vmem>>, vector<128x128xbf16>
    %cst_34 = arith.constant dense<0.000000e+00> : vector<256x128xf32>
    %72 = tpu.matmul %70, %71, %cst_34 {dimension_numbers = #tpu.dot_dimension_numbers<[1], [0], [0], [1], [0, 0, 1, 1], [], []>} : vector<256x128xbf16>, vector<128x128xbf16>, vector<256x128xf32> -> vector<256x128xf32>
    %c0_35 = arith.constant 0 : index
    %c0_36 = arith.constant 0 : index
    %73 = vector.load %arg11[%c0_35, %c0_36] : memref<1x128xf32, #tpu.memory_space<vmem>>, vector<1x128xf32>
    %74 = vector.broadcast %73 : vector<1x128xf32> to vector<256x128xf32>
    %75 = arith.addf %72, %74 : vector<256x128xf32>
    %c0_37 = arith.constant 0 : index
    %c0_38 = arith.constant 0 : index
    %76 = vector.load %arg12[%c0_37, %c0_38] : memref<256x128xf32, #tpu.memory_space<vmem>>, vector<256x128xf32>
    tpu.vector_store %arg12[%c0_37, %c0_38], %75 {strides = array<i32>} : memref<256x128xf32, #tpu.memory_space<vmem>>, vector<256x128xf32>,
    return
  }
  func.func @transform_0(%arg0: i32) -> (i32, i32) {
    %c0_i32 = arith.constant 0 : i32
    %c0_i32_0 = arith.constant 0 : i32
    return %arg0, %c0_i32 : i32, i32
  }
  func.func @transform_1(%arg0: i32) -> (i32, i32) {
    %c0_i32 = arith.constant 0 : i32
    %c0_i32_0 = arith.constant 0 : i32
    %c0_i32_1 = arith.constant 0 : i32
    return %c0_i32, %c0_i32_0 : i32, i32
  }
  func.func @transform_2(%arg0: i32) -> (i32, i32) {
    %c0_i32 = arith.constant 0 : i32
    %c0_i32_0 = arith.constant 0 : i32
    %c0_i32_1 = arith.constant 0 : i32
    return %c0_i32, %c0_i32_0 : i32, i32
  }
  func.func @transform_3(%arg0: i32) -> (i32, i32) {
    %c0_i32 = arith.constant 0 : i32
    %c0_i32_0 = arith.constant 0 : i32
    %c0_i32_1 = arith.constant 0 : i32
    return %c0_i32, %c0_i32_0 : i32, i32
  }
  func.func @transform_4(%arg0: i32) -> (i32, i32) {
    %c0_i32 = arith.constant 0 : i32
    %c0_i32_0 = arith.constant 0 : i32
    %c0_i32_1 = arith.constant 0 : i32
    return %c0_i32, %c0_i32_0 : i32, i32
  }
  func.func @transform_5(%arg0: i32) -> (i32, i32) {
    %c0_i32 = arith.constant 0 : i32
    %c0_i32_0 = arith.constant 0 : i32
    %c0_i32_1 = arith.constant 0 : i32
    return %c0_i32, %c0_i32_0 : i32, i32
  }
  func.func @transform_6(%arg0: i32) -> (i32, i32) {
    %c0_i32 = arith.constant 0 : i32
    %c0_i32_0 = arith.constant 0 : i32
    %c0_i32_1 = arith.constant 0 : i32
    return %c0_i32, %c0_i32_0 : i32, i32
  }
  func.func @transform_7(%arg0: i32) -> (i32, i32) {
    %c0_i32 = arith.constant 0 : i32
    %c0_i32_0 = arith.constant 0 : i32
    %c0_i32_1 = arith.constant 0 : i32
    return %c0_i32, %c0_i32_0 : i32, i32
  }
  func.func @transform_8(%arg0: i32) -> (i32, i32) {
    %c0_i32 = arith.constant 0 : i32
    %c0_i32_0 = arith.constant 0 : i32
    %c0_i32_1 = arith.constant 0 : i32
    return %c0_i32, %c0_i32_0 : i32, i32
  }
  func.func @transform_9(%arg0: i32) -> (i32, i32) {
    %c0_i32 = arith.constant 0 : i32
    %c0_i32_0 = arith.constant 0 : i32
    %c0_i32_1 = arith.constant 0 : i32
    return %c0_i32, %c0_i32_0 : i32, i32
  }
  func.func @transform_10(%arg0: i32) -> (i32, i32) {
    %c0_i32 = arith.constant 0 : i32
    %c0_i32_0 = arith.constant 0 : i32
    %c0_i32_1 = arith.constant 0 : i32
    return %c0_i32, %c0_i32_0 : i32, i32
  }
  func.func @transform_11(%arg0: i32) -> (i32, i32) {
    %c0_i32 = arith.constant 0 : i32
    %c0_i32_0 = arith.constant 0 : i32
    return %arg0, %c0_i32 : i32, i32
  }
}

</mosaic_0001>

<bundles_post_ra>
// kernel: tpu_custom_call.1
= control target key start
LH: loop header
LB: loop body
LE: loop exit
PB: predicated region body
PF: predicated region fallthrough
CT: control target
= control target key end

     0   :  { %s5904_s0 = inlined_call_operand.hbm [shape: bf16[512,128], index: 0, kind: input, shape index: {}]   ;;  %s5905_s1 = inlined_call_operand.hbm [shape: bf16[128,128], index: 1, kind: input, shape index: {}]   ;;  %s5906_s2 = inlined_call_operand.vmem [shape: f32[1,128], index: 2, kind: input, shape index: {}]   ;;  %s5907_s3 = inlined_call_operand.vmem [shape: f32[1,128], index: 3, kind: input, shape index: {}]   ;;  %s5908_s4 = inlined_call_operand.vmem [shape: f32[1,128], index: 4, kind: input, shape index: {}]   ;;  %s5909_s5 = inlined_call_operand.hbm [shape: bf16[128,128], index: 5, kind: input, shape index: {}]   ;;  %s5910_s6 = inlined_call_operand.vmem [shape: f32[1,128], index: 6, kind: input, shape index: {}]   ;;  %s5911_s7 = inlined_call_operand.vmem [shape: f32[1,128], index: 7, kind: input, shape index: {}]   ;;  %s5912_s8 = inlined_call_operand.vmem [shape: f32[1,128], index: 8, kind: input, shape index: {}]   ;;  %s5913_s9 = inlined_call_operand.hbm [shape: bf16[128,128], index: 9, kind: input, shape index: {}]   ;;  %s5914_s10 = inlined_call_operand.vmem [shape: f32[1,128], index: 10, kind: input, shape index: {}]   ;;  %s5915_s11 = inlined_call_operand.hbm [shape: f32[512,128], index: 11, kind: output, shape index: {}]  }
   0x1   :  { %5919 = sst [smem:[#allocation17_spill]] %s5905_s1 }
   0x2   :  { %5920 = sst [smem:[#allocation18_spill]] %s5909_s5 }
   0x3   :  { %5921 = sst [smem:[#allocation19_spill]] %s5913_s9 }
   0x4   :  { %16 = vsyncpa [#allocation3], 0 }
   0x5   :  { %18 = vsyncpa [#allocation3 + $0x1], 0 }
   0x6   :  { %19 = vsyncpa [#allocation6], 0 }
   0x7   :  { %20 = vsyncpa [#allocation9], 0 }
   0x8   :  { %21 = vsyncpa [#allocation4], 0 }
   0x9   :  { %23 = vsyncpa [#allocation4 + $0x1], 0  ;;  %s3714_s17 = smov 0   ;;  %s3716_s18 = smov 0  }
   0xa   :  { %s3718_s19 = smov 0   ;;  %s3720_s20 = smov 0  }
   0xb LB: > { %5922 = sst [smem:[#allocation15_spill]] %s3641_s19  ;;  %s3735_s21 = sadd.s32 4294967295, %s3645_s20   ;;  %s3645_s20 = sphi %s3720_s20, %s6026_s20   ;;  %s3641_s19 = sphi %s3718_s19, %s6023_s19   ;;  %s3637_s18 = sphi %s3716_s18, %s6025_s18   ;;  %s3633_s17 = sphi %s3714_s17, %s6024_s17  }
   0xc   : > { %s2984_s22 = sadd.s32 4294967294, %s3645_s20   ;;  %p49_p0 = scmp.ne.s32.totalorder %s3637_s18, %s3633_s17 }
   0xd   : > { %p50_p1 = scmp.eq.s32.totalorder %s3735_s21, 0  ;;  %p283_p2 = scmp.eq.s32.totalorder %s3735_s21, 1 }
   0xe   : > { %p289_p3 = scmp.eq.s32.totalorder %s2984_s22, 1  ;;  %p2985_p5 = scmp.ge.s32.totalorder %s3645_s20, 1 }
   0xf   : > { %p3744_p4 = por %p50_p1, %p49_p0  ;;  %p296_p7 = scmp.lt.s32.totalorder %s3645_s20, 3 }
  0x10   : > { %p3749_p6 = por %p289_p3, %p49_p0  ;;  %s5925_s1 = sld [smem:[#allocation17_spill]] }
  0x11   : > { %p3757_p8 = pnand %p2985_p5, %p296_p7  ;;  %s3647_s29 = smov [#allocation5]  }
  0x12   : > { %s309_s30 = sshll.u32 %s3647_s29, 4  ;;  %s5928_s5 = sld [smem:[#allocation18_spill]]  ;;  %s310_s30 = int_to_ptr.vmem [resolvable:$true] %s309_s30 }
  0x13   : > { %p3246_p9 = pneg %p3757_p8  ;;  %s5916_s16 = smov 64  }
  0x14   : > { %s5917_s22 = smov 4   ;;  %s3650_s25 = smov [#allocation7]  }
  0x15   : > { %p3765_p10 = pnand %p3246_p9, %p50_p1  ;;  %s332_s26 = sshll.u32 %s3650_s25, 4  ;;  %s333_s26 = int_to_ptr.vmem [resolvable:$true] %s332_s26 }
  0x16   : > { %s307_s27 = sshll.u32 %s5925_s1, 4  ;;  %s5929_s9 = sld [smem:[#allocation19_spill]]  ;;  %s308_s27 = int_to_ptr.hbm [resolvable:$true] %s307_s27 }
  0x17   : > { %3249 = dma.hbm_to_vmem [thread:$0]  (!%p3765_p10), %s308_s27, 1024, %s310_s30, [#allocation6], %s5916_s16, %s5916_s16, %s5917_s22  }
  0x18   : > { %s330_s15 = sshll.u32 %s5928_s5, 4  ;;  %s3651_s27 = smov [#allocation8]   ;;  %s331_s15 = int_to_ptr.hbm [resolvable:$true] %s330_s15 }
  0x19   : > { %3252 = dma.hbm_to_vmem [thread:$0]  (!%p3765_p10), %s331_s15, 1024, %s333_s26, [#allocation6], %s5916_s16, %s5916_s16, %s5917_s22  }
  0x1a   : > { %s355_s30 = sshll.u32 %s3651_s27, 4  ;;  %s3787_s1 = sadd.s32 1, %s3645_s20   ;;  %s356_s30 = int_to_ptr.vmem [resolvable:$true] %s355_s30 }
  0x1b   : > { %s33_s25 = ssub.s32 %s3645_s20, %s3787_s1  ;;  %s36_s29 = sadd.s32 1, %s3641_s19 }
  0x1c   : > { %s353_s14 = sshll.u32 %s5929_s9, 4  ;;  %p34_p12 = scmp.eq.s32.totalorder %s33_s25, 0  ;;  %s354_s14 = int_to_ptr.hbm [resolvable:$true] %s353_s14 }
  0x1d   : > { %3255 = dma.hbm_to_vmem [thread:$0]  (!%p3765_p10), %s354_s14, 1024, %s356_s30, [#allocation9], %s5916_s16, %s5916_s16, %s5917_s22  }
  0x1e   : > { %p43_p13 = scmp.ne.s32.totalorder %s3641_s19, %s3637_s18  ;;  %p44_p0 = scmp.eq.s32.totalorder %s3645_s20, 0 }
  0x1f   : > { %s3801_s13 = scalar_select %p34_p12, %s3641_s19, %s36_s29  }
  0x20   : > { %p3805_p3 = por %p283_p2, %p43_p13  ;;  %p3267_p5 = scmp.lt.s32.totalorder %s3645_s20, 2 }
  0x21   : > { %5930 = sst [smem:[#allocation16_spill]] %s3801_s13  ;;  %s372_s26 = sand.u32 1, %s3641_s19  }
  0x22   : > { %s3164_s12 = sshll.u32 %s3645_s20, 7  ;;  %p45_p7 = por %p44_p0, %p43_p13 }
  0x23   : > { %s2990_s27 = sshll.u32 %s372_s26, 7  ;;  %s381_s14 = scalar_lea.hbm %s5904_s0, %s3164_s12 }
  0x24   : > { %s382_s30 = sshll.u32 %s381_s14, 4  ;;  %s376_s25 = scalar_lea.vmem [#allocation2], %s2990_s27  ;;  %s383_s30 = int_to_ptr.hbm [resolvable:$true] %s382_s30 }
  0x25   : > { %s384_s16 = sshll.u32 %s376_s25, 4  ;;  %p3815_p9 = pnand %p3267_p5, %p45_p7  ;;  %s385_s16 = int_to_ptr.vmem [resolvable:$true] %s384_s16 }
  0x26   : > { %s373_s22 = scalar_lea.sflag [#allocation3], %s372_s26  ;;  %s3541_s13 = sshra.s32 %s383_s30, 4  ;;  %s3542_s13 = int_to_ptr.hbm [resolvable:$true] %s3541_s13 }
  0x27   : > { %s3543_s19 = scalar_lea.hbm %s3542_s13, 128  ;;  %p3545_p10 = pneg %p3815_p9 }
  0x28   : > { %p3544_p2 = scmp.ne.s32.totalorder %s3542_s13, %s3543_s19  ;;  %s3548_s12 = scalar_lea.hbm %s5904_s0, 256 }
  0x29   : > { %p3549_p0 = scmp.lt.s32.totalorder %s3542_s13, %s5904_s0  ;;  %p3550_p5 = scmp.lt.s32.totalorder %s3548_s12, %s3543_s19 }
  0x2a   : > { %p3546_p12 = pnand %p3545_p10, %p3544_p2 }
  0x2b   : > { %p3551_p7 = por %p3550_p5, %p3549_p0 }
  0x2c   : > { %p3547_p13 = pneg %p3546_p12 }
  0x2e   : > { %p3552_p11 = pnand %p3551_p7, %p3547_p13 }
  0x30   : > { %3555 = shalt.err (!%p3552_p11)
}
  0x31   : > { %s5933_s26 = smov 4   ;;  %s5934_s25 = smov 64  }
  0x32   : > { %3259 = dma.hbm_to_vmem [thread:$0]  (!%p3815_p9), %s383_s30, 2048, %s385_s16, %s373_s22, %s5934_s25, %s5934_s25, %s5933_s26  }
  0x33   : > { %396 = sbr.rel (%p3757_p8) target bundleno = 1031 (0x407), region = 64  ;;  %s3835_s5 = sand.u32 (!%p3757_p8), 1, %s3637_s18  }
  0x34   : > { %s2994_s13 = sshll.u32 (!%p3757_p8), %s3835_s5, 7  ;;  %s399_s19 = scalar_lea.sflag (!%p3757_p8), [#allocation3], %s3835_s5 }
  0x35   : > { %s3839_s9 = scalar_lea.vmem (!%p3757_p8), [#allocation2], %s2994_s13 }
  0x38   : > { %3616 = dma.done.wait (%p3744_p4), %s399_s19, 2048  }
  0x39   : > { %3618 = vsyncadd (%p3744_p4), %s399_s19, 4294965248 }
  0x3a   : > { %3620 = dma.done.wait (%p50_p1), [#allocation6], 2048  }
  0x3b   : > { %3622 = vsyncadd (%p50_p1), [#allocation6], 4294965248 }
  0x3c   : > { %3624 = dma.done.wait (%p50_p1), [#allocation9], 1024  }
  0x3d   : > { %3626 = vsyncadd (%p50_p1), [#allocation9], 4294966272  ;;  %v3188_v0 = vld [vmem:[#allocation5 + $0x38] sm:$0xff]  ;;  %v3187_v1 = vld [vmem:[#allocation5 + $0x30] sm:$0xff]  ;;  %s2998_s30 = sshll.u32 %s3835_s5, 8  ;;  %s3205_s19 = sshll.u32 %s3735_s21, 8 }
  0x3e   : > { %655 = vmatpush.bf16.msra.mxu0 %v3188_v0  ;;  %3206 = vmatpush.bf16.msra.mxu3 %v3188_v0  ;;  %v3186_v2 = vld [vmem:[#allocation5 + $0x28] sm:$0xff]  ;;  %v3185_v3 = vld [vmem:[#allocation5 + $0x20] sm:$0xff]  ;;  %v3184_v4 = vld [vmem:[#allocation5 + $0x18] sm:$0xff]  ;;  %s5465_s27 = scalar_lea.vmem [#allocation10], %s2998_s30  ;;  %s2878_s28 = scalar_lea.hbm %s5915_s11, %s3205_s19 }
  0x3f   : > { %v3183_v5 = vld [vmem:[#allocation5 + $0x10] sm:$0xff]  ;;  %v3182_v6 = vld [vmem:[#allocation5 + $0x8] sm:$0xff]  ;;  %v3181_v7 = vld [vmem:[#allocation5] sm:$0xff]  ;;  %s2879_s16 = sshll.u32 %s5465_s27, 4  ;;  %s2881_s22 = sshll.u32 %s2878_s28, 4  ;;  %s2880_s16 = int_to_ptr.vmem [resolvable:$true] %s2879_s16  ;;  %s2882_s22 = int_to_ptr.hbm [resolvable:$true] %s2881_s22 }
  0x40   : > { %v3165_v8 = vld [vmem:[%s3839_s9] sm:$0xff]  ;;  %v3166_v9 = vld [vmem:[%s3839_s9 + $0x8] sm:$0xff]  ;;  %v3167_v11 = vld [vmem:[%s3839_s9 + $0x10] sm:$0xff]  ;;  %s2867_s21 = scalar_lea.sflag [#allocation4], %s3835_s5  ;;  %s3585_s30 = sshra.s32 %s2882_s22, 4  ;;  %s3586_s30 = int_to_ptr.hbm [resolvable:$true] %s3585_s30 }
  0x41   : > { %v3177_v10 = vld [vmem:[%s3839_s9 + $0x60] sm:$0xff]  ;;  %v3168_v12 = vld [vmem:[%s3839_s9 + $0x18] sm:$0xff]  ;;  %v3178_v13 = vld [vmem:[%s3839_s9 + $0x68] sm:$0xff]  ;;  %s3587_s29 = scalar_lea.hbm %s3586_s30, 256  ;;  %s3591_s26 = scalar_lea.hbm %s5915_s11, 512 }
  0x42   : > { %656 = vmatpush.bf16.msra.mxu0 %v3187_v1  ;;  %3207 = vmatpush.bf16.msra.mxu3 %v3187_v1  ;;  %v3169_v14 = vld [vmem:[%s3839_s9 + $0x20] sm:$0xff]  ;;  %v3170_v15 = vld [vmem:[%s3839_s9 + $0x28] sm:$0xff]  ;;  %v3179_v16 = vld [vmem:[%s3839_s9 + $0x70] sm:$0xff]  ;;  %p3588_p1 = scmp.ne.s32.totalorder %s3586_s30, %s3587_s29  ;;  %p3592_p11 = scmp.lt.s32.totalorder %s3586_s30, %s5915_s11 }
  0x43   : > { %v3171_v17 = vld [vmem:[%s3839_s9 + $0x30] sm:$0xff]  ;;  %v3172_v18 = vld [vmem:[%s3839_s9 + $0x38] sm:$0xff]  ;;  %v3867_v19 = vld [vmem:[%s5906_s2] ss:$0 sm:$0xff]  ;;  %p3593_p9 = scmp.lt.s32.totalorder %s3591_s26, %s3587_s29 }
  0x44   : > { %v3173_v20 = vld [vmem:[%s3839_s9 + $0x40] sm:$0xff]  ;;  %v3180_v25 = vld [vmem:[%s3839_s9 + $0x78] sm:$0xff]  ;;  %v3174_v32 = vld [vmem:[%s3839_s9 + $0x48] sm:$0xff]  ;;  %p3589_p4 = pnand %p3588_p1, %p3805_p3 }
  0x45   : > { %v3175_v43 = vld [vmem:[%s3839_s9 + $0x50] sm:$0xff]  ;;  %v3176_v54 = vld [vmem:[%s3839_s9 + $0x58] sm:$0xff]  ;;  %p3594_p2 = por %p3593_p9, %p3592_p11 }
  0x46   : > { %657 = vmatpush.bf16.msra.mxu0 %v3186_v2  ;;  %3208 = vmatpush.bf16.msra.mxu3 %v3186_v2  ;;  %p3590_p8 = pneg %p3589_p4 }
  0x48   : > { %p3595_p10 = pnand %p3594_p2, %p3590_p8 }
  0x4a   : > { %658 = vmatpush.bf16.msra.mxu0 %v3185_v3  ;;  %3209 = vmatpush.bf16.msra.mxu3 %v3185_v3 }
  0x4e   : > { %659 = vmatpush.bf16.msra.mxu0 %v3184_v4  ;;  %3210 = vmatpush.bf16.msra.mxu3 %v3184_v4 }
  0x52   : > { %660 = vmatpush.bf16.msra.mxu0 %v3183_v5  ;;  %3211 = vmatpush.bf16.msra.mxu3 %v3183_v5 }
  0x56   : > { %661 = vmatpush.bf16.msra.mxu0 %v3182_v6  ;;  %3212 = vmatpush.bf16.msra.mxu3 %v3182_v6 }
  0x5a   : > { %662 = vmatpush.bf16.msra.mxu0 %v3181_v7  ;;  %3213 = vmatpush.bf16.msra.mxu3 %v3181_v7 }
  0x5d   : > { %663 = vmatmul.bf16.vlgmr.msra.gmra.mxu0 %v3165_v8  ;;  %723 = vmatmul.bf16.vlgmr.msra.gmra.mxu3 %v3177_v10 }
  0x6d   : > { %668 = vmatmul.bf16.gmra.mxu0 %v3166_v9  ;;  %728 = vmatmul.bf16.gmra.mxu3 %v3178_v13 }
  0x7d   : > { %673 = vmatmul.bf16.gmra.mxu0 %v3167_v11  ;;  %733 = vmatmul.bf16.gmra.mxu3 %v3179_v16 }
  0x8d   : > { %678 = vmatmul.bf16.gmra.mxu0 %v3168_v12  ;;  %738 = vmatmul.bf16.gmra.mxu3 %v3180_v25 }
  0x9d   : > { %683 = vmatmul.bf16.gmra.mxu0 %v3169_v14 }
  0xad   : > { %688 = vmatmul.bf16.gmra.mxu0 %v3170_v15 }
  0xbd   : > { %693 = vmatmul.bf16.gmra.mxu0 %v3171_v17 }
  0xcd   : > { %698 = vmatmul.bf16.gmra.mxu0 %v3172_v18 }
  0xda   : > { %v664_v21 = vpop.f32.mrf.mxu0 }
  0xdb   : > { %v665_v22 = vadd.f32 %v3867_v19, %v664_v21 }
  0xdd   : > { %v776_v23 = vmul.f32 0.01, %v665_v22  ;;  %703 = vmatmul.bf16.gmra.mxu0 %v3173_v20  ;;  %vm744_vm0 = vcmp.ge.f32.partialorder %v665_v22, 0.0 }
  0xdf   : > { %v3871_v24 = vsel %vm744_vm0, %v665_v22, %v776_v23 }
  0xe0   : > { %840 = vadd.xlane.f32.xlu0 %v3871_v24  ;;  %v904_v26 = vmul.f32 %v3871_v24, %v3871_v24  ;;  %v724_v61 = vpop.f32.mrf.mxu3 }
  0xe1   : > { %v725_v12 = vadd.f32 %v3867_v19, %v724_v61 }
  0xe2   : > { %v666_v27 = vpop.f32.mrf.mxu0  ;;  %936 = vadd.xlane.f32.xlu1 %v904_v26 }
  0xe3   : > { %v667_v28 = vadd.f32 %v3867_v19, %v666_v27  ;;  %v800_v17 = vmul.f32 0.01, %v725_v12  ;;  %vm768_vm11 = vcmp.ge.f32.partialorder %v725_v12, 0.0 }
  0xe5   : > { %v777_v29 = vmul.f32 0.01, %v667_v28  ;;  %vm745_vm1 = vcmp.ge.f32.partialorder %v667_v28, 0.0  ;;  %v3940_v21 = vsel %vm768_vm11, %v725_v12, %v800_v17 }
  0xe6   : > { %v928_v22 = vmul.f32 %v3940_v21, %v3940_v21 }
  0xe7   : > { %v3878_v30 = vsel %vm745_vm1, %v667_v28, %v777_v29 }
  0xe8   : > { %842 = vadd.xlane.f32.xlu0 %v3878_v30  ;;  %v905_v31 = vmul.f32 %v3878_v30, %v3878_v30  ;;  %v726_v4 = vpop.f32.mrf.mxu3 }
  0xe9   : > { %v727_v7 = vadd.f32 %v3867_v19, %v726_v4 }
  0xea   : > { %v669_v33 = vpop.f32.mrf.mxu0  ;;  %938 = vadd.xlane.f32.xlu1 %v905_v31 }
  0xeb   : > { %v670_v34 = vadd.f32 %v3867_v19, %v669_v33  ;;  %v801_v11 = vmul.f32 0.01, %v727_v7  ;;  %vm769_vm9 = vcmp.ge.f32.partialorder %v727_v7, 0.0 }
  0xed   : > { %v778_v35 = vmul.f32 0.01, %v670_v34  ;;  %708 = vmatmul.bf16.gmra.mxu0 %v3174_v32  ;;  %vm746_vm2 = vcmp.ge.f32.partialorder %v670_v34, 0.0  ;;  %v3933_v15 = vsel %vm769_vm9, %v727_v7, %v801_v11 }
  0xef   : > { %v3885_v36 = vsel %vm746_vm2, %v670_v34, %v778_v35 }
  0xf0   : > { %844 = vadd.xlane.f32.xlu2 %v3885_v36  ;;  %v906_v37 = vmul.f32 %v3885_v36, %v3885_v36  ;;  %v729_v31 = vpop.f32.mrf.mxu3 }
  0xf1   : > { %v730_v33 = vadd.f32 %v3867_v19, %v729_v31 }
  0xf2   : > { %v671_v38 = vpop.f32.mrf.mxu0  ;;  %940 = vadd.xlane.f32.xlu0 %v906_v37 }
  0xf3   : > { %v672_v39 = vadd.f32 %v3867_v19, %v671_v38  ;;  %v802_v37 = vmul.f32 0.01, %v730_v33  ;;  %vm770_vm15 = vcmp.ge.f32.partialorder %v730_v33, 0.0 }
  0xf5   : > { %v779_v40 = vmul.f32 0.01, %v672_v39  ;;  %vm747_vm3 = vcmp.ge.f32.partialorder %v672_v39, 0.0 }
  0xf7   : > { %v3891_v41 = vsel %vm747_vm3, %v672_v39, %v779_v40  ;;  %v3196_v39 = vld [vmem:[#allocation7 + $0x38] sm:$0xff] }
  0xf8   : > { %846 = vadd.xlane.f32.xlu2 %v3891_v41  ;;  %v907_v42 = vmul.f32 %v3891_v41, %v3891_v41  ;;  %1700 = vmatpush.bf16.msra.mxu1 %v3196_v39 }
  0xf9   : > { %3214 = vmatpush.bf16.msrb.mxu3 %v3196_v39 }
  0xfa   : > { %v674_v44 = vpop.f32.mrf.mxu0  ;;  %942 = vadd.xlane.f32.xlu1 %v907_v42 }
  0xfb   : > { %v675_v45 = vadd.f32 %v3867_v19, %v674_v44  ;;  %v3195_v44 = vld [vmem:[#allocation7 + $0x30] sm:$0xff] }
  0xfc   : > { %1701 = vmatpush.bf16.msra.mxu1 %v3195_v44 }
  0xfd   : > { %v780_v46 = vmul.f32 0.01, %v675_v45  ;;  %713 = vmatmul.bf16.gmra.mxu0 %v3175_v43  ;;  %vm748_vm4 = vcmp.ge.f32.partialorder %v675_v45, 0.0  ;;  %v3961_v43 = vsel %vm770_vm15, %v730_v33, %v802_v37  ;;  %3215 = vmatpush.bf16.msrb.mxu3 %v3195_v44 }
  0xff   : > { %v3898_v47 = vsel %vm748_vm4, %v675_v45, %v780_v46 }
 0x100   : > { %848 = vadd.xlane.f32.xlu2 %v3898_v47  ;;  %v908_v48 = vmul.f32 %v3898_v47, %v3898_v47 }
 0x102   : > { %v676_v49 = vpop.f32.mrf.mxu0  ;;  %944 = vadd.xlane.f32.xlu1 %v908_v48 }
 0x103   : > { %v677_v50 = vadd.f32 %v3867_v19, %v676_v49  ;;  %v3194_v49 = vld [vmem:[#allocation7 + $0x28] sm:$0xff] }
 0x104   : > { %1702 = vmatpush.bf16.msra.mxu1 %v3194_v49  ;;  %3216 = vmatpush.bf16.msrb.mxu3 %v3194_v49 }
 0x105   : > { %v781_v51 = vmul.f32 0.01, %v677_v50  ;;  %vm749_vm5 = vcmp.ge.f32.partialorder %v677_v50, 0.0 }
 0x107   : > { %v3904_v52 = vsel %vm749_vm5, %v677_v50, %v781_v51  ;;  %v929_v50 = vmul.f32 %v3933_v15, %v3933_v15 }
 0x108   : > { %850 = vadd.xlane.f32.xlu0 %v3904_v52  ;;  %v909_v53 = vmul.f32 %v3904_v52, %v3904_v52 }
 0x10a   : > { %v679_v55 = vpop.f32.mrf.mxu0  ;;  %946 = vadd.xlane.f32.xlu2 %v909_v53 }
 0x10b   : > { %v680_v56 = vadd.f32 %v3867_v19, %v679_v55 }
 0x10d   : > { %v782_v57 = vmul.f32 0.01, %v680_v56  ;;  %718 = vmatmul.bf16.gmra.mxu0 %v3176_v54  ;;  %vm750_vm6 = vcmp.ge.f32.partialorder %v680_v56, 0.0  ;;  %v3193_v54 = vld [vmem:[#allocation7 + $0x20] sm:$0xff] }
 0x10e   : > { %1703 = vmatpush.bf16.msra.mxu1 %v3193_v54  ;;  %3217 = vmatpush.bf16.msrb.mxu3 %v3193_v54 }
 0x10f   : > { %v3911_v58 = vsel %vm750_vm6, %v680_v56, %v782_v57 }
 0x110   : > { %852 = vadd.xlane.f32.xlu0 %v3911_v58  ;;  %v910_v59 = vmul.f32 %v3911_v58, %v3911_v58 }
 0x112   : > { %v681_v60 = vpop.f32.mrf.mxu0  ;;  %948 = vadd.xlane.f32.xlu2 %v910_v59  ;;  %v3192_v59 = vld [vmem:[#allocation7 + $0x18] sm:$0xff] }
 0x113   : > { %v682_v62 = vadd.f32 %v3867_v19, %v681_v60  ;;  %v731_v60 = vpop.f32.mrf.mxu3  ;;  %1704 = vmatpush.bf16.msra.mxu1 %v3192_v59  ;;  %3218 = vmatpush.bf16.msrb.mxu3 %v3192_v59 }
 0x114   : > { %v732_v7 = vadd.f32 %v3867_v19, %v731_v60 }
 0x115   : > { %v783_v63 = vmul.f32 0.01, %v682_v62  ;;  %vm751_vm7 = vcmp.ge.f32.partialorder %v682_v62, 0.0 }
 0x116   : > { %vm771_vm3 = vcmp.ge.f32.partialorder %v732_v7, 0.0 }
 0x117   : > { %v3917_v0 = vsel %vm751_vm7, %v682_v62, %v783_v63 }
 0x118   : > { %854 = vadd.xlane.f32.xlu1 %v3917_v0  ;;  %v911_v1 = vmul.f32 %v3917_v0, %v3917_v0 }
 0x11a   : > { %v684_v2 = vpop.f32.mrf.mxu0  ;;  %950 = vadd.xlane.f32.xlu0 %v911_v1  ;;  %v3191_v1 = vld [vmem:[#allocation7 + $0x10] sm:$0xff] }
 0x11b   : > { %v685_v3 = vadd.f32 %v3867_v19, %v684_v2  ;;  %1705 = vmatpush.bf16.msra.mxu1 %v3191_v1  ;;  %3219 = vmatpush.bf16.msrb.mxu3 %v3191_v1 }
 0x11d   : > { %v784_v5 = vmul.f32 0.01, %v685_v3  ;;  %vm752_vm8 = vcmp.ge.f32.partialorder %v685_v3, 0.0 }
 0x11f   : > { %v3923_v6 = vsel %vm752_vm8, %v685_v3, %v784_v5 }
 0x120   : > { %856 = vadd.xlane.f32.xlu1 %v3923_v6  ;;  %v912_v8 = vmul.f32 %v3923_v6, %v3923_v6 }
 0x122   : > { %v686_v9 = vpop.f32.mrf.mxu0  ;;  %952 = vadd.xlane.f32.xlu0 %v912_v8 }
 0x123   : > { %v687_v10 = vadd.f32 %v3867_v19, %v686_v9 }
 0x125   : > { %v785_v13 = vmul.f32 0.01, %v687_v10  ;;  %vm753_vm10 = vcmp.ge.f32.partialorder %v687_v10, 0.0 }
 0x127   : > { %v3931_v14 = vsel %vm753_vm10, %v687_v10, %v785_v13  ;;  %v3190_v10 = vld [vmem:[#allocation7 + $0x8] sm:$0xff]  ;;  %v734_v13 = vpop.f32.mrf.mxu3 }
 0x128   : > { %858 = vadd.xlane.f32.xlu2 %v3931_v14  ;;  %v913_v16 = vmul.f32 %v3931_v14, %v3931_v14  ;;  %v735_v17 = vadd.f32 %v3867_v19, %v734_v13  ;;  %1706 = vmatpush.bf16.msra.mxu1 %v3190_v10 }
 0x129   : > { %3220 = vmatpush.bf16.msrb.mxu3 %v3190_v10 }
 0x12a   : > { %v689_v18 = vpop.f32.mrf.mxu0  ;;  %890 = vadd.xlane.f32.xlu0 %v3933_v15  ;;  %954 = vadd.xlane.f32.xlu1 %v913_v16  ;;  %vm772_vm4 = vcmp.ge.f32.partialorder %v735_v17, 0.0 }
 0x12b   : > { %v690_v20 = vadd.f32 %v3867_v19, %v689_v18 }
 0x12d   : > { %v786_v23 = vmul.f32 0.01, %v690_v20  ;;  %vm754_vm12 = vcmp.ge.f32.partialorder %v690_v20, 0.0 }
 0x12f   : > { %v3946_v28 = vsel %vm754_vm12, %v690_v20, %v786_v23  ;;  %v930_v20 = vmul.f32 %v3961_v43, %v3961_v43  ;;  %v803_v23 = vmul.f32 0.01, %v732_v7 }
 0x130   : > { %888 = vadd.xlane.f32.xlu2 %v3940_v21  ;;  %v914_v32 = vmul.f32 %v3946_v28, %v3946_v28 }
 0x132   : > { %v691_v25 = vpop.f32.mrf.mxu0  ;;  %984 = vadd.xlane.f32.xlu1 %v928_v22 }
 0x133   : > { %v692_v26 = vadd.f32 %v3867_v19, %v691_v25  ;;  %v3189_v25 = vld [vmem:[#allocation7] sm:$0xff] }
 0x134   : > { %1707 = vmatpush.bf16.msra.mxu1 %v3189_v25  ;;  %3221 = vmatpush.bf16.msrb.mxu3 %v3189_v25 }
 0x135   : > { %v787_v27 = vmul.f32 0.01, %v692_v26  ;;  %vm755_vm13 = vcmp.ge.f32.partialorder %v692_v26, 0.0 }
 0x137   : > { %v3948_v29 = vsel %vm755_vm13, %v692_v26, %v787_v27 }
 0x138   : > { %860 = vadd.xlane.f32.xlu2 %v3946_v28  ;;  %862 = vadd.xlane.f32.xlu0 %v3948_v29  ;;  %v915_v40 = vmul.f32 %v3948_v29, %v3948_v29 }
 0x13a   : > { %v694_v34 = vpop.f32.mrf.mxu0  ;;  %956 = vadd.xlane.f32.xlu1 %v914_v32  ;;  %v804_v32 = vmul.f32 0.01, %v735_v17 }
 0x13b   : > { %v695_v35 = vadd.f32 %v3867_v19, %v694_v34 }
 0x13c   : > { %v4001_v44 = vsel %vm772_vm4, %v735_v17, %v804_v32 }
 0x13d   : > { %v788_v38 = vmul.f32 0.01, %v695_v35  ;;  %vm756_vm14 = vcmp.ge.f32.partialorder %v695_v35, 0.0 }
 0x13f   : > { %v3958_v42 = vsel %vm756_vm14, %v695_v35, %v788_v38  ;;  %v3997_v38 = vsel %vm771_vm3, %v732_v7, %v803_v23 }
 0x140   : > { %958 = vadd.xlane.f32.xlu2 %v915_v40  ;;  %864 = vadd.xlane.f32.xlu0 %v3958_v42  ;;  %v916_v61 = vmul.f32 %v3958_v42, %v3958_v42 }
 0x142   : > { %v696_v45 = vpop.f32.mrf.mxu0  ;;  %892 = vadd.xlane.f32.xlu1 %v3961_v43 }
 0x143   : > { %v697_v46 = vadd.f32 %v3867_v19, %v696_v45 }
 0x145   : > { %vm757_vm0 = vcmp.ge.f32.partialorder %v697_v46, 0.0  ;;  %v789_v48 = vmul.f32 0.01, %v697_v46 }
 0x147   : > { %v3967_v51 = vsel %vm757_vm0, %v697_v46, %v789_v48  ;;  %v931_v46 = vmul.f32 %v3997_v38, %v3997_v38 }
 0x148   : > { %986 = vadd.xlane.f32.xlu2 %v929_v50  ;;  %v917_v53 = vmul.f32 %v3967_v51, %v3967_v51 }
 0x14a   : > { %v699_v55 = vpop.f32.mrf.mxu0  ;;  %962 = vadd.xlane.f32.xlu0 %v917_v53  ;;  %866 = vadd.xlane.f32.xlu1 %v3967_v51 }
 0x14b   : > { %v700_v56 = vadd.f32 %v3867_v19, %v699_v55 }
 0x14d   : > { %vm758_vm1 = vcmp.ge.f32.partialorder %v700_v56, 0.0  ;;  %v790_v57 = vmul.f32 0.01, %v700_v56 }
 0x14f   : > { %v3975_v62 = vsel %vm758_vm1, %v700_v56, %v790_v57 }
 0x150   : > { %960 = vadd.xlane.f32.xlu2 %v916_v61  ;;  %v918_v63 = vmul.f32 %v3975_v62, %v3975_v62 }
 0x152   : > { %v701_v2 = vpop.f32.mrf.mxu0  ;;  %964 = vadd.xlane.f32.xlu0 %v918_v63  ;;  %868 = vadd.xlane.f32.xlu1 %v3975_v62  ;;  %v736_v63 = vpop.f32.mrf.mxu3 }
 0x153   : > { %v702_v3 = vadd.f32 %v3867_v19, %v701_v2  ;;  %v841_v4 = vpop.xlane.xlu0 %840  ;;  %v737_v7 = vadd.f32 %v3867_v19, %v736_v63 }
 0x154   : > { %v3981_v5 = vmul.f32 0.015625, %v841_v4 }
 0x155   : > { %v791_v8 = vmul.f32 0.01, %v702_v3  ;;  %v937_v9 = vpop.xlane.xlu1 %936  ;;  %vm759_vm2 = vcmp.ge.f32.partialorder %v702_v3, 0.0  ;;  %v805_v23 = vmul.f32 0.01, %v737_v7  ;;  %vm773_vm10 = vcmp.ge.f32.partialorder %v737_v7, 0.0 }
 0x156   : > { %v1064_v11 = vmul.f32 %v3981_v5, %v3981_v5  ;;  %v1032_v12 = vmul.f32 0.015625, %v937_v9 }
 0x157   : > { %v3986_v16 = vsel %vm759_vm2, %v702_v3, %v791_v8 }
 0x158   : > { %v1096_v18 = vsub.f32 %v1032_v12, %v1064_v11  ;;  %870 = vadd.xlane.f32.xlu2 %v3986_v16  ;;  %v919_v22 = vmul.f32 %v3986_v16, %v3986_v16 }
 0x15a   : > { %v1128_v26 = vadd.f32 1e-05, %v1096_v18  ;;  %v704_v27 = vpop.f32.mrf.mxu0  ;;  %988 = vadd.xlane.f32.xlu0 %v930_v20  ;;  %966 = vadd.xlane.f32.xlu1 %v919_v22 }
 0x15b   : > { %v705_v31 = vadd.f32 %v3867_v19, %v704_v27  ;;  %v843_v33 = vpop.xlane.xlu0 %842 }
 0x15c   : > { %3318 = vrsqrt.f32 %v1128_v26  ;;  %v3995_v34 = vmul.f32 0.015625, %v843_v33  ;;  %vm1166_vm8 = vweird.f32 %v1128_v26 }
 0x15d   : > { %v792_v35 = vmul.f32 0.01, %v705_v31  ;;  %v939_v37 = vpop.xlane.xlu1 %938  ;;  %vm760_vm5 = vcmp.ge.f32.partialorder %v705_v31, 0.0 }
 0x15e   : > { %v1065_v39 = vmul.f32 %v3995_v34, %v3995_v34  ;;  %v1033_v40 = vmul.f32 0.015625, %v939_v37 }
 0x15f   : > { %v4006_v48 = vsel %vm760_vm5, %v705_v31, %v792_v35  ;;  %v932_v35 = vmul.f32 %v4001_v44, %v4001_v44 }
 0x160   : > { %v1097_v45 = vsub.f32 %v1033_v40, %v1065_v39  ;;  %894 = vadd.xlane.f32.xlu2 %v3997_v38  ;;  %v920_v59 = vmul.f32 %v4006_v48, %v4006_v48  ;;  %v1480_v40 = vsub.f32 %v3871_v24, %v3981_v5 }
 0x162   : > { %v3319_v49 = vpop.eup %3318  ;;  %v4008_v50 = vadd.f32 1e-05, %v1097_v45  ;;  %v706_v53 = vpop.f32.mrf.mxu0  ;;  %896 = vadd.xlane.f32.xlu0 %v4001_v44  ;;  %990 = vadd.xlane.f32.xlu1 %v931_v46 }
 0x163   : > { %v1161_v54 = vmul.f32 %v3319_v49, %v1128_v26  ;;  %v707_v55 = vadd.f32 %v3867_v19, %v706_v53  ;;  %v845_v56 = vpop.xlane.xlu2 %844  ;;  %vm1167_vm7 = vweird.f32 %v3319_v49 }
 0x164   : > { %3320 = vrsqrt.f32 %v4008_v50  ;;  %v4013_v57 = vmul.f32 0.015625, %v845_v56  ;;  %vm4031_vm9 = vmor %vm1166_vm8, %vm1167_vm7  ;;  %vm1176_vm13 = vweird.f32 %v4008_v50 }
 0x165   : > { %v1162_v60 = vmul.f32 %v3319_v49, %v1161_v54  ;;  %v793_v61 = vmul.f32 0.01, %v707_v55  ;;  %v941_v1 = vpop.xlane.xlu0 %940  ;;  %vm761_vm6 = vcmp.ge.f32.partialorder %v707_v55, 0.0  ;;  %v4045_v54 = vsel %vm773_vm10, %v737_v7, %v805_v23  ;;  %v739_v23 = vpop.f32.mrf.mxu3 }
 0x166   : > { %v1066_v2 = vmul.f32 %v4013_v57, %v4013_v57  ;;  %v1034_v3 = vmul.f32 0.015625, %v941_v1 }
 0x167   : > { %v1163_v4 = vmul.f32 0.5, %v1162_v60  ;;  %v4020_v10 = vsel %vm761_vm6, %v707_v55, %v793_v61 }
 0x168   : > { %v1098_v8 = vsub.f32 %v1034_v3, %v1066_v2  ;;  %968 = vadd.xlane.f32.xlu2 %v920_v59  ;;  %v921_v53 = vmul.f32 %v4020_v10, %v4020_v10  ;;  %v1481_v3 = vsub.f32 %v3878_v30, %v3995_v34 }
 0x169   : > { %v1164_v9 = vsub.f32 1.5, %v1163_v4 }
 0x16a   : > { %v3321_v11 = vpop.eup %3320  ;;  %v4022_v12 = vadd.f32 1e-05, %v1098_v8  ;;  %v709_v13 = vpop.f32.mrf.mxu0  ;;  %872 = vadd.xlane.f32.xlu0 %v4006_v48  ;;  %874 = vadd.xlane.f32.xlu1 %v4020_v10 }
 0x16b   : > { %v1165_v17 = vmul.f32 %v3319_v49, %v1164_v9  ;;  %v1171_v18 = vmul.f32 %v3321_v11, %v4008_v50  ;;  %v710_v20 = vadd.f32 %v3867_v19, %v709_v13  ;;  %v847_v22 = vpop.xlane.xlu2 %846  ;;  %vm1177_vm12 = vweird.f32 %v3321_v11 }
 0x16c   : > { %3322 = vrsqrt.f32 %v4022_v12  ;;  %v4029_v25 = vmul.f32 0.015625, %v847_v22  ;;  %vm1178_vm14 = vmor %vm1176_vm13, %vm1177_vm12  ;;  %vm1186_vm1 = vweird.f32 %v4022_v12 }
 0x16d   : > { %v1172_v31 = vmul.f32 %v3321_v11, %v1171_v18  ;;  %v794_v32 = vmul.f32 0.01, %v710_v20  ;;  %v943_v33 = vpop.xlane.xlu1 %942  ;;  %vm762_vm11 = vcmp.ge.f32.partialorder %v710_v20, 0.0  ;;  %v1169_v39 = vsel %vm4031_vm9, %v3319_v49, %v1165_v17  ;;  %v4052_v49 = vld [vmem:[%s5907_s3] ss:$0 sm:$0xff] }
 0x16e   : > { %v1067_v37 = vmul.f32 %v4029_v25, %v4029_v25  ;;  %v1035_v26 = vmul.f32 0.015625, %v943_v33  ;;  %v1512_v59 = vmul.f32 %v1480_v40, %v1169_v39 }
 0x16f   : > { %v1173_v45 = vmul.f32 0.5, %v1172_v31  ;;  %v4047_v56 = vsel %vm762_vm11, %v710_v20, %v794_v32  ;;  %v4078_v20 = vld [vmem:[%s5908_s4] ss:$0 sm:$0xff] }
 0x170   : > { %v1099_v46 = vsub.f32 %v1035_v26, %v1067_v37  ;;  %992 = vadd.xlane.f32.xlu2 %v932_v35  ;;  %v922_v7 = vmul.f32 %v4047_v56, %v4047_v56  ;;  %v1548_v17 = vmul.f32 %v4052_v49, %v1512_v59 }
 0x171   : > { %v1174_v55 = vsub.f32 1.5, %v1173_v45 }
 0x172   : > { %v4054_v60 = vpop.eup %3322  ;;  %v4056_v24 = vadd.f32 1e-05, %v1099_v46  ;;  %v711_v5 = vpop.f32.mrf.mxu0  ;;  %970 = vadd.xlane.f32.xlu0 %v921_v53  ;;  %898 = vadd.xlane.f32.xlu1 %v4045_v54  ;;  %v1584_v26 = vadd.f32 %v4078_v20, %v1548_v17  ;;  %v933_v17 = vmul.f32 %v4045_v54, %v4045_v54 }
 0x173   : > { %v1175_v61 = vmul.f32 %v3321_v11, %v1174_v55  ;;  %v1181_v63 = vmul.f32 %v4054_v60, %v4022_v12  ;;  %v712_v1 = vadd.f32 %v3867_v19, %v711_v5  ;;  %v849_v2 = vpop.xlane.xlu2 %848  ;;  %vm1187_vm0 = vweird.f32 %v4054_v60 }
 0x174   : > { %3324 = vrsqrt.f32 %v4056_v24  ;;  %v4067_v4 = vmul.f32 0.015625, %v849_v2  ;;  %vm4097_vm3 = vmor %vm1186_vm1, %vm1187_vm0  ;;  %vm1196_vm5 = vweird.f32 %v4056_v24 }
 0x175   : > { %v1182_v50 = vmul.f32 %v4054_v60, %v1181_v63  ;;  %v795_v8 = vmul.f32 0.01, %v712_v1  ;;  %v945_v9 = vpop.xlane.xlu1 %944  ;;  %v1179_v13 = vsel %vm1178_vm14, %v3321_v11, %v1175_v61  ;;  %vm763_vm15 = vcmp.ge.f32.partialorder %v712_v1, 0.0 }
 0x176   : > { %v1068_v18 = vmul.f32 %v4067_v4, %v4067_v4  ;;  %v1036_v30 = vmul.f32 0.015625, %v945_v9  ;;  %v1513_v34 = vmul.f32 %v1481_v3, %v1179_v13  ;;  %v1482_v9 = vsub.f32 %v3885_v36, %v4013_v57 }
 0x177   : > { %v1183_v22 = vmul.f32 0.5, %v1182_v50  ;;  %v4082_v32 = vsel %vm763_vm15, %v712_v1, %v795_v8  ;;  %v740_v36 = vadd.f32 %v3867_v19, %v739_v23 }
 0x178   : > { %v1100_v27 = vsub.f32 %v1036_v30, %v1068_v18  ;;  %876 = vadd.xlane.f32.xlu2 %v4047_v56  ;;  %v1549_v11 = vmul.f32 %v4052_v49, %v1513_v34  ;;  %v741_v30 = vpop.f32.mrf.mxu3 }
 0x179   : > { %v1184_v31 = vsub.f32 1.5, %v1183_v22  ;;  %v1483_v22 = vsub.f32 %v3891_v41, %v4029_v25  ;;  %v742_v23 = vadd.f32 %v3867_v19, %v741_v30  ;;  %vm774_vm8 = vcmp.ge.f32.partialorder %v740_v36, 0.0 }
 0x17a   : > { %v3325_v33 = vpop.eup %3324  ;;  %v4084_v35 = vadd.f32 1e-05, %v1100_v27  ;;  %v714_v37 = vpop.f32.mrf.mxu0  ;;  %878 = vadd.xlane.f32.xlu0 %v4082_v32  ;;  %972 = vadd.xlane.f32.xlu1 %v922_v7  ;;  %v1585_v39 = vadd.f32 %v4078_v20, %v1549_v11  ;;  %v923_v7 = vmul.f32 %v4082_v32, %v4082_v32 }
 0x17b   : > { %v1185_v40 = vmul.f32 %v4054_v60, %v1184_v31  ;;  %v1191_v45 = vmul.f32 %v3325_v33, %v4056_v24  ;;  %v715_v46 = vadd.f32 %v3867_v19, %v714_v37  ;;  %v851_v53 = vpop.xlane.xlu0 %850  ;;  %vm1197_vm4 = vweird.f32 %v3325_v33 }
 0x17c   : > { %3326 = vrsqrt.f32 %v4084_v35  ;;  %v4094_v55 = vmul.f32 0.015625, %v851_v53  ;;  %v1616_v59 = vpack.c.bf16 %v1585_v39, %v1584_v26  ;;  %vm1198_vm6 = vmor %vm1196_vm5, %vm1197_vm4  ;;  %vm775_vm10 = vcmp.ge.f32.partialorder %v742_v23, 0.0 }
 0x17d   : > { %v1192_v5 = vmul.f32 %v3325_v33, %v1191_v45  ;;  %v796_v61 = vmul.f32 0.01, %v715_v46  ;;  %v947_v63 = vpop.xlane.xlu2 %946  ;;  %vm764_vm2 = vcmp.ge.f32.partialorder %v715_v46, 0.0  ;;  %v1189_v12 = vsel %vm4097_vm3, %v4054_v60, %v1185_v40 }
 0x17e   : > { %v1069_v2 = vmul.f32 %v4094_v55, %v4094_v55  ;;  %v1037_v3 = vmul.f32 0.015625, %v947_v63  ;;  %1708 = vmatmul.bf16.vlgmr.msra.gmra.mxu1 %v1616_v59  ;;  %v1514_v57 = vmul.f32 %v1482_v9, %v1189_v12  ;;  %v806_v63 = vmul.f32 0.01, %v740_v36 }
 0x17f   : > { %v1193_v50 = vmul.f32 0.5, %v1192_v5  ;;  %v4105_v8 = vsel %vm764_vm2, %v715_v46, %v796_v61  ;;  %vm1206_vm11 = vweird.f32 %v4084_v35 }
 0x180   : > { %v1101_v13 = vsub.f32 %v1037_v3, %v1069_v2  ;;  %974 = vadd.xlane.f32.xlu2 %v923_v7  ;;  %v924_v25 = vmul.f32 %v4105_v8, %v4105_v8  ;;  %v1550_v5 = vmul.f32 %v4052_v49, %v1514_v57  ;;  %v4150_v57 = vsel %vm774_vm8, %v740_v36, %v806_v63 }
 0x181   : > { %v1194_v18 = vsub.f32 1.5, %v1193_v50  ;;  %v934_v36 = vmul.f32 %v4150_v57, %v4150_v57 }
 0x182   : > { %v4114_v34 = vpop.eup %3326  ;;  %v4118_v27 = vadd.f32 1e-05, %v1101_v13  ;;  %v716_v11 = vpop.f32.mrf.mxu0  ;;  %994 = vadd.xlane.f32.xlu0 %v933_v17  ;;  %880 = vadd.xlane.f32.xlu1 %v4105_v8  ;;  %v807_v13 = vmul.f32 0.01, %v742_v23  ;;  %v1586_v17 = vadd.f32 %v4078_v20, %v1550_v5 }
 0x183   : > { %v1195_v60 = vmul.f32 %v3325_v33, %v1194_v18  ;;  %v1201_v31 = vmul.f32 %v4114_v34, %v4084_v35  ;;  %v717_v37 = vadd.f32 %v3867_v19, %v716_v11  ;;  %v853_v26 = vpop.xlane.xlu0 %852  ;;  %vm1207_vm9 = vweird.f32 %v4114_v34 }
 0x184   : > { %3328 = vrsqrt.f32 %v4118_v27  ;;  %v4128_v41 = vmul.f32 0.015625, %v853_v26  ;;  %vm4156_vm12 = vmor %vm1206_vm11, %vm1207_vm9  ;;  %vm1216_vm14 = vweird.f32 %v4118_v27 }
 0x185   : > { %v1202_v39 = vmul.f32 %v4114_v34, %v1201_v31  ;;  %v797_v24 = vmul.f32 0.01, %v717_v37  ;;  %v949_v40 = vpop.xlane.xlu2 %948  ;;  %vm765_vm7 = vcmp.ge.f32.partialorder %v717_v37, 0.0  ;;  %v1199_v45 = vsel %vm1198_vm6, %v3325_v33, %v1195_v60 }
 0x186   : > { %v1070_v46 = vmul.f32 %v4128_v41, %v4128_v41  ;;  %v1038_v53 = vmul.f32 0.015625, %v949_v40  ;;  %v1515_v59 = vmul.f32 %v1483_v22, %v1199_v45 }
 0x187   : > { %v1203_v61 = vmul.f32 0.5, %v1202_v39  ;;  %v4137_v1 = vsel %vm765_vm7, %v717_v37, %v797_v24 }
 0x188   : > { %v1102_v2 = vsub.f32 %v1038_v53, %v1070_v46  ;;  %882 = vadd.xlane.f32.xlu2 %v4137_v1  ;;  %v925_v3 = vmul.f32 %v4137_v1, %v4137_v1  ;;  %v1551_v7 = vmul.f32 %v4052_v49, %v1515_v59  ;;  %v4165_v46 = vsel %vm775_vm10, %v742_v23, %v807_v13 }
 0x189   : > { %v1204_v33 = vsub.f32 1.5, %v1203_v61  ;;  %v1484_v53 = vsub.f32 %v3898_v47, %v4067_v4 }
 0x18a   : > { %v3329_v50 = vpop.eup %3328  ;;  %v4143_v12 = vadd.f32 1e-05, %v1102_v2  ;;  %976 = vadd.xlane.f32.xlu0 %v924_v25  ;;  %978 = vadd.xlane.f32.xlu1 %v925_v3  ;;  %v719_v9 = vpop.f32.mrf.mxu0  ;;  %v1587_v18 = vadd.f32 %v4078_v20, %v1551_v7 }
 0x18b   : > { %v1205_v30 = vmul.f32 %v4114_v34, %v1204_v33  ;;  %v1211_v22 = vmul.f32 %v3329_v50, %v4118_v27  ;;  %v855_v11 = vpop.xlane.xlu1 %854  ;;  %v720_v45 = vadd.f32 %v3867_v19, %v719_v9  ;;  %vm1217_vm13 = vweird.f32 %v3329_v50 }
 0x18c   : > { %3330 = vrsqrt.f32 %v4143_v12  ;;  %v4153_v60 = vmul.f32 0.015625, %v855_v11  ;;  %v1617_v31 = vpack.c.bf16 %v1587_v18, %v1586_v17  ;;  %v1485_v27 = vsub.f32 %v3904_v52, %v4094_v55  ;;  %vm1218_vm15 = vmor %vm1216_vm14, %vm1217_vm13 }
 0x18d   : > { %v1212_v37 = vmul.f32 %v3329_v50, %v1211_v22  ;;  %v951_v26 = vpop.xlane.xlu0 %950  ;;  %v1209_v35 = vsel %vm4156_vm12, %v4114_v34, %v1205_v30  ;;  %v935_v34 = vmul.f32 %v4165_v46, %v4165_v46  ;;  %v798_v3 = vmul.f32 0.01, %v720_v45 }
 0x18e   : > { %v1071_v39 = vmul.f32 %v4153_v60, %v4153_v60  ;;  %v1039_v24 = vmul.f32 0.015625, %v951_v26  ;;  %1713 = vmatmul.bf16.gmra.mxu1 %v1617_v31  ;;  %v1516_v2 = vmul.f32 %v1484_v53, %v1209_v35  ;;  %vm766_vm0 = vcmp.ge.f32.partialorder %v720_v45, 0.0 }
 0x18f   : > { %v1213_v40 = vmul.f32 0.5, %v1212_v37  ;;  %v4194_v31 = vsel %vm766_vm0, %v720_v45, %v798_v3  ;;  %vm1226_vm3 = vweird.f32 %v4143_v12 }
 0x190   : > { %v1103_v59 = vsub.f32 %v1039_v24, %v1071_v39  ;;  %900 = vadd.xlane.f32.xlu2 %v4150_v57  ;;  %v1552_v52 = vmul.f32 %v4052_v49, %v1516_v2  ;;  %v926_v53 = vmul.f32 %v4194_v31, %v4194_v31 }
 0x191   : > { %v1214_v5 = vsub.f32 1.5, %v1213_v40 }
 0x192   : > { %v4173_v61 = vpop.eup %3330  ;;  %v4176_v63 = vadd.f32 1e-05, %v1103_v59  ;;  %902 = vadd.xlane.f32.xlu0 %v4165_v46  ;;  %996 = vadd.xlane.f32.xlu1 %v934_v36  ;;  %v721_v23 = vpop.f32.mrf.mxu0 }
 0x193   : > { %v1215_v47 = vmul.f32 %v3329_v50, %v1214_v5  ;;  %v1221_v4 = vmul.f32 %v4173_v61, %v4143_v12  ;;  %v857_v7 = vpop.xlane.xlu1 %856  ;;  %v722_v33 = vadd.f32 %v3867_v19, %v721_v23  ;;  %vm1227_vm2 = vweird.f32 %v4173_v61 }
 0x194   : > { %3332 = vrsqrt.f32 %v4176_v63  ;;  %v4188_v9 = vmul.f32 0.015625, %v857_v7  ;;  %vm4220_vm4 = vmor %vm1226_vm3, %vm1227_vm2  ;;  %vm1236_vm6 = vweird.f32 %v4176_v63 }
 0x195   : > { %v1222_v13 = vmul.f32 %v4173_v61, %v1221_v4  ;;  %v799_v17 = vmul.f32 0.01, %v722_v33  ;;  %v953_v18 = vpop.xlane.xlu0 %952  ;;  %vm767_vm1 = vcmp.ge.f32.partialorder %v722_v33, 0.0  ;;  %v1219_v30 = vsel %vm1218_vm15, %v3329_v50, %v1215_v47 }
 0x196   : > { %v1072_v22 = vmul.f32 %v4188_v9, %v4188_v9  ;;  %v1040_v19 = vmul.f32 0.015625, %v953_v18  ;;  %v1517_v11 = vmul.f32 %v1485_v27, %v1219_v30  ;;  %v1588_v50 = vadd.f32 %v4078_v20, %v1552_v52 }
 0x197   : > { %v1223_v55 = vmul.f32 0.5, %v1222_v13  ;;  %v4196_v37 = vsel %vm767_vm1, %v722_v33, %v799_v17  ;;  %v1486_v13 = vsub.f32 %v3911_v58, %v4128_v41 }
 0x198   : > { %v1104_v26 = vsub.f32 %v1040_v19, %v1072_v22  ;;  %998 = vadd.xlane.f32.xlu2 %v935_v34  ;;  %v1553_v25 = vmul.f32 %v4052_v49, %v1517_v11  ;;  %v927_v3 = vmul.f32 %v4196_v37, %v4196_v37 }
 0x199   : > { %v1224_v39 = vsub.f32 1.5, %v1223_v55 }
 0x19a   : > { %v3333_v24 = vpop.eup %3332  ;;  %v4199_v36 = vadd.f32 1e-05, %v1104_v26  ;;  %884 = vadd.xlane.f32.xlu0 %v4194_v31  ;;  %886 = vadd.xlane.f32.xlu1 %v4196_v37  ;;  %v1589_v40 = vadd.f32 %v4078_v20, %v1553_v25 }
 0x19b   : > { %v1231_v45 = vmul.f32 %v3333_v24, %v4176_v63  ;;  %v859_v35 = vpop.xlane.xlu2 %858  ;;  %v1225_v59 = vmul.f32 %v4173_v61, %v1224_v39  ;;  %vm1237_vm5 = vweird.f32 %v3333_v24 }
 0x19c   : > { %3334 = vrsqrt.f32 %v4199_v36  ;;  %v4211_v5 = vmul.f32 0.015625, %v859_v35  ;;  %v1618_v23 = vpack.c.bf16 %v1589_v40, %v1588_v50  ;;  %vm1238_vm7 = vmor %vm1236_vm6, %vm1237_vm5  ;;  %vm1246_vm9 = vweird.f32 %v4199_v36 }
 0x19d   : > { %v1232_v34 = vmul.f32 %v3333_v24, %v1231_v45  ;;  %v955_v2 = vpop.xlane.xlu1 %954  ;;  %v1229_v12 = vsel %vm4220_vm4, %v4173_v61, %v1225_v59  ;;  %v4231_v11 = vpop.xlane.xlu0 %890  ;;  %v1487_v61 = vsub.f32 %v3917_v0, %v4153_v60 }
 0x19e   : > { %v1073_v47 = vmul.f32 %v4211_v5, %v4211_v5  ;;  %v1041_v4 = vmul.f32 0.015625, %v955_v2  ;;  %1718 = vmatmul.bf16.gmra.mxu1 %v1618_v23  ;;  %v1518_v55 = vmul.f32 %v1486_v13, %v1229_v12 }
 0x19f   : > { %v1233_v33 = vmul.f32 0.5, %v1232_v34 }
 0x1a0   : > { %v1105_v27 = vsub.f32 %v1041_v4, %v1073_v47  ;;  %980 = vadd.xlane.f32.xlu2 %v926_v53  ;;  %v1554_v45 = vmul.f32 %v4052_v49, %v1518_v55 }
 0x1a1   : > { %v1234_v17 = vsub.f32 1.5, %v1233_v33 }
 0x1a2   : > { %v3335_v18 = vpop.eup %3334  ;;  %v1137_v30 = vadd.f32 1e-05, %v1105_v27  ;;  %982 = vadd.xlane.f32.xlu0 %v927_v3 }
 0x1a3   : > { %v1235_v22 = vmul.f32 %v3333_v24, %v1234_v17  ;;  %v1241_v19 = vmul.f32 %v3335_v18, %v4199_v36  ;;  %v889_v52 = vpop.xlane.xlu2 %888  ;;  %vm1247_vm8 = vweird.f32 %v3335_v18 }
 0x1a4   : > { %3336 = vrsqrt.f32 %v1137_v30  ;;  %v4235_v58 = vmul.f32 0.015625, %v889_v52  ;;  %vm1248_vm10 = vmor %vm1246_vm9, %vm1247_vm8  ;;  %vm1256_vm12 = vweird.f32 %v1137_v30 }
 0x1a5   : > { %v1242_v41 = vmul.f32 %v3335_v18, %v1241_v19  ;;  %v985_v26 = vpop.xlane.xlu1 %984  ;;  %v1239_v25 = vsel %vm1238_vm7, %v3333_v24, %v1235_v22  ;;  %v1590_v24 = vadd.f32 %v4078_v20, %v1554_v45  ;;  %v1488_v22 = vsub.f32 %v3923_v6, %v4188_v9 }
 0x1a6   : > { %v1088_v39 = vmul.f32 %v4235_v58, %v4235_v58  ;;  %v1056_v63 = vmul.f32 0.015625, %v985_v26  ;;  %v1519_v50 = vmul.f32 %v1487_v61, %v1239_v25  ;;  %v1489_v6 = vsub.f32 %v3931_v14, %v4211_v5 }
 0x1a7   : > { %v1243_v40 = vmul.f32 0.5, %v1242_v41 }
 0x1a8   : > { %v1555_v35 = vmul.f32 %v4052_v49, %v1519_v50  ;;  %v1120_v59 = vsub.f32 %v1056_v63, %v1088_v39 }
 0x1a9   : > { %v1244_v53 = vsub.f32 1.5, %v1243_v40 }
 0x1aa   : > { %v3337_v0 = vpop.eup %3336  ;;  %v1591_v60 = vadd.f32 %v4078_v20, %v1555_v35  ;;  %v4245_v7 = vadd.f32 1e-05, %v1120_v59 }
 0x1ab   : > { %v1251_v23 = vmul.f32 %v3337_v0, %v1137_v30  ;;  %v861_v34 = vpop.xlane.xlu2 %860  ;;  %v863_v2 = vpop.xlane.xlu0 %862  ;;  %v1245_v47 = vmul.f32 %v3335_v18, %v1244_v53  ;;  %vm1257_vm11 = vweird.f32 %v3337_v0 }
 0x1ac   : > { %v4243_v4 = vmul.f32 0.015625, %v861_v34  ;;  %v1619_v27 = vpack.c.bf16 %v1591_v60, %v1590_v24  ;;  %v4252_v19 = vmul.f32 0.015625, %v863_v2  ;;  %3338 = vrsqrt.f32 %v4245_v7  ;;  %vm1258_vm13 = vmor %vm1256_vm12, %vm1257_vm11 }
 0x1ad   : > { %v1252_v3 = vmul.f32 %v3337_v0, %v1251_v23  ;;  %v957_v33 = vpop.xlane.xlu1 %956  ;;  %v1249_v52 = vsel %vm1248_vm10, %v3335_v18, %v1245_v47  ;;  %v4264_v60 = vmul.f32 0.015625, %v4231_v11  ;;  %vm1406_vm5 = vweird.f32 %v4245_v7 }
 0x1ae   : > { %v1074_v12 = vmul.f32 %v4243_v4, %v4243_v4  ;;  %v1042_v17 = vmul.f32 0.015625, %v957_v33  ;;  %1723 = vmatmul.bf16.gmra.mxu1 %v1619_v27  ;;  %v1520_v25 = vmul.f32 %v1488_v22, %v1249_v52  ;;  %v1075_v39 = vmul.f32 %v4252_v19, %v4252_v19 }
 0x1af   : > { %v1253_v13 = vmul.f32 0.5, %v1252_v3  ;;  %v1089_v2 = vmul.f32 %v4264_v60, %v4264_v60 }
 0x1b0   : > { %v1106_v61 = vsub.f32 %v1042_v17, %v1074_v12  ;;  %v1556_v30 = vmul.f32 %v4052_v49, %v1520_v25 }
 0x1b1   : > { %v1254_v55 = vsub.f32 1.5, %v1253_v13 }
 0x1b2   : > { %v1138_v36 = vadd.f32 1e-05, %v1106_v61  ;;  %v4259_v45 = vpop.eup %3338 }
 0x1b3   : > { %v1255_v41 = vmul.f32 %v3337_v0, %v1254_v55  ;;  %v959_v26 = vpop.xlane.xlu2 %958  ;;  %v865_v9 = vpop.xlane.xlu0 %864  ;;  %v1401_v23 = vmul.f32 %v4259_v45, %v4245_v7  ;;  %vm1407_vm3 = vweird.f32 %v4259_v45 }
 0x1b4   : > { %v1043_v63 = vmul.f32 0.015625, %v959_v26  ;;  %3340 = vrsqrt.f32 %v1138_v36  ;;  %v4279_v22 = vmul.f32 0.015625, %v865_v9  ;;  %vm1266_vm15 = vweird.f32 %v1138_v36  ;;  %vm4325_vm6 = vmor %vm1406_vm5, %vm1407_vm3 }
 0x1b5   : > { %v893_v18 = vpop.xlane.xlu1 %892  ;;  %v1259_v50 = vsel %vm1258_vm13, %v3337_v0, %v1255_v41  ;;  %v1592_v0 = vadd.f32 %v4078_v20, %v1556_v30  ;;  %v1402_v27 = vmul.f32 %v4259_v45, %v1401_v23 }
 0x1b6   : > { %v1107_v40 = vsub.f32 %v1043_v63, %v1075_v39  ;;  %v1521_v35 = vmul.f32 %v1489_v6, %v1259_v50  ;;  %v1076_v9 = vmul.f32 %v4279_v22, %v4279_v22 }
 0x1b7   : > { %v1403_v39 = vmul.f32 0.5, %v1402_v27  ;;  %v4303_v27 = vmul.f32 0.015625, %v893_v18  ;;  %v1491_v18 = vsub.f32 %v3948_v29, %v4252_v19 }
 0x1b8   : > { %v1139_v53 = vadd.f32 1e-05, %v1107_v40  ;;  %v1557_v59 = vmul.f32 %v4052_v49, %v1521_v35 }
 0x1b9   : > { %v1090_v29 = vmul.f32 %v4303_v27, %v4303_v27 }
 0x1ba   : > { %3342 = vrsqrt.f32 %v1139_v53  ;;  %v4268_v14 = vpop.eup %3340  ;;  %v1593_v34 = vadd.f32 %v4078_v20, %v1557_v59  ;;  %vm1276_vm2 = vweird.f32 %v1139_v53 }
 0x1bb   : > { %v987_v5 = vpop.xlane.xlu2 %986  ;;  %v1261_v24 = vmul.f32 %v4268_v14, %v1138_v36  ;;  %vm1267_vm14 = vweird.f32 %v4268_v14 }
 0x1bc   : > { %v1057_v47 = vmul.f32 0.015625, %v987_v5  ;;  %v1620_v33 = vpack.c.bf16 %v1593_v34, %v1592_v0  ;;  %v1404_v34 = vsub.f32 1.5, %v1403_v39  ;;  %vm4295_vm0 = vmor %vm1266_vm15, %vm1267_vm14 }
 0x1bd   : > { %v963_v3 = vpop.xlane.xlu0 %962  ;;  %v867_v11 = vpop.xlane.xlu1 %866  ;;  %v1262_v12 = vmul.f32 %v4268_v14, %v1261_v24  ;;  %v1490_v24 = vsub.f32 %v3946_v28, %v4243_v4 }
 0x1be   : > { %v1121_v13 = vsub.f32 %v1057_v47, %v1089_v2  ;;  %v4277_v17 = vmul.f32 0.015625, %v867_v11  ;;  %1728 = vmatmul.bf16.gmra.mxu1 %v1620_v33  ;;  %v1045_v41 = vmul.f32 0.015625, %v963_v3 }
 0x1bf   : > { %v1263_v55 = vmul.f32 0.5, %v1262_v12 }
 0x1c0   : > { %v3343_v52 = vpop.eup %3342  ;;  %v4281_v61 = vadd.f32 1e-05, %v1121_v13  ;;  %v1077_v26 = vmul.f32 %v4277_v17, %v4277_v17 }
 0x1c1   : > { %v1271_v25 = vmul.f32 %v3343_v52, %v1139_v53  ;;  %v1264_v63 = vsub.f32 1.5, %v1263_v55  ;;  %vm1277_vm1 = vweird.f32 %v3343_v52 }
 0x1c2   : > { %3344 = vrsqrt.f32 %v4281_v61  ;;  %v1109_v6 = vsub.f32 %v1045_v41, %v1077_v26  ;;  %v1405_v41 = vmul.f32 %v4259_v45, %v1404_v34  ;;  %vm1278_vm4 = vmor %vm1276_vm2, %vm1277_vm1  ;;  %vm1416_vm8 = vweird.f32 %v4281_v61 }
 0x1c3   : > { %v1272_v50 = vmul.f32 %v3343_v52, %v1271_v25  ;;  %v961_v40 = vpop.xlane.xlu2 %960  ;;  %v1265_v35 = vmul.f32 %v4268_v14, %v1264_v63 }
 0x1c4   : > { %v4290_v30 = vadd.f32 1e-05, %v1109_v6  ;;  %v1044_v59 = vmul.f32 0.015625, %v961_v40  ;;  %v1409_v7 = vsel %vm4325_vm6, %v4259_v45, %v1405_v41 }
 0x1c5   : > { %v1273_v23 = vmul.f32 0.5, %v1272_v50  ;;  %v965_v5 = vpop.xlane.xlu0 %964  ;;  %v869_v0 = vpop.xlane.xlu1 %868  ;;  %v1269_v12 = vsel %vm4295_vm0, %v4268_v14, %v1265_v35 }
 0x1c6   : > { %3346 = vrsqrt.f32 %v4290_v30  ;;  %v1108_v2 = vsub.f32 %v1044_v59, %v1076_v9  ;;  %v4299_v11 = vmul.f32 0.015625, %v869_v0  ;;  %v1046_v13 = vmul.f32 0.015625, %v965_v5 }
 0x1c7   : > { %v1274_v3 = vsub.f32 1.5, %v1273_v23  ;;  %v1522_v39 = vmul.f32 %v1490_v24, %v1269_v12  ;;  %vm1296_vm11 = vweird.f32 %v4290_v30 }
 0x1c8   : > { %v4301_v33 = vpop.eup %3344  ;;  %v4305_v36 = vadd.f32 1e-05, %v1108_v2  ;;  %v1078_v55 = vmul.f32 %v4299_v11, %v4299_v11 }
 0x1c9   : > { %v1275_v28 = vmul.f32 %v3343_v52, %v1274_v3  ;;  %v1411_v4 = vmul.f32 %v4301_v33, %v4281_v61  ;;  %v1558_v24 = vmul.f32 %v4052_v49, %v1522_v39  ;;  %vm1417_vm7 = vweird.f32 %v4301_v33 }
 0x1ca   : > { %3348 = vrsqrt.f32 %v4305_v36  ;;  %v1110_v14 = vsub.f32 %v1046_v13, %v1078_v55  ;;  %vm4358_vm9 = vmor %vm1416_vm8, %vm1417_vm7  ;;  %vm1286_vm14 = vweird.f32 %v4305_v36 }
 0x1cb   : > { %v1412_v53 = vmul.f32 %v4301_v33, %v1411_v4  ;;  %v871_v26 = vpop.xlane.xlu2 %870  ;;  %v1279_v25 = vsel %vm1278_vm4, %v3343_v52, %v1275_v28  ;;  %v1504_v28 = vsub.f32 %v3940_v21, %v4235_v58 }
 0x1cc   : > { %v4320_v63 = vpop.eup %3346  ;;  %v4323_v6 = vmul.f32 0.015625, %v871_v26  ;;  %v1523_v50 = vmul.f32 %v1491_v18, %v1279_v25  ;;  %v4333_v52 = vadd.f32 1e-05, %v1110_v14  ;;  %v1594_v25 = vadd.f32 %v4078_v20, %v1558_v24 }
 0x1cd   : > { %v1413_v19 = vmul.f32 0.5, %v1412_v53  ;;  %v1291_v40 = vmul.f32 %v4320_v63, %v4290_v30  ;;  %v989_v35 = vpop.xlane.xlu0 %988  ;;  %v967_v59 = vpop.xlane.xlu1 %966  ;;  %v1536_v39 = vmul.f32 %v1504_v28, %v1409_v7  ;;  %vm1297_vm10 = vweird.f32 %v4320_v63 }
 0x1ce   : > { %v1079_v23 = vmul.f32 %v4323_v6, %v4323_v6  ;;  %v1058_v5 = vmul.f32 0.015625, %v989_v35  ;;  %v1047_v0 = vmul.f32 0.015625, %v967_v59  ;;  %3350 = vrsqrt.f32 %v4333_v52  ;;  %vm4384_vm12 = vmor %vm1296_vm11, %vm1297_vm10 }
 0x1cf   : > { %v1414_v34 = vsub.f32 1.5, %v1413_v19  ;;  %v1292_v2 = vmul.f32 %v4320_v63, %v1291_v40  ;;  %v1559_v45 = vmul.f32 %v4052_v49, %v1523_v50  ;;  %v1505_v7 = vsub.f32 %v3933_v15, %v4264_v60 }
 0x1d0   : > { %v4343_v47 = vpop.eup %3348  ;;  %v1122_v3 = vsub.f32 %v1058_v5, %v1090_v29  ;;  %v1111_v12 = vsub.f32 %v1047_v0, %v1079_v23  ;;  %vm1306_vm0 = vweird.f32 %v4333_v52 }
 0x1d1   : > { %v1415_v4 = vmul.f32 %v4301_v33, %v1414_v34  ;;  %v1293_v13 = vmul.f32 0.5, %v1292_v2  ;;  %v1281_v55 = vmul.f32 %v4343_v47, %v4305_v36  ;;  %v1595_v53 = vadd.f32 %v4078_v20, %v1559_v45 }
 0x1d2   : > { %v4353_v41 = vadd.f32 1e-05, %v1122_v3  ;;  %v4355_v18 = vadd.f32 1e-05, %v1111_v12  ;;  %vm1287_vm13 = vweird.f32 %v4343_v47  ;;  %v1572_v2 = vmul.f32 %v4052_v49, %v1536_v39 }
 0x1d3   : > { %v1294_v26 = vsub.f32 1.5, %v1293_v13  ;;  %v1282_v21 = vmul.f32 %v4343_v47, %v1281_v55  ;;  %v895_v58 = vpop.xlane.xlu2 %894  ;;  %v1419_v61 = vsel %vm4358_vm9, %v4301_v33, %v1415_v4  ;;  %v1621_v40 = vpack.c.bf16 %v1595_v53, %v1594_v25  ;;  %vm4405_vm15 = vmor %vm1286_vm14, %vm1287_vm13 }
 0x1d4   : > { %3352 = vrsqrt.f32 %v4353_v41  ;;  %v4369_v50 = vmul.f32 0.015625, %v895_v58  ;;  %v4371_v9 = vpop.eup %3350  ;;  %v1537_v60 = vmul.f32 %v1505_v7, %v1419_v61  ;;  %v1493_v45 = vsub.f32 %v3967_v51, %v4277_v17 }
 0x1d5   : > { %v1295_v29 = vmul.f32 %v4320_v63, %v1294_v26  ;;  %v1283_v19 = vmul.f32 0.5, %v1282_v21  ;;  %3354 = vrsqrt.f32 %v4355_v18  ;;  %v897_v35 = vpop.xlane.xlu0 %896  ;;  %v991_v59 = vpop.xlane.xlu1 %990  ;;  %v1301_v33 = vmul.f32 %v4371_v9, %v4333_v52  ;;  %1733 = vmatmul.bf16.gmra.mxu1 %v1621_v40 }
 0x1d6   : > { %v1091_v23 = vmul.f32 %v4369_v50, %v4369_v50  ;;  %v1059_v0 = vmul.f32 0.015625, %v991_v59  ;;  %v1573_v4 = vmul.f32 %v4052_v49, %v1537_v60  ;;  %v1492_v55 = vsub.f32 %v3958_v42, %v4279_v22 }
 0x1d7   : > { %v1284_v5 = vsub.f32 1.5, %v1283_v19  ;;  %v1302_v15 = vmul.f32 %v4371_v9, %v1301_v33  ;;  %v1299_v30 = vsel %vm4384_vm12, %v4320_v63, %v1295_v29  ;;  %v1608_v26 = vadd.f32 %v4078_v20, %v1572_v2 }
 0x1d8   : > { %v1123_v3 = vsub.f32 %v1059_v0, %v1091_v23  ;;  %v1525_v17 = vmul.f32 %v1493_v45, %v1299_v30  ;;  %v1609_v58 = vadd.f32 %v4078_v20, %v1573_v4  ;;  %vm1307_vm1 = vweird.f32 %v4371_v9 }
 0x1d9   : > { %v1285_v24 = vmul.f32 %v4343_v47, %v1284_v5  ;;  %v1303_v28 = vmul.f32 0.5, %v1302_v15  ;;  %v4431_v0 = vmul.f32 0.015625, %v897_v35  ;;  %vm1316_vm3 = vweird.f32 %v4355_v18  ;;  %vm4443_vm5 = vmor %vm1306_vm0, %vm1307_vm1 }
 0x1da   : > { %v4395_v12 = vpop.eup %3352  ;;  %v4411_v14 = vadd.f32 1e-05, %v1123_v3  ;;  %v1628_v40 = vpack.c.bf16 %v1609_v58, %v1608_v26  ;;  %v1561_v23 = vmul.f32 %v4052_v49, %v1525_v17  ;;  %v1494_v58 = vsub.f32 %v3975_v62, %v4299_v11 }
 0x1db   : > { %v4401_v13 = vpop.eup %3354  ;;  %v1421_v53 = vmul.f32 %v4395_v12, %v4353_v41  ;;  %v969_v51 = vpop.xlane.xlu2 %968  ;;  %v1289_v42 = vsel %vm4405_vm15, %v4343_v47, %v1285_v24  ;;  %v1304_v22 = vsub.f32 1.5, %v1303_v28  ;;  %vm1427_vm2 = vweird.f32 %v4395_v12 }
 0x1dc   : > { %v1311_v36 = vmul.f32 %v4401_v13, %v4355_v18  ;;  %3356 = vrsqrt.f32 %v4411_v14  ;;  %v1524_v59 = vmul.f32 %v1492_v55, %v1289_v42  ;;  %v1048_v47 = vmul.f32 0.015625, %v969_v51  ;;  %1768 = vmatmul.bf16.vlgmr.msrb.gmra.mxu3 %v1628_v40 }
 0x1dd   : > { %v1422_v21 = vmul.f32 %v4395_v12, %v1421_v53  ;;  %v873_v25 = vpop.xlane.xlu0 %872  ;;  %v875_v39 = vpop.xlane.xlu1 %874  ;;  %v1305_v5 = vmul.f32 %v4371_v9, %v1304_v22  ;;  %vm1317_vm4 = vweird.f32 %v4401_v13  ;;  %v1092_v3 = vmul.f32 %v4431_v0, %v4431_v0 }
 0x1de   : > { %v1312_v61 = vmul.f32 %v4401_v13, %v1311_v36  ;;  %v4423_v29 = vmul.f32 0.015625, %v873_v25  ;;  %v4433_v34 = vmul.f32 0.015625, %v875_v39  ;;  %v1560_v30 = vmul.f32 %v4052_v49, %v1524_v59  ;;  %vm4466_vm6 = vmor %vm1316_vm3, %vm1317_vm4 }
 0x1df   : > { %v1423_v19 = vmul.f32 0.5, %v1422_v21  ;;  %v1597_v63 = vadd.f32 %v4078_v20, %v1561_v23  ;;  %v1309_v53 = vsel %vm4443_vm5, %v4371_v9, %v1305_v5  ;;  %vm1426_vm7 = vweird.f32 %v4353_v41 }
 0x1e0   : > { %v1313_v7 = vmul.f32 0.5, %v1312_v61  ;;  %v1080_v33 = vmul.f32 %v4423_v29, %v4423_v29  ;;  %v1081_v51 = vmul.f32 %v4433_v34, %v4433_v34  ;;  %v1596_v17 = vadd.f32 %v4078_v20, %v1560_v30  ;;  %vm4478_vm8 = vmor %vm1426_vm7, %vm1427_vm2 }
 0x1e1   : > { %v1424_v15 = vsub.f32 1.5, %v1423_v19  ;;  %v1526_v59 = vmul.f32 %v1494_v58, %v1309_v53  ;;  %v1495_v62 = vsub.f32 %v3986_v16, %v4323_v6  ;;  %vm1436_vm10 = vweird.f32 %v4411_v14 }
 0x1e2   : > { %v1314_v60 = vsub.f32 1.5, %v1313_v7  ;;  %v1112_v2 = vsub.f32 %v1048_v47, %v1080_v33  ;;  %v3357_v24 = vpop.eup %3356  ;;  %v1622_v39 = vpack.c.bf16 %v1597_v63, %v1596_v17  ;;  %v1506_v47 = vsub.f32 %v3961_v43, %v4303_v27 }
 0x1e3   : > { %v993_v35 = vpop.xlane.xlu2 %992  ;;  %v1431_v4 = vmul.f32 %v3357_v24, %v4411_v14  ;;  %v1425_v42 = vmul.f32 %v4395_v12, %v1424_v15  ;;  %vm1437_vm9 = vweird.f32 %v3357_v24  ;;  %v1562_v43 = vmul.f32 %v4052_v49, %v1526_v59 }
 0x1e4   : > { %v1315_v28 = vmul.f32 %v4401_v13, %v1314_v60  ;;  %v4449_v55 = vadd.f32 1e-05, %v1112_v2  ;;  %v1060_v52 = vmul.f32 0.015625, %v993_v35  ;;  %v1507_v2 = vsub.f32 %v3997_v38, %v4369_v50  ;;  %vm1438_vm11 = vmor %vm1436_vm10, %vm1437_vm9 }
 0x1e5   : > { %v971_v36 = vpop.xlane.xlu0 %970  ;;  %v899_v26 = vpop.xlane.xlu1 %898  ;;  %v1432_v22 = vmul.f32 %v3357_v24, %v1431_v4  ;;  %1738 = vmatmul.bf16.gmra.mxu1 %v1622_v39  ;;  %v1598_v38 = vadd.f32 %v4078_v20, %v1562_v43  ;;  %v1496_v43 = vsub.f32 %v4006_v48, %v4423_v29 }
 0x1e6   : > { %3358 = vrsqrt.f32 %v4449_v55  ;;  %v1049_v21 = vmul.f32 0.015625, %v971_v36  ;;  %v1124_v25 = vsub.f32 %v1060_v52, %v1092_v3  ;;  %v1319_v40 = vsel %vm4466_vm6, %v4401_v13, %v1315_v28 }
 0x1e7   : > { %v1433_v61 = vmul.f32 0.5, %v1432_v22  ;;  %v1429_v13 = vsel %vm4478_vm8, %v4395_v12, %v1425_v42  ;;  %v1527_v6 = vmul.f32 %v1495_v62, %v1319_v40  ;;  %vm1326_vm12 = vweird.f32 %v4449_v55  ;;  %v4526_v42 = vld [vmem:[%s5907_s3] ss:$0 sm:$0xff] }
 0x1e8   : > { %v1113_v19 = vsub.f32 %v1049_v21, %v1081_v51  ;;  %v4482_v18 = vadd.f32 1e-05, %v1124_v25  ;;  %v1538_v27 = vmul.f32 %v1506_v47, %v1429_v13  ;;  %v4519_v36 = vmul.f32 0.015625, %v899_v26 }
 0x1e9   : > { %v1434_v41 = vsub.f32 1.5, %v1433_v61  ;;  %v1563_v14 = vmul.f32 %v4052_v49, %v1527_v6  ;;  %v1508_v6 = vsub.f32 %v4001_v44, %v4431_v0 }
 0x1ea   : > { %v4484_v7 = vadd.f32 1e-05, %v1113_v19  ;;  %3360 = vrsqrt.f32 %v4482_v18  ;;  %v1574_v50 = vmul.f32 %v4052_v49, %v1538_v27  ;;  %v1093_v13 = vmul.f32 %v4519_v36, %v4519_v36 }
 0x1eb   : > { %v877_v16 = vpop.xlane.xlu2 %876  ;;  %v1435_v23 = vmul.f32 %v3357_v24, %v1434_v41  ;;  %v1599_v9 = vadd.f32 %v4078_v20, %v1563_v14  ;;  %vm1446_vm2 = vweird.f32 %v4482_v18 }
 0x1ec   : > { %v4492_v33 = vpop.eup %3358  ;;  %3362 = vrsqrt.f32 %v4484_v7  ;;  %v4495_v5 = vmul.f32 0.015625, %v877_v16  ;;  %v1610_v62 = vadd.f32 %v4078_v20, %v1574_v50  ;;  %vm1336_vm0 = vweird.f32 %v4484_v7 }
 0x1ed   : > { %v1321_v12 = vmul.f32 %v4492_v33, %v4449_v55  ;;  %v879_v15 = vpop.xlane.xlu0 %878  ;;  %v973_v60 = vpop.xlane.xlu1 %972  ;;  %v1439_v45 = vsel %vm1438_vm11, %v3357_v24, %v1435_v23  ;;  %vm1327_vm13 = vweird.f32 %v4492_v33  ;;  %v4563_v55 = vld [vmem:[%s5910_s6] ss:$0 sm:$0xff] }
 0x1ee   : > { %v1082_v30 = vmul.f32 %v4495_v5, %v4495_v5  ;;  %v1050_v3 = vmul.f32 0.015625, %v973_v60  ;;  %v4508_v28 = vmul.f32 0.015625, %v879_v15  ;;  %v1539_v63 = vmul.f32 %v1507_v2, %v1439_v45  ;;  %vm4549_vm14 = vmor %vm1326_vm12, %vm1327_vm13 }
 0x1ef   : > { %v1322_v35 = vmul.f32 %v4492_v33, %v1321_v12  ;;  %v1623_v15 = vpack.c.bf16 %v1599_v9, %v1598_v38 }
 0x1f0   : > { %v1114_v4 = vsub.f32 %v1050_v3, %v1082_v30  ;;  %v4510_v53 = vpop.eup %3360  ;;  %v1575_v22 = vmul.f32 %v4526_v42, %v1539_v63  ;;  %v1083_v25 = vmul.f32 %v4508_v28, %v4508_v28  ;;  %v1497_v30 = vsub.f32 %v4020_v10, %v4433_v34 }
 0x1f1   : > { %v1323_v51 = vmul.f32 0.5, %v1322_v35  ;;  %v1441_v17 = vmul.f32 %v4510_v53, %v4482_v18  ;;  %vm1447_vm3 = vweird.f32 %v4510_v53 }
 0x1f2   : > { %v4515_v52 = vpop.eup %3362  ;;  %v4521_v24 = vadd.f32 1e-05, %v1114_v4  ;;  %v1611_v11 = vadd.f32 %v4078_v20, %v1575_v22  ;;  %vm4621_vm6 = vmor %vm1446_vm2, %vm1447_vm3 }
 0x1f3   : > { %v1324_v21 = vsub.f32 1.5, %v1323_v51  ;;  %v1331_v49 = vmul.f32 %v4515_v52, %v4484_v7  ;;  %v975_v58 = vpop.xlane.xlu2 %974  ;;  %v1442_v26 = vmul.f32 %v4510_v53, %v1441_v17  ;;  %vm1337_vm15 = vweird.f32 %v4515_v52 }
 0x1f4   : > { %3364 = vrsqrt.f32 %v4521_v24  ;;  %v1051_v39 = vmul.f32 0.015625, %v975_v58  ;;  %v1629_v20 = vpack.c.bf16 %v1611_v11, %v1610_v62  ;;  %vm4583_vm1 = vmor %vm1336_vm0, %vm1337_vm15  ;;  %vm1346_vm5 = vweird.f32 %v4521_v24 }
 0x1f5   : > { %v1325_v61 = vmul.f32 %v4492_v33, %v1324_v21  ;;  %v1332_v19 = vmul.f32 %v4515_v52, %v1331_v49  ;;  %v995_v40 = vpop.xlane.xlu0 %994  ;;  %v881_v59 = vpop.xlane.xlu1 %880  ;;  %v1443_v41 = vmul.f32 0.5, %v1442_v26  ;;  %1743 = vmatmul.bf16.gmra.mxu1 %v1623_v15 }
 0x1f6   : > { %v1115_v47 = vsub.f32 %v1051_v39, %v1083_v25  ;;  %v1061_v16 = vmul.f32 0.015625, %v995_v40  ;;  %1773 = vmatmul.bf16.gmra.mxu3 %v1629_v20  ;;  %v4575_v14 = vmul.f32 0.015625, %v881_v59  ;;  %v1498_v59 = vsub.f32 %v4047_v56, %v4495_v5 }
 0x1f7   : > { %v1333_v12 = vmul.f32 0.5, %v1332_v19  ;;  %v1329_v60 = vsel %vm4549_vm14, %v4492_v33, %v1325_v61  ;;  %v1509_v33 = vsub.f32 %v4045_v54, %v4519_v36  ;;  %v1444_v29 = vsub.f32 1.5, %v1443_v41 }
 0x1f8   : > { %v4558_v27 = vadd.f32 1e-05, %v1115_v47  ;;  %v1125_v2 = vsub.f32 %v1061_v16, %v1093_v13  ;;  %v1528_v45 = vmul.f32 %v1496_v43, %v1329_v60  ;;  %v1084_v38 = vmul.f32 %v4575_v14, %v4575_v14 }
 0x1f9   : > { %v1334_v3 = vsub.f32 1.5, %v1333_v12  ;;  %v1445_v58 = vmul.f32 %v4510_v53, %v1444_v29  ;;  %v1499_v41 = vsub.f32 %v4082_v32, %v4508_v28  ;;  %v1500_v0 = vsub.f32 %v4105_v8, %v4575_v14 }
 0x1fa   : > { %v4570_v48 = vpop.eup %3364  ;;  %3366 = vrsqrt.f32 %v4558_v27  ;;  %v4573_v35 = vadd.f32 1e-05, %v1125_v2  ;;  %vm1356_vm11 = vweird.f32 %v4558_v27 }
 0x1fb   : > { %v1335_v10 = vmul.f32 %v4515_v52, %v1334_v3  ;;  %v1341_v34 = vmul.f32 %v4570_v48, %v4521_v24  ;;  %v883_v4 = vpop.xlane.xlu2 %882  ;;  %v1709_v63 = vpop.f32.mrf.mxu1  ;;  %vm1347_vm7 = vweird.f32 %v4570_v48  ;;  %v1449_v3 = vsel %vm4621_vm6, %v4510_v53, %v1445_v58 }
 0x1fc   : > { %3368 = vrsqrt.f32 %v4573_v35  ;;  %v4590_v50 = vmul.f32 0.015625, %v883_v4  ;;  %v1710_v7 = vadd.f32 %v4563_v55, %v1709_v63  ;;  %vm4665_vm10 = vmor %vm1346_vm5, %vm1347_vm7  ;;  %vm1456_vm13 = vweird.f32 %v4573_v35 }
 0x1fd   : > { %v1342_v17 = vmul.f32 %v4570_v48, %v1341_v34  ;;  %v977_v22 = vpop.xlane.xlu0 %976  ;;  %v979_v21 = vpop.xlane.xlu1 %978  ;;  %v1339_v49 = vsel %vm4583_vm1, %v4515_v52, %v1335_v10  ;;  %v1564_v52 = vmul.f32 %v4526_v42, %v1528_v45  ;;  %v4645_v10 = vld [vmem:[%s5908_s4] ss:$0 sm:$0xff] }
 0x1fe   : > { %v1085_v9 = vmul.f32 %v4590_v50, %v4590_v50  ;;  %v1821_v26 = vmul.f32 0.01, %v1710_v7  ;;  %v1052_v25 = vmul.f32 0.015625, %v977_v22  ;;  %v1053_v61 = vmul.f32 0.015625, %v979_v21 }
 0x1ff   : > { %v1343_v39 = vmul.f32 0.5, %v1342_v17  ;;  %vm1789_vm4 = vcmp.ge.f32.partialorder %v1710_v7, 0.0  ;;  %v1529_v19 = vmul.f32 %v1497_v30, %v1339_v49  ;;  %v1600_v34 = vadd.f32 %v4645_v10, %v1564_v52 }
 0x200   : > { %v4602_v40 = vpop.eup %3366  ;;  %v1116_v62 = vsub.f32 %v1052_v25, %v1084_v38  ;;  %v4606_v11 = vsel %vm1789_vm4, %v1710_v7, %v1821_v26  ;;  %v1117_v47 = vsub.f32 %v1053_v61, %v1085_v9  ;;  %v1540_v21 = vmul.f32 %v1508_v6, %v1449_v3 }
 0x201   : > { %v1351_v13 = vmul.f32 %v4602_v40, %v4558_v27  ;;  %1885 = vadd.xlane.f32.xlu1 %v4606_v11  ;;  %v1344_v12 = vsub.f32 1.5, %v1343_v39  ;;  %v1949_v20 = vmul.f32 %v4606_v11, %v4606_v11  ;;  %v1565_v60 = vmul.f32 %v4526_v42, %v1529_v19 }
 0x202   : > { %v4615_v16 = vpop.eup %3368  ;;  %v4625_v15 = vadd.f32 1e-05, %v1116_v62  ;;  %v4638_v29 = vadd.f32 1e-05, %v1117_v47  ;;  %vm1357_vm8 = vweird.f32 %v4602_v40  ;;  %v1501_v6 = vsub.f32 %v4137_v1, %v4590_v50 }
 0x203   : > { %v1352_v43 = vmul.f32 %v4602_v40, %v1351_v13  ;;  %v1451_v2 = vmul.f32 %v4615_v16, %v4573_v35  ;;  %v901_v18 = vpop.xlane.xlu2 %900  ;;  %v1711_v30 = vpop.f32.mrf.mxu1  ;;  %1981 = vadd.xlane.f32.xlu0 %v1949_v20  ;;  %v1601_v7 = vadd.f32 %v4645_v10, %v1565_v60  ;;  %v1345_v17 = vmul.f32 %v4570_v48, %v1344_v12  ;;  %vm4686_vm12 = vmor %vm1356_vm11, %vm1357_vm8 }
 0x204   : > { %3370 = vrsqrt.f32 %v4625_v15  ;;  %v4640_v45 = vmul.f32 0.015625, %v901_v18  ;;  %v1712_v51 = vadd.f32 %v4563_v55, %v1711_v30  ;;  %vm1457_vm14 = vweird.f32 %v4615_v16 }
 0x205   : > { %v1353_v4 = vmul.f32 0.5, %v1352_v43  ;;  %v1452_v63 = vmul.f32 %v4615_v16, %v1451_v2  ;;  %v903_v53 = vpop.xlane.xlu0 %902  ;;  %v997_v38 = vpop.xlane.xlu1 %996  ;;  %3372 = vrsqrt.f32 %v4638_v29  ;;  %v1624_v39 = vpack.c.bf16 %v1601_v7, %v1600_v34  ;;  %vm4744_vm4 = vmor %vm1456_vm13, %vm1457_vm14 }
 0x206   : > { %v1094_v22 = vmul.f32 %v4640_v45, %v4640_v45  ;;  %v1822_v9 = vmul.f32 0.01, %v1712_v51  ;;  %v4659_v26 = vmul.f32 0.015625, %v903_v53  ;;  %v1062_v25 = vmul.f32 0.015625, %v997_v38 }
 0x207   : > { %v1354_v49 = vsub.f32 1.5, %v1353_v4  ;;  %v1453_v58 = vmul.f32 0.5, %v1452_v63  ;;  %vm1790_vm9 = vcmp.ge.f32.partialorder %v1712_v51, 0.0  ;;  %1748 = vmatmul.bf16.gmra.mxu1 %v1624_v39  ;;  %v1349_v13 = vsel %vm4665_vm10, %v4570_v48, %v1345_v17 }
 0x208   : > { %v1095_v62 = vmul.f32 %v4659_v26, %v4659_v26  ;;  %v1126_v24 = vsub.f32 %v1062_v25, %v1094_v22  ;;  %v4679_v52 = vsel %vm1790_vm9, %v1712_v51, %v1822_v9  ;;  %v1576_v48 = vmul.f32 %v4526_v42, %v1540_v21 }
 0x209   : > { %v1355_v44 = vmul.f32 %v4602_v40, %v1354_v49  ;;  %v1454_v47 = vsub.f32 1.5, %v1453_v58  ;;  %1887 = vadd.xlane.f32.xlu2 %v4679_v52  ;;  %v1950_v20 = vmul.f32 %v4679_v52, %v4679_v52  ;;  %v1530_v51 = vmul.f32 %v1498_v59, %v1349_v13 }
 0x20a   : > { %v4675_v19 = vpop.eup %3370  ;;  %v4699_v2 = vadd.f32 1e-05, %v1126_v24  ;;  %vm1366_vm15 = vweird.f32 %v4625_v15  ;;  %vm1376_vm0 = vweird.f32 %v4638_v29  ;;  %v1510_v8 = vsub.f32 %v4150_v57, %v4640_v45 }
 0x20b   : > { %v1361_v23 = vmul.f32 %v4675_v19, %v4625_v15  ;;  %v999_v12 = vpop.xlane.xlu2 %998  ;;  %v1714_v60 = vpop.f32.mrf.mxu1  ;;  %v1359_v3 = vsel %vm4686_vm12, %v4602_v40, %v1355_v44  ;;  %1983 = vadd.xlane.f32.xlu1 %v1950_v20  ;;  %v1455_v7 = vmul.f32 %v4615_v16, %v1454_v47  ;;  %v1566_v49 = vmul.f32 %v4526_v42, %v1530_v51 }
 0x20c   : > { %v4697_v43 = vpop.eup %3372  ;;  %v1063_v18 = vmul.f32 0.015625, %v999_v12  ;;  %v1715_v30 = vadd.f32 %v4563_v55, %v1714_v60  ;;  %v1531_v53 = vmul.f32 %v1499_v41, %v1359_v3  ;;  %3374 = vrsqrt.f32 %v4699_v2 }
 0x20d   : > { %v1362_v34 = vmul.f32 %v4675_v19, %v1361_v23  ;;  %v1371_v4 = vmul.f32 %v4697_v43, %v4638_v29  ;;  %v885_v63 = vpop.xlane.xlu0 %884  ;;  %v887_v38 = vpop.xlane.xlu1 %886  ;;  %vm1367_vm2 = vweird.f32 %v4675_v19  ;;  %vm1377_vm3 = vweird.f32 %v4697_v43 }
 0x20e   : > { %v1127_v40 = vsub.f32 %v1063_v18, %v1095_v62  ;;  %v1823_v56 = vmul.f32 0.01, %v1715_v30  ;;  %v4722_v32 = vmul.f32 0.015625, %v885_v63  ;;  %vm1791_vm1 = vcmp.ge.f32.partialorder %v1715_v30, 0.0  ;;  %vm4765_vm5 = vmor %vm1366_vm15, %vm1367_vm2 }
 0x20f   : > { %v1363_v17 = vmul.f32 0.5, %v1362_v34  ;;  %v1372_v22 = vmul.f32 %v4697_v43, %v1371_v4  ;;  %v1567_v28 = vmul.f32 %v4526_v42, %v1531_v53  ;;  %v4725_v21 = vmul.f32 0.015625, %v887_v38  ;;  %vm4777_vm7 = vmor %vm1376_vm0, %vm1377_vm3 }
 0x210   : > { %v4720_v5 = vadd.f32 1e-05, %v1127_v40  ;;  %v1086_v58 = vmul.f32 %v4722_v32, %v4722_v32  ;;  %v4736_v61 = vsel %vm1791_vm1, %v1715_v30, %v1823_v56  ;;  %v1602_v18 = vadd.f32 %v4645_v10, %v1566_v49 }
 0x211   : > { %v1364_v59 = vsub.f32 1.5, %v1363_v17  ;;  %v1373_v41 = vmul.f32 0.5, %v1372_v22  ;;  %v1087_v39 = vmul.f32 %v4725_v21, %v4725_v21  ;;  %1889 = vadd.xlane.f32.xlu2 %v4736_v61  ;;  %v1951_v23 = vmul.f32 %v4736_v61, %v4736_v61 }
 0x212   : > { %3376 = vrsqrt.f32 %v4720_v5  ;;  %v4738_v24 = vpop.eup %3374  ;;  %v1603_v12 = vadd.f32 %v4645_v10, %v1567_v28  ;;  %v1459_v30 = vsel %vm4744_vm4, %v4615_v16, %v1455_v7  ;;  %v1612_v63 = vadd.f32 %v4645_v10, %v1576_v48 }
 0x213   : > { %v1365_v9 = vmul.f32 %v4675_v19, %v1364_v59  ;;  %v1374_v25 = vsub.f32 1.5, %v1373_v41  ;;  %v981_v44 = vpop.xlane.xlu2 %980  ;;  %v1716_v62 = vpop.f32.mrf.mxu1  ;;  %v1461_v60 = vmul.f32 %v4738_v24, %v4699_v2  ;;  %1985 = vadd.xlane.f32.xlu1 %v1951_v23  ;;  %v1541_v16 = vmul.f32 %v1509_v33, %v1459_v30 }
 0x214   : > { %v1054_v27 = vmul.f32 0.015625, %v981_v44  ;;  %v1717_v47 = vadd.f32 %v4563_v55, %v1716_v62  ;;  %v1625_v40 = vpack.c.bf16 %v1603_v12, %v1602_v18  ;;  %vm1466_vm8 = vweird.f32 %v4699_v2 }
 0x215   : > { %v1375_v20 = vmul.f32 %v4697_v43, %v1374_v25  ;;  %v983_v35 = vpop.xlane.xlu0 %982  ;;  %v1462_v53 = vmul.f32 %v4738_v24, %v1461_v60  ;;  %v1369_v54 = vsel %vm4765_vm5, %v4675_v19, %v1365_v9  ;;  %v1577_v22 = vmul.f32 %v4526_v42, %v1541_v16 }
 0x216   : > { %v1118_v3 = vsub.f32 %v1054_v27, %v1086_v58  ;;  %v1824_v34 = vmul.f32 0.01, %v1717_v47  ;;  %v1055_v4 = vmul.f32 0.015625, %v983_v35  ;;  %vm1792_vm6 = vcmp.ge.f32.partialorder %v1717_v47, 0.0 }
 0x217   : > { %v1463_v36 = vmul.f32 0.5, %v1462_v53  ;;  %v1379_v29 = vsel %vm4777_vm7, %v4697_v43, %v1375_v20  ;;  %1753 = vmatmul.bf16.gmra.mxu1 %v1625_v40  ;;  %vm1467_vm9 = vweird.f32 %v4738_v24  ;;  %v1613_v41 = vadd.f32 %v4645_v10, %v1577_v22 }
 0x218   : > { %v3377_v38 = vpop.eup %3376  ;;  %v4781_v15 = vadd.f32 1e-05, %v1118_v3  ;;  %v1119_v7 = vsub.f32 %v1055_v4, %v1087_v39  ;;  %v4783_v17 = vsel %vm1792_vm6, %v1717_v47, %v1824_v34  ;;  %v1532_v58 = vmul.f32 %v1500_v0, %v1369_v54  ;;  %vm4813_vm10 = vmor %vm1466_vm8, %vm1467_vm9 }
 0x219   : > { %v1471_v33 = vmul.f32 %v3377_v38, %v4720_v5  ;;  %1891 = vadd.xlane.f32.xlu0 %v4783_v17  ;;  %v1952_v19 = vmul.f32 %v4783_v17, %v4783_v17  ;;  %v1464_v28 = vsub.f32 1.5, %v1463_v36  ;;  %v1533_v9 = vmul.f32 %v1501_v6, %v1379_v29 }
 0x21a   : > { %3378 = vrsqrt.f32 %v4781_v15  ;;  %v4796_v56 = vadd.f32 1e-05, %v1119_v7  ;;  %v1630_v44 = vpack.c.bf16 %v1613_v41, %v1612_v63  ;;  %vm1477_vm12 = vweird.f32 %v3377_v38 }
 0x21b   : > { %v1472_v59 = vmul.f32 %v3377_v38, %v1471_v33  ;;  %v1719_v49 = vpop.f32.mrf.mxu1  ;;  %1987 = vadd.xlane.f32.xlu2 %v1952_v19  ;;  %v1465_v25 = vmul.f32 %v4738_v24, %v1464_v28  ;;  %vm1476_vm13 = vweird.f32 %v4720_v5  ;;  %v1568_v6 = vmul.f32 %v4526_v42, %v1532_v58 }
 0x21c   : > { %3380 = vrsqrt.f32 %v4796_v56  ;;  %v1720_v43 = vadd.f32 %v4563_v55, %v1719_v49  ;;  %1778 = vmatmul.bf16.gmra.mxu3 %v1630_v44  ;;  %v1569_v2 = vmul.f32 %v4526_v42, %v1533_v9  ;;  %vm1478_vm14 = vmor %vm1476_vm13, %vm1477_vm12  ;;  %vm1386_vm15 = vweird.f32 %v4781_v15 }
 0x21d   : > { %v1473_v39 = vmul.f32 0.5, %v1472_v59  ;;  %v1469_v1 = vsel %vm4813_vm10, %v4738_v24, %v1465_v25  ;;  %v1511_v24 = vsub.f32 %v4165_v46, %v4659_v26  ;;  %v1604_v18 = vadd.f32 %v4645_v10, %v1568_v6 }
 0x21e   : > { %v1825_v13 = vmul.f32 0.01, %v1720_v43  ;;  %vm1793_vm11 = vcmp.ge.f32.partialorder %v1720_v43, 0.0  ;;  %v1542_v45 = vmul.f32 %v1510_v8, %v1469_v1  ;;  %v1605_v30 = vadd.f32 %v4645_v10, %v1569_v2 }
 0x21f   : > { %v1474_v14 = vsub.f32 1.5, %v1473_v39  ;;  %vm1396_vm2 = vweird.f32 %v4796_v56  ;;  %v1502_v33 = vsub.f32 %v4194_v31, %v4722_v32  ;;  %v1503_v28 = vsub.f32 %v4196_v37, %v4725_v21 }
 0x220   : > { %v3379_v50 = vpop.eup %3378  ;;  %v4823_v0 = vsel %vm1793_vm11, %v1720_v43, %v1825_v13  ;;  %v1578_v63 = vmul.f32 %v4526_v42, %v1542_v45  ;;  %v1626_v40 = vpack.c.bf16 %v1605_v30, %v1604_v18 }
 0x221   : > { %v1475_v27 = vmul.f32 %v3377_v38, %v1474_v14  ;;  %v1381_v47 = vmul.f32 %v3379_v50, %v4781_v15  ;;  %1893 = vadd.xlane.f32.xlu0 %v4823_v0  ;;  %v1953_v57 = vmul.f32 %v4823_v0, %v4823_v0  ;;  %vm1387_vm1 = vweird.f32 %v3379_v50 }
 0x222   : > { %v3381_v23 = vpop.eup %3380  ;;  %v1614_v36 = vadd.f32 %v4645_v10, %v1578_v63  ;;  %vm1388_vm4 = vmor %vm1386_vm15, %vm1387_vm1 }
 0x223   : > { %v1382_v5 = vmul.f32 %v3379_v50, %v1381_v47  ;;  %v1391_v12 = vmul.f32 %v3381_v23, %v4796_v56  ;;  %v1721_v20 = vpop.f32.mrf.mxu1  ;;  %v1479_v60 = vsel %vm1478_vm14, %v3377_v38, %v1475_v27  ;;  %1989 = vadd.xlane.f32.xlu2 %v1953_v57  ;;  %vm1397_vm3 = vweird.f32 %v3381_v23 }
 0x224   : > { %v1722_v35 = vadd.f32 %v4563_v55, %v1721_v20  ;;  %v1543_v3 = vmul.f32 %v1511_v24, %v1479_v60  ;;  %vm1398_vm5 = vmor %vm1396_vm2, %vm1397_vm3 }
 0x225   : > { %v1383_v34 = vmul.f32 0.5, %v1382_v5  ;;  %v1392_v4 = vmul.f32 %v3381_v23, %v1391_v12 }
 0x226   : > { %v1826_v46 = vmul.f32 0.01, %v1722_v35  ;;  %vm1794_vm0 = vcmp.ge.f32.partialorder %v1722_v35, 0.0  ;;  %v1579_v26 = vmul.f32 %v4526_v42, %v1543_v3  ;;  %v3204_v3 = vld [vmem:[#allocation8 + $0x38] sm:$0xff] }
 0x227   : > { %v1384_v51 = vsub.f32 1.5, %v1383_v34  ;;  %v1393_v53 = vmul.f32 0.5, %v1392_v4  ;;  %1758 = vmatmul.bf16.gmra.mxu1 %v1626_v40  ;;  %2745 = vmatpush.bf16.msra.mxu2 %v3204_v3 }
 0x228   : > { %v4842_v16 = vsel %vm1794_vm0, %v1722_v35, %v1826_v46  ;;  %v1615_v38 = vadd.f32 %v4645_v10, %v1579_v26  ;;  %3222 = vmatpush.bf16.msra.mxu3 %v3204_v3  ;;  %v3203_v46 = vld [vmem:[#allocation8 + $0x30] sm:$0xff] }
 0x229   : > { %v1385_v48 = vmul.f32 %v3379_v50, %v1384_v51  ;;  %v1394_v7 = vsub.f32 1.5, %v1393_v53  ;;  %1895 = vadd.xlane.f32.xlu1 %v4842_v16  ;;  %v1954_v54 = vmul.f32 %v4842_v16, %v4842_v16 }
 0x22a   : > { %v1631_v29 = vpack.c.bf16 %v1615_v38, %v1614_v36 }
 0x22b   : > { %v1395_v22 = vmul.f32 %v3381_v23, %v1394_v7  ;;  %1991 = vadd.xlane.f32.xlu0 %v1954_v54  ;;  %v1389_v19 = vsel %vm1388_vm4, %v3379_v50, %v1385_v48  ;;  %v1724_v59 = vpop.f32.mrf.mxu1  ;;  %2746 = vmatpush.bf16.msra.mxu2 %v3203_v46  ;;  %v3202_v48 = vld [vmem:[#allocation8 + $0x28] sm:$0xff] }
 0x22c   : > { %v1534_v41 = vmul.f32 %v1502_v33, %v1389_v19  ;;  %v1725_v49 = vadd.f32 %v4563_v55, %v1724_v59  ;;  %1783 = vmatmul.bf16.gmra.mxu3 %v1631_v29 }
 0x22d   : > { %v1399_v31 = vsel %vm1398_vm5, %v3381_v23, %v1395_v22  ;;  %3223 = vmatpush.bf16.msra.mxu3 %v3203_v46  ;;  %v3201_v22 = vld [vmem:[#allocation8 + $0x20] sm:$0xff] }
 0x22e   : > { %v1535_v32 = vmul.f32 %v1503_v28, %v1399_v31  ;;  %v1827_v15 = vmul.f32 0.01, %v1725_v49  ;;  %vm1795_vm6 = vcmp.ge.f32.partialorder %v1725_v49, 0.0  ;;  %v1570_v43 = vmul.f32 %v4526_v42, %v1534_v41  ;;  %v3200_v31 = vld [vmem:[#allocation8 + $0x18] sm:$0xff] }
 0x22f   : > { %2747 = vmatpush.bf16.msra.mxu2 %v3202_v48 }
 0x230   : > { %v1571_v58 = vmul.f32 %v4526_v42, %v1535_v32  ;;  %v4861_v9 = vsel %vm1795_vm6, %v1725_v49, %v1827_v15  ;;  %v1606_v25 = vadd.f32 %v4645_v10, %v1570_v43 }
 0x231   : > { %1897 = vadd.xlane.f32.xlu1 %v4861_v9  ;;  %v1955_v37 = vmul.f32 %v4861_v9, %v4861_v9  ;;  %3224 = vmatpush.bf16.msra.mxu3 %v3202_v48 }
 0x232   : > { %v1607_v21 = vadd.f32 %v4645_v10, %v1571_v58 }
 0x233   : > { %v1726_v56 = vpop.f32.mrf.mxu1  ;;  %1993 = vadd.xlane.f32.xlu0 %v1955_v37  ;;  %2748 = vmatpush.bf16.msra.mxu2 %v3201_v22  ;;  %v3199_v37 = vld [vmem:[#allocation8 + $0x10] sm:$0xff] }
 0x234   : > { %v1727_v39 = vadd.f32 %v4563_v55, %v1726_v56  ;;  %v1627_v44 = vpack.c.bf16 %v1607_v21, %v1606_v25 }
 0x235   : > { %3225 = vmatpush.bf16.msra.mxu3 %v3201_v22 }
 0x236   : > { %v1828_v62 = vmul.f32 0.01, %v1727_v39  ;;  %vm1796_vm7 = vcmp.ge.f32.partialorder %v1727_v39, 0.0 }
 0x237   : > { %1763 = vmatmul.bf16.gmra.mxu1 %v1627_v44  ;;  %2749 = vmatpush.bf16.msra.mxu2 %v3200_v31 }
 0x238   : > { %v4869_v13 = vsel %vm1796_vm7, %v1727_v39, %v1828_v62 }
 0x239   : > { %1899 = vadd.xlane.f32.xlu2 %v4869_v13  ;;  %v1956_v42 = vmul.f32 %v4869_v13, %v4869_v13  ;;  %3226 = vmatpush.bf16.msra.mxu3 %v3200_v31 }
 0x23b   : > { %1995 = vadd.xlane.f32.xlu1 %v1956_v42  ;;  %v1729_v8 = vpop.f32.mrf.mxu1  ;;  %2750 = vmatpush.bf16.msra.mxu2 %v3199_v37 }
 0x23c   : > { %v1730_v14 = vadd.f32 %v4563_v55, %v1729_v8  ;;  %v3198_v8 = vld [vmem:[#allocation8 + $0x8] sm:$0xff] }
 0x23d   : > { %3227 = vmatpush.bf16.msra.mxu3 %v3199_v37 }
 0x23e   : > { %v1829_v1 = vmul.f32 0.01, %v1730_v14  ;;  %vm1797_vm8 = vcmp.ge.f32.partialorder %v1730_v14, 0.0 }
 0x23f   : > { %2751 = vmatpush.bf16.msra.mxu2 %v3198_v8 }
 0x240   : > { %v4875_v10 = vsel %vm1797_vm8, %v1730_v14, %v1829_v1 }
 0x241   : > { %1901 = vadd.xlane.f32.xlu2 %v4875_v10  ;;  %v1957_v50 = vmul.f32 %v4875_v10, %v4875_v10  ;;  %3228 = vmatpush.bf16.msra.mxu3 %v3198_v8 }
 0x243   : > { %v1731_v6 = vpop.f32.mrf.mxu1  ;;  %1997 = vadd.xlane.f32.xlu1 %v1957_v50 }
 0x244   : > { %v1732_v2 = vadd.f32 %v4563_v55, %v1731_v6 }
 0x246   : > { %v1830_v27 = vmul.f32 0.01, %v1732_v2  ;;  %vm1798_vm9 = vcmp.ge.f32.partialorder %v1732_v2, 0.0 }
 0x248   : > { %v4881_v47 = vsel %vm1798_vm9, %v1732_v2, %v1830_v27 }
 0x249   : > { %1903 = vadd.xlane.f32.xlu0 %v4881_v47  ;;  %v1958_v57 = vmul.f32 %v4881_v47, %v4881_v47 }
 0x24b   : > { %1999 = vadd.xlane.f32.xlu2 %v1958_v57 }
 0x252   : > { %v1734_v45 = vpop.f32.mrf.mxu1 }
 0x253   : > { %v1735_v60 = vadd.f32 %v4563_v55, %v1734_v45  ;;  %v3197_v45 = vld [vmem:[#allocation8] sm:$0xff] }
 0x254   : > { %2752 = vmatpush.bf16.msra.mxu2 %v3197_v45  ;;  %3229 = vmatpush.bf16.msra.mxu3 %v3197_v45 }
 0x255   : > { %v1831_v34 = vmul.f32 0.01, %v1735_v60  ;;  %vm1799_vm12 = vcmp.ge.f32.partialorder %v1735_v60, 0.0 }
 0x257   : > { %v4898_v51 = vsel %vm1799_vm12, %v1735_v60, %v1831_v34 }
 0x258   : > { %v1959_v38 = vmul.f32 %v4898_v51, %v4898_v51 }
 0x25a   : > { %v1736_v23 = vpop.f32.mrf.mxu1 }
 0x25b   : > { %v1737_v24 = vadd.f32 %v4563_v55, %v1736_v23 }
 0x25d   : > { %v1832_v5 = vmul.f32 0.01, %v1737_v24  ;;  %vm1800_vm10 = vcmp.ge.f32.partialorder %v1737_v24, 0.0 }
 0x25f   : > { %v4887_v12 = vsel %vm1800_vm10, %v1737_v24, %v1832_v5  ;;  %v1769_v20 = vpop.f32.mrf.mxu3 }
 0x260   : > { %1907 = vadd.xlane.f32.xlu1 %v4887_v12  ;;  %v1770_v35 = vadd.f32 %v4563_v55, %v1769_v20  ;;  %v1960_v62 = vmul.f32 %v4887_v12, %v4887_v12 }
 0x262   : > { %v4892_v18 = vpop.f32.mrf.mxu1  ;;  %v1845_v30 = vmul.f32 0.01, %v1770_v35  ;;  %vm1813_vm11 = vcmp.ge.f32.partialorder %v1770_v35, 0.0 }
 0x263   : > { %v1740_v50 = vadd.f32 %v4563_v55, %v4892_v18 }
 0x264   : > { %v4894_v4 = vsel %vm1813_vm11, %v1770_v35, %v1845_v30 }
 0x265   : > { %1933 = vadd.xlane.f32.xlu2 %v4894_v4  ;;  %v1833_v20 = vmul.f32 0.01, %v1740_v50  ;;  %vm1801_vm0 = vcmp.ge.f32.partialorder %v1740_v50, 0.0 }
 0x267   : > { %v1771_v63 = vpop.f32.mrf.mxu3 }
 0x268   : > { %v1772_v26 = vadd.f32 %v4563_v55, %v1771_v63  ;;  %v1973_v63 = vmul.f32 %v4894_v4, %v4894_v4 }
 0x26a   : > { %v1741_v53 = vpop.f32.mrf.mxu1  ;;  %v1846_v40 = vmul.f32 0.01, %v1772_v26  ;;  %vm1814_vm13 = vcmp.ge.f32.partialorder %v1772_v26, 0.0 }
 0x26b   : > { %v1742_v7 = vadd.f32 %v4563_v55, %v1741_v53 }
 0x26c   : > { %v4903_v54 = vsel %vm1814_vm13, %v1772_v26, %v1846_v40 }
 0x26d   : > { %1935 = vadd.xlane.f32.xlu0 %v4903_v54  ;;  %2001 = vadd.xlane.f32.xlu2 %v1959_v38  ;;  %v1974_v36 = vmul.f32 %v4903_v54, %v4903_v54  ;;  %v1834_v29 = vmul.f32 0.01, %v1742_v7  ;;  %vm1802_vm14 = vcmp.ge.f32.partialorder %v1742_v7, 0.0  ;;  %v4950_v38 = vsel %vm1801_vm0, %v1740_v50, %v1833_v20 }
 0x26f   : > { %2031 = vadd.xlane.f32.xlu1 %v1974_v36  ;;  %v4912_v32 = vsel %vm1802_vm14, %v1742_v7, %v1834_v29 }
 0x272   : > { %v1744_v28 = vpop.f32.mrf.mxu1 }
 0x273   : > { %v1745_v3 = vadd.f32 %v4563_v55, %v1744_v28 }
 0x274   : > { %v1886_v33 = vpop.xlane.xlu1 %1885 }
 0x275   : > { %v4908_v19 = vmul.f32 0.015625, %v1886_v33  ;;  %1905 = vadd.xlane.f32.xlu0 %v4898_v51  ;;  %1911 = vadd.xlane.f32.xlu2 %v4912_v32  ;;  %v1835_v7 = vmul.f32 0.01, %v1745_v3  ;;  %vm1803_vm2 = vcmp.ge.f32.partialorder %v1745_v3, 0.0 }
 0x276   : > { %v1982_v41 = vpop.xlane.xlu0 %1981 }
 0x277   : > { %v2109_v59 = vmul.f32 %v4908_v19, %v4908_v19  ;;  %v2077_v49 = vmul.f32 0.015625, %v1982_v41 }
 0x279   : > { %v2141_v15 = vsub.f32 %v2077_v49, %v2109_v59  ;;  %v1774_v58 = vpop.f32.mrf.mxu3 }
 0x27a   : > { %v1775_v21 = vadd.f32 %v4563_v55, %v1774_v58  ;;  %v1746_v25 = vpop.f32.mrf.mxu1  ;;  %v1961_v58 = vmul.f32 %v4950_v38, %v4950_v38 }
 0x27b   : > { %v4916_v43 = vadd.f32 1e-05, %v2141_v15  ;;  %v1747_v29 = vadd.f32 %v4563_v55, %v1746_v25  ;;  %v1962_v25 = vmul.f32 %v4912_v32, %v4912_v32 }
 0x27c   : > { %v1888_v56 = vpop.xlane.xlu2 %1887  ;;  %v1847_v39 = vmul.f32 0.01, %v1775_v21  ;;  %vm1815_vm15 = vcmp.ge.f32.partialorder %v1775_v21, 0.0 }
 0x27d   : > { %3382 = vrsqrt.f32 %v4916_v43  ;;  %v4920_v44 = vmul.f32 0.015625, %v1888_v56  ;;  %2003 = vadd.xlane.f32.xlu0 %v1960_v62  ;;  %vm1804_vm4 = vcmp.ge.f32.partialorder %v1747_v29, 0.0  ;;  %vm2211_vm5 = vweird.f32 %v4916_v43 }
 0x27e   : > { %v1984_v42 = vpop.xlane.xlu1 %1983  ;;  %v4928_v6 = vsel %vm1815_vm15, %v1775_v21, %v1847_v39  ;;  %v4963_v39 = vsel %vm1803_vm2, %v1745_v3, %v1835_v7 }
 0x27f   : > { %v2110_v14 = vmul.f32 %v4920_v44, %v4920_v44  ;;  %v2078_v1 = vmul.f32 0.015625, %v1984_v42  ;;  %1937 = vadd.xlane.f32.xlu1 %v4928_v6  ;;  %v1836_v42 = vmul.f32 0.01, %v1747_v29 }
 0x281   : > { %v2142_v2 = vsub.f32 %v2078_v1, %v2110_v14  ;;  %v1776_v57 = vpop.f32.mrf.mxu3 }
 0x282   : > { %v1777_v5 = vadd.f32 %v4563_v55, %v1776_v57 }
 0x283   : > { %v4931_v27 = vpop.eup %3382  ;;  %v4935_v24 = vadd.f32 1e-05, %v2142_v2 }
 0x284   : > { %v2206_v23 = vmul.f32 %v4931_v27, %v4916_v43  ;;  %v1848_v35 = vmul.f32 0.01, %v1777_v5  ;;  %v1749_v18 = vpop.f32.mrf.mxu1  ;;  %v1890_v30 = vpop.xlane.xlu2 %1889  ;;  %vm1816_vm1 = vcmp.ge.f32.partialorder %v1777_v5, 0.0  ;;  %vm2212_vm3 = vweird.f32 %v4931_v27 }
 0x285   : > { %3384 = vrsqrt.f32 %v4935_v24  ;;  %v4941_v34 = vmul.f32 0.015625, %v1890_v30  ;;  %2029 = vadd.xlane.f32.xlu0 %v1973_v63  ;;  %vm4972_vm6 = vmor %vm2211_vm5, %vm2212_vm3  ;;  %v2525_v43 = vsub.f32 %v4606_v11, %v4908_v19  ;;  %vm2221_vm8 = vweird.f32 %v4935_v24 }
 0x286   : > { %v2207_v60 = vmul.f32 %v4931_v27, %v2206_v23  ;;  %v1986_v26 = vpop.xlane.xlu1 %1985  ;;  %v4945_v53 = vsel %vm1816_vm1, %v1777_v5, %v1848_v35  ;;  %v4980_v23 = vsel %vm1804_vm4, %v1747_v29, %v1836_v42  ;;  %v1975_v42 = vmul.f32 %v4928_v6, %v4928_v6 }
 0x287   : > { %v2111_v40 = vmul.f32 %v4941_v34, %v4941_v34  ;;  %1939 = vadd.xlane.f32.xlu2 %v4945_v53  ;;  %v2079_v48 = vmul.f32 0.015625, %v1986_v26  ;;  %1909 = vadd.xlane.f32.xlu1 %v4950_v38  ;;  %v2526_v26 = vsub.f32 %v4679_v52, %v4920_v44  ;;  %v1976_v1 = vmul.f32 %v4945_v53, %v4945_v53 }
 0x288   : > { %v2208_v46 = vmul.f32 0.5, %v2207_v60  ;;  %v1750_v60 = vadd.f32 %v4563_v55, %v1749_v18 }
 0x289   : > { %v2143_v28 = vsub.f32 %v2079_v48, %v2111_v40  ;;  %v1963_v40 = vmul.f32 %v4963_v39, %v4963_v39 }
 0x28a   : > { %v2209_v22 = vsub.f32 1.5, %v2208_v46  ;;  %v1837_v7 = vmul.f32 0.01, %v1750_v60  ;;  %vm1805_vm10 = vcmp.ge.f32.partialorder %v1750_v60, 0.0 }
 0x28b   : > { %v3385_v33 = vpop.eup %3384  ;;  %v4957_v49 = vadd.f32 1e-05, %v2143_v28 }
 0x28c   : > { %v1892_v36 = vpop.xlane.xlu0 %1891  ;;  %v2216_v41 = vmul.f32 %v3385_v33, %v4935_v24  ;;  %v1751_v31 = vpop.f32.mrf.mxu1  ;;  %v2210_v62 = vmul.f32 %v4931_v27, %v2209_v22  ;;  %vm2222_vm7 = vweird.f32 %v3385_v33  ;;  %v5005_v24 = vld [vmem:[%s5911_s7] ss:$0 sm:$0xff] }
 0x28d   : > { %v4954_v59 = vmul.f32 0.015625, %v1892_v36  ;;  %3386 = vrsqrt.f32 %v4957_v49  ;;  %2005 = vadd.xlane.f32.xlu0 %v1961_v58  ;;  %vm4994_vm9 = vmor %vm2221_vm8, %vm2222_vm7  ;;  %v1752_v58 = vadd.f32 %v4563_v55, %v1751_v31  ;;  %vm2231_vm12 = vweird.f32 %v4957_v49 }
 0x28e   : > { %v1988_v37 = vpop.xlane.xlu2 %1987  ;;  %v2217_v21 = vmul.f32 %v3385_v33, %v2216_v41  ;;  %v2214_v5 = vsel %vm4972_vm6, %v4931_v27, %v2210_v62  ;;  %v1964_v27 = vmul.f32 %v4980_v23, %v4980_v23 }
 0x28f   : > { %v2112_v15 = vmul.f32 %v4954_v59, %v4954_v59  ;;  %v2080_v56 = vmul.f32 0.015625, %v1988_v37  ;;  %1913 = vadd.xlane.f32.xlu2 %v4963_v39  ;;  %2007 = vadd.xlane.f32.xlu1 %v1962_v25  ;;  %v2557_v18 = vmul.f32 %v2525_v43, %v2214_v5  ;;  %vm1806_vm13 = vcmp.ge.f32.partialorder %v1752_v58, 0.0 }
 0x290   : > { %v2218_v8 = vmul.f32 0.5, %v2217_v21 }
 0x291   : > { %v2144_v14 = vsub.f32 %v2080_v56, %v2112_v15  ;;  %v2593_v15 = vmul.f32 %v5005_v24, %v2557_v18 }
 0x292   : > { %v2219_v50 = vsub.f32 1.5, %v2218_v8  ;;  %v5035_v8 = vsel %vm1805_vm10, %v1750_v60, %v1837_v7  ;;  %v1838_v60 = vmul.f32 0.01, %v1752_v58 }
 0x293   : > { %v4976_v2 = vadd.f32 1e-05, %v2144_v14  ;;  %v4989_v35 = vpop.eup %3386  ;;  %v1965_v46 = vmul.f32 %v5035_v8, %v5035_v8 }
 0x294   : > { %v1894_v57 = vpop.xlane.xlu0 %1893  ;;  %v2220_v20 = vmul.f32 %v3385_v33, %v2219_v50  ;;  %v1754_v30 = vpop.f32.mrf.mxu1  ;;  %v2226_v11 = vmul.f32 %v4989_v35, %v4957_v49  ;;  %vm2232_vm11 = vweird.f32 %v4989_v35 }
 0x295   : > { %v4978_v45 = vmul.f32 0.015625, %v1894_v57  ;;  %3388 = vrsqrt.f32 %v4976_v2  ;;  %1915 = vadd.xlane.f32.xlu0 %v4980_v23  ;;  %vm5052_vm14 = vmor %vm2231_vm12, %vm2232_vm11  ;;  %vm2241_vm0 = vweird.f32 %v4976_v2 }
 0x296   : > { %v1990_v63 = vpop.xlane.xlu2 %1989  ;;  %v2224_v48 = vsel %vm4994_vm9, %v3385_v33, %v2220_v20  ;;  %v2227_v36 = vmul.f32 %v4989_v35, %v2226_v11  ;;  %v5023_v33 = vld [vmem:[%s5912_s8] ss:$0 sm:$0xff]  ;;  %v1755_v11 = vadd.f32 %v4563_v55, %v1754_v30  ;;  %v2527_v55 = vsub.f32 %v4736_v61, %v4941_v34 }
 0x297   : > { %v2113_v3 = vmul.f32 %v4978_v45, %v4978_v45  ;;  %v2081_v19 = vmul.f32 0.015625, %v1990_v63  ;;  %2011 = vadd.xlane.f32.xlu2 %v1964_v27  ;;  %2009 = vadd.xlane.f32.xlu1 %v1963_v40  ;;  %v2558_v29 = vmul.f32 %v2526_v26, %v2224_v48  ;;  %v2629_v43 = vadd.f32 %v5023_v33, %v2593_v15 }
 0x298   : > { %v2228_v41 = vmul.f32 0.5, %v2227_v36  ;;  %v1839_v61 = vmul.f32 0.01, %v1755_v11  ;;  %vm1807_vm2 = vcmp.ge.f32.partialorder %v1755_v11, 0.0 }
 0x299   : > { %v2145_v22 = vsub.f32 %v2081_v19, %v2113_v3  ;;  %v2594_v56 = vmul.f32 %v5005_v24, %v2558_v29  ;;  %v2528_v29 = vsub.f32 %v4783_v17, %v4954_v59 }
 0x29a   : > { %v2229_v25 = vsub.f32 1.5, %v2228_v41 }
 0x29b   : > { %v5015_v28 = vpop.eup %3388  ;;  %v5017_v52 = vadd.f32 1e-05, %v2145_v22  ;;  %v2630_v20 = vadd.f32 %v5023_v33, %v2594_v56  ;;  %v5071_v22 = vsel %vm1806_vm13, %v1752_v58, %v1838_v60 }
 0x29c   : > { %v1896_v44 = vpop.xlane.xlu1 %1895  ;;  %v2236_v37 = vmul.f32 %v5015_v28, %v4976_v2  ;;  %v2230_v57 = vmul.f32 %v4989_v35, %v2229_v25  ;;  %v1756_v5 = vpop.f32.mrf.mxu1  ;;  %vm2242_vm15 = vweird.f32 %v5015_v28  ;;  %v1966_v17 = vmul.f32 %v5071_v22, %v5071_v22 }
 0x29d   : > { %v5028_v21 = vmul.f32 0.015625, %v1896_v44  ;;  %3390 = vrsqrt.f32 %v5017_v52  ;;  %2035 = vadd.xlane.f32.xlu0 %v1976_v1  ;;  %v2661_v27 = vpack.c.bf16 %v2630_v20, %v2629_v43  ;;  %vm2243_vm1 = vmor %vm2241_vm0, %vm2242_vm15  ;;  %vm2251_vm5 = vweird.f32 %v5017_v52 }
 0x29e   : > { %v1992_v62 = vpop.xlane.xlu0 %1991  ;;  %v2237_v14 = vmul.f32 %v5015_v28, %v2236_v37  ;;  %v2234_v30 = vsel %vm5052_vm14, %v4989_v35, %v2230_v57 }
 0x29f   : > { %v2114_v31 = vmul.f32 %v5028_v21, %v5028_v21  ;;  %v2082_v50 = vmul.f32 0.015625, %v1992_v62  ;;  %v1779_v19 = vpop.f32.mrf.mxu3  ;;  %2033 = vadd.xlane.f32.xlu2 %v1975_v42  ;;  %2013 = vadd.xlane.f32.xlu1 %v1965_v46  ;;  %v2559_v44 = vmul.f32 %v2527_v55, %v2234_v30  ;;  %v5085_v42 = vsel %vm1807_vm2, %v1755_v11, %v1839_v61 }
 0x2a0   : > { %v2238_v3 = vmul.f32 0.5, %v2237_v14  ;;  %2753 = vmatmul.bf16.vlgmr.msra.gmra.mxu2 %v2661_v27  ;;  %v1967_v46 = vmul.f32 %v5085_v42, %v5085_v42 }
 0x2a1   : > { %v2146_v63 = vsub.f32 %v2082_v50, %v2114_v31  ;;  %v2595_v31 = vmul.f32 %v5005_v24, %v2559_v44  ;;  %v2529_v44 = vsub.f32 %v4823_v0, %v4978_v45 }
 0x2a2   : > { %v2239_v26 = vsub.f32 1.5, %v2238_v3 }
 0x2a3   : > { %v5057_v40 = vadd.f32 1e-05, %v2146_v63  ;;  %v5059_v49 = vpop.eup %3390 }
 0x2a4   : > { %v2240_v48 = vmul.f32 %v5015_v28, %v2239_v26  ;;  %v2246_v7 = vmul.f32 %v5059_v49, %v5017_v52  ;;  %v1898_v36 = vpop.xlane.xlu1 %1897  ;;  %v1759_v25 = vpop.f32.mrf.mxu1  ;;  %vm2252_vm4 = vweird.f32 %v5059_v49 }
 0x2a5   : > { %3392 = vrsqrt.f32 %v5057_v40  ;;  %v5076_v34 = vmul.f32 0.015625, %v1898_v36  ;;  %1917 = vadd.xlane.f32.xlu0 %v5035_v8  ;;  %vm5123_vm7 = vmor %vm2251_vm5, %vm2252_vm4  ;;  %vm2261_vm11 = vweird.f32 %v5057_v40 }
 0x2a6   : > { %v2247_v35 = vmul.f32 %v5059_v49, %v2246_v7  ;;  %v1994_v2 = vpop.xlane.xlu0 %1993  ;;  %v2244_v41 = vsel %vm2243_vm1, %v5015_v28, %v2240_v48  ;;  %v5090_v28 = vld [vmem:[%s5910_s6] ss:$0 sm:$0xff] }
 0x2a7   : > { %v2115_v15 = vmul.f32 %v5076_v34, %v5076_v34  ;;  %v2083_v58 = vmul.f32 0.015625, %v1994_v2  ;;  %v2560_v37 = vmul.f32 %v2528_v29, %v2244_v41  ;;  %v1781_v56 = vpop.f32.mrf.mxu3  ;;  %2015 = vadd.xlane.f32.xlu2 %v1966_v17  ;;  %1919 = vadd.xlane.f32.xlu1 %v5071_v22  ;;  %v1757_v20 = vadd.f32 %v5090_v28, %v1756_v5 }
 0x2a8   : > { %v2248_v59 = vmul.f32 0.5, %v2247_v35  ;;  %v1782_v14 = vadd.f32 %v5090_v28, %v1781_v56  ;;  %v1760_v3 = vadd.f32 %v5090_v28, %v1759_v25  ;;  %v1780_v11 = vadd.f32 %v5090_v28, %v1779_v19 }
 0x2a9   : > { %v2147_v62 = vsub.f32 %v2083_v58, %v2115_v15  ;;  %v2596_v1 = vmul.f32 %v5005_v24, %v2560_v37  ;;  %v2631_v5 = vadd.f32 %v5023_v33, %v2595_v31  ;;  %v1840_v17 = vmul.f32 0.01, %v1757_v20 }
 0x2aa   : > { %v2249_v57 = vsub.f32 1.5, %v2248_v59  ;;  %v1850_v27 = vmul.f32 0.01, %v1782_v14  ;;  %vm1818_vm3 = vcmp.ge.f32.partialorder %v1782_v14, 0.0  ;;  %v1841_v29 = vmul.f32 0.01, %v1760_v3 }
 0x2ab   : > { %v5096_v50 = vpop.eup %3392  ;;  %v5098_v43 = vadd.f32 1e-05, %v2147_v62  ;;  %v2632_v30 = vadd.f32 %v5023_v33, %v2596_v1  ;;  %v1849_v35 = vmul.f32 0.01, %v1780_v11  ;;  %vm1809_vm6 = vcmp.ge.f32.partialorder %v1760_v3, 0.0 }
 0x2ac   : > { %v2256_v60 = vmul.f32 %v5096_v50, %v5057_v40  ;;  %v1900_v63 = vpop.xlane.xlu2 %1899  ;;  %v2250_v48 = vmul.f32 %v5059_v49, %v2249_v57  ;;  %v5118_v41 = vsel %vm1818_vm3, %v1782_v14, %v1850_v27  ;;  %vm1817_vm8 = vcmp.ge.f32.partialorder %v1780_v11, 0.0  ;;  %v1761_v31 = vpop.f32.mrf.mxu1 }
 0x2ad   : > { %3394 = vrsqrt.f32 %v5098_v43  ;;  %v5108_v18 = vmul.f32 0.015625, %v1900_v63  ;;  %v2662_v61 = vpack.c.bf16 %v2632_v30, %v2631_v5  ;;  %2017 = vadd.xlane.f32.xlu0 %v1967_v46  ;;  %vm2262_vm9 = vweird.f32 %v5096_v50 }
 0x2ae   : > { %v2257_v26 = vmul.f32 %v5096_v50, %v2256_v60  ;;  %v1996_v55 = vpop.xlane.xlu1 %1995  ;;  %vm1808_vm10 = vcmp.ge.f32.partialorder %v1757_v20, 0.0  ;;  %v2254_v0 = vsel %vm5123_vm7, %v5059_v49, %v2250_v48  ;;  %v5143_v62 = vsel %vm1809_vm6, %v1760_v3, %v1841_v29  ;;  %vm5145_vm12 = vmor %vm2261_vm11, %vm2262_vm9 }
 0x2af   : > { %v2116_v19 = vmul.f32 %v5108_v18, %v5108_v18  ;;  %v2084_v7 = vmul.f32 0.015625, %v1996_v55  ;;  %1921 = vadd.xlane.f32.xlu2 %v5085_v42  ;;  %1943 = vadd.xlane.f32.xlu1 %v5118_v41  ;;  %v5133_v37 = vpop.f32.mrf.mxu3  ;;  %v5153_v49 = vsel %vm1817_vm8, %v1780_v11, %v1849_v35  ;;  %v2530_v40 = vsub.f32 %v4842_v16, %v5028_v21 }
 0x2b0   : > { %v2258_v36 = vmul.f32 0.5, %v2257_v26  ;;  %2758 = vmatmul.bf16.gmra.mxu2 %v2662_v61  ;;  %v2561_v63 = vmul.f32 %v2529_v44, %v2254_v0  ;;  %v5164_v27 = vsel %vm1808_vm10, %v1757_v20, %v1840_v17  ;;  %v1969_v11 = vmul.f32 %v5143_v62, %v5143_v62 }
 0x2b1   : > { %v2148_v2 = vsub.f32 %v2084_v7, %v2116_v19  ;;  %v1762_v16 = vadd.f32 %v5090_v28, %v1761_v31  ;;  %v1977_v21 = vmul.f32 %v5153_v49, %v5153_v49  ;;  %vm2271_vm15 = vweird.f32 %v5098_v43 }
 0x2b2   : > { %v2259_v52 = vsub.f32 1.5, %v2258_v36  ;;  %v2597_v20 = vmul.f32 %v5005_v24, %v2561_v63  ;;  %v1968_v14 = vmul.f32 %v5164_v27, %v5164_v27 }
 0x2b3   : > { %v5129_v58 = vpop.eup %3394  ;;  %v5131_v59 = vadd.f32 1e-05, %v2148_v2  ;;  %v1842_v36 = vmul.f32 0.01, %v1762_v16  ;;  %vm1810_vm13 = vcmp.ge.f32.partialorder %v1762_v16, 0.0 }
 0x2b4   : > { %v2260_v45 = vmul.f32 %v5096_v50, %v2259_v52  ;;  %v2266_v56 = vmul.f32 %v5129_v58, %v5098_v43  ;;  %v1902_v25 = vpop.xlane.xlu2 %1901  ;;  %vm2272_vm14 = vweird.f32 %v5129_v58  ;;  %v2633_v0 = vadd.f32 %v5023_v33, %v2597_v20 }
 0x2b5   : > { %3396 = vrsqrt.f32 %v5131_v59  ;;  %v5150_v1 = vmul.f32 0.015625, %v1902_v25  ;;  %1923 = vadd.xlane.f32.xlu0 %v5164_v27  ;;  %vm5192_vm0 = vmor %vm2271_vm15, %vm2272_vm14  ;;  %vm2281_vm2 = vweird.f32 %v5131_v59 }
 0x2b6   : > { %v2267_v57 = vmul.f32 %v5129_v58, %v2266_v56  ;;  %v1998_v60 = vpop.xlane.xlu1 %1997  ;;  %v2264_v3 = vsel %vm5145_vm12, %v5096_v50, %v2260_v45  ;;  %v1764_v45 = vpop.f32.mrf.mxu1 }
 0x2b7   : > { %v2117_v46 = vmul.f32 %v5150_v1, %v5150_v1  ;;  %v2085_v26 = vmul.f32 0.015625, %v1998_v60  ;;  %v2562_v5 = vmul.f32 %v2530_v40, %v2264_v3  ;;  %2021 = vadd.xlane.f32.xlu2 %v1969_v11  ;;  %2037 = vadd.xlane.f32.xlu1 %v1977_v21  ;;  %v1786_v35 = vpop.f32.mrf.mxu3  ;;  %v2531_v11 = vsub.f32 %v4861_v9, %v5076_v34 }
 0x2b8   : > { %v2268_v55 = vmul.f32 0.5, %v2267_v57  ;;  %v1787_v40 = vadd.f32 %v5090_v28, %v1786_v35  ;;  %v5190_v57 = vsel %vm1810_vm13, %v1762_v16, %v1842_v36 }
 0x2b9   : > { %v2149_v50 = vsub.f32 %v2085_v26, %v2117_v46  ;;  %v2598_v48 = vmul.f32 %v5005_v24, %v2562_v5 }
 0x2ba   : > { %v2269_v30 = vsub.f32 1.5, %v2268_v55  ;;  %v2532_v55 = vsub.f32 %v4869_v13, %v5108_v18  ;;  %vm1820_vm4 = vcmp.ge.f32.partialorder %v1787_v40, 0.0  ;;  %v1785_v13 = vadd.f32 %v5090_v28, %v5133_v37 }
 0x2bb   : > { %v3397_v19 = vpop.eup %3396  ;;  %v5174_v7 = vadd.f32 1e-05, %v2149_v50  ;;  %v2634_v44 = vadd.f32 %v5023_v33, %v2598_v48  ;;  %v1852_v50 = vmul.f32 0.01, %v1787_v40  ;;  %v1978_v18 = vmul.f32 %v5118_v41, %v5118_v41 }
 0x2bc   : > { %v2276_v29 = vmul.f32 %v3397_v19, %v5131_v59  ;;  %v1904_v61 = vpop.xlane.xlu0 %1903  ;;  %v2270_v15 = vmul.f32 %v5129_v58, %v2269_v30  ;;  %vm2282_vm1 = vweird.f32 %v3397_v19  ;;  %vm1819_vm6 = vcmp.ge.f32.partialorder %v1785_v13, 0.0 }
 0x2bd   : > { %3398 = vrsqrt.f32 %v5174_v7  ;;  %v5178_v2 = vmul.f32 0.015625, %v1904_v61  ;;  %v2663_v60 = vpack.c.bf16 %v2634_v44, %v2633_v0  ;;  %1941 = vadd.xlane.f32.xlu0 %v5153_v49  ;;  %vm2283_vm3 = vmor %vm2281_vm2, %vm2282_vm1  ;;  %v5216_v48 = vsel %vm1820_vm4, %v1787_v40, %v1852_v50 }
 0x2be   : > { %v2277_v52 = vmul.f32 %v3397_v19, %v2276_v29  ;;  %v2000_v17 = vpop.xlane.xlu2 %1999  ;;  %v2274_v46 = vsel %vm5192_vm0, %v5129_v58, %v2270_v15  ;;  %v1765_v58 = vadd.f32 %v5090_v28, %v1764_v45  ;;  %v1766_v29 = vpop.f32.mrf.mxu1  ;;  %v1851_v44 = vmul.f32 0.01, %v1785_v13 }
 0x2bf   : > { %v2118_v56 = vmul.f32 %v5178_v2, %v5178_v2  ;;  %v2086_v25 = vmul.f32 0.015625, %v2000_v17  ;;  %1927 = vadd.xlane.f32.xlu2 %v5190_v57  ;;  %2019 = vadd.xlane.f32.xlu1 %v1968_v14  ;;  %v2563_v30 = vmul.f32 %v2531_v11, %v2274_v46  ;;  %v1970_v14 = vmul.f32 %v5190_v57, %v5190_v57 }
 0x2c0   : > { %v2278_v31 = vmul.f32 0.5, %v2277_v52  ;;  %2763 = vmatmul.bf16.gmra.mxu2 %v2663_v60  ;;  %v1843_v36 = vmul.f32 0.01, %v1765_v58  ;;  %vm1811_vm5 = vcmp.ge.f32.partialorder %v1765_v58, 0.0  ;;  %v1767_v52 = vadd.f32 %v5090_v28, %v1766_v29 }
 0x2c1   : > { %v2150_v43 = vsub.f32 %v2086_v25, %v2118_v56  ;;  %v2599_v61 = vmul.f32 %v5005_v24, %v2563_v30  ;;  %vm2291_vm8 = vweird.f32 %v5174_v7  ;;  %v2533_v46 = vsub.f32 %v4875_v10, %v5150_v1 }
 0x2c2   : > { %v2279_v63 = vsub.f32 1.5, %v2278_v31  ;;  %v5224_v0 = vsel %vm1811_vm5, %v1765_v58, %v1843_v36  ;;  %v5231_v31 = vsel %vm1819_vm6, %v1785_v13, %v1851_v44  ;;  %v1844_v28 = vmul.f32 0.01, %v1767_v52 }
 0x2c3   : > { %v5201_v26 = vpop.eup %3398  ;;  %v2182_v16 = vadd.f32 1e-05, %v2150_v43  ;;  %v2635_v45 = vadd.f32 %v5023_v33, %v2599_v61  ;;  %v1971_v3 = vmul.f32 %v5224_v0, %v5224_v0  ;;  %vm1812_vm10 = vcmp.ge.f32.partialorder %v1767_v52, 0.0 }
 0x2c4   : > { %v2280_v21 = vmul.f32 %v3397_v19, %v2279_v63  ;;  %v2286_v5 = vmul.f32 %v5201_v26, %v5174_v7  ;;  %vm2292_vm7 = vweird.f32 %v5201_v26  ;;  %v1980_v13 = vmul.f32 %v5216_v48, %v5216_v48 }
 0x2c5   : > { %3400 = vrsqrt.f32 %v2182_v16  ;;  %1947 = vadd.xlane.f32.xlu0 %v5216_v48  ;;  %vm5236_vm9 = vmor %vm2291_vm8, %vm2292_vm7  ;;  %vm2301_vm12 = vweird.f32 %v2182_v16 }
 0x2c6   : > { %v2287_v9 = vmul.f32 %v5201_v26, %v2286_v5  ;;  %v2284_v34 = vsel %vm2283_vm3, %v3397_v19, %v2280_v21  ;;  %v2534_v21 = vsub.f32 %v4881_v47, %v5178_v2 }
 0x2c7   : > { %v2564_v59 = vmul.f32 %v2532_v55, %v2284_v34  ;;  %2039 = vadd.xlane.f32.xlu2 %v1978_v18  ;;  %1925 = vadd.xlane.f32.xlu1 %v5143_v62  ;;  %v5246_v55 = vsel %vm1812_vm10, %v1767_v52, %v1844_v28 }
 0x2c8   : > { %v2288_v20 = vmul.f32 0.5, %v2287_v9  ;;  %v1972_v58 = vmul.f32 %v5246_v55, %v5246_v55 }
 0x2c9   : > { %v2600_v35 = vmul.f32 %v5005_v24, %v2564_v59 }
 0x2ca   : > { %v2289_v19 = vsub.f32 1.5, %v2288_v20 }
 0x2cb   : > { %v3401_v37 = vpop.eup %3400  ;;  %v2636_v15 = vadd.f32 %v5023_v33, %v2600_v35 }
 0x2cc   : > { %v2296_v17 = vmul.f32 %v3401_v37, %v2182_v16  ;;  %v2290_v56 = vmul.f32 %v5201_v26, %v2289_v19  ;;  %vm2302_vm11 = vweird.f32 %v3401_v37  ;;  %v1979_v16 = vmul.f32 %v5231_v31, %v5231_v31 }
 0x2cd   : > { %v2664_v40 = vpack.c.bf16 %v2636_v15, %v2635_v45  ;;  %2023 = vadd.xlane.f32.xlu0 %v1970_v14  ;;  %vm2303_vm13 = vmor %vm2301_vm12, %vm2302_vm11 }
 0x2ce   : > { %v2297_v25 = vmul.f32 %v3401_v37, %v2296_v17  ;;  %v2294_v7 = vsel %vm5236_vm9, %v5201_v26, %v2290_v56 }
 0x2cf   : > { %1945 = vadd.xlane.f32.xlu2 %v5231_v31  ;;  %2025 = vadd.xlane.f32.xlu1 %v1971_v3  ;;  %v2565_v5 = vmul.f32 %v2533_v46, %v2294_v7 }
 0x2d0   : > { %v2298_v60 = vmul.f32 0.5, %v2297_v25  ;;  %2768 = vmatmul.bf16.gmra.mxu2 %v2664_v40 }
 0x2d1   : > { %v2601_v10 = vmul.f32 %v5005_v24, %v2565_v5 }
 0x2d2   : > { %v2299_v63 = vsub.f32 1.5, %v2298_v60 }
 0x2d3   : > { %v2637_v47 = vadd.f32 %v5023_v33, %v2601_v10  ;;  %v1908_v2 = vpop.xlane.xlu1 %1907 }
 0x2d4   : > { %v2300_v11 = vmul.f32 %v3401_v37, %v2299_v63  ;;  %v5269_v17 = vmul.f32 0.015625, %v1908_v2 }
 0x2d5   : > { %1929 = vadd.xlane.f32.xlu0 %v5224_v0 }
 0x2d6   : > { %v2304_v50 = vsel %vm2303_vm13, %v3401_v37, %v2300_v11  ;;  %v2120_v40 = vmul.f32 %v5269_v17, %v5269_v17 }
 0x2d7   : > { %v2566_v30 = vmul.f32 %v2534_v21, %v2304_v50  ;;  %2027 = vadd.xlane.f32.xlu2 %v1972_v58  ;;  %1931 = vadd.xlane.f32.xlu1 %v5246_v55 }
 0x2d8   : > { %v1934_v34 = vpop.xlane.xlu2 %1933 }
 0x2d9   : > { %v2602_v1 = vmul.f32 %v5005_v24, %v2566_v30  ;;  %v5277_v63 = vmul.f32 0.015625, %v1934_v34 }
 0x2db   : > { %v2638_v26 = vadd.f32 %v5023_v33, %v2602_v1  ;;  %v2133_v58 = vmul.f32 %v5277_v63, %v5277_v63 }
 0x2dd   : > { %v2665_v9 = vpack.c.bf16 %v2638_v26, %v2637_v47  ;;  %2041 = vadd.xlane.f32.xlu0 %v1979_v16 }
 0x2df   : > { %2043 = vadd.xlane.f32.xlu1 %v1980_v13 }
 0x2e0   : > { %2773 = vmatmul.bf16.gmra.mxu2 %v2665_v9  ;;  %v1936_v18 = vpop.xlane.xlu0 %1935  ;;  %v2002_v35 = vpop.xlane.xlu2 %2001 }
 0x2e1   : > { %v5262_v59 = vmul.f32 0.015625, %v1936_v18  ;;  %v2087_v15 = vmul.f32 0.015625, %v2002_v35 }
 0x2e2   : > { %v2032_v20 = vpop.xlane.xlu1 %2031 }
 0x2e3   : > { %v2134_v36 = vmul.f32 %v5262_v59, %v5262_v59  ;;  %v2102_v29 = vmul.f32 0.015625, %v2032_v20 }
 0x2e5   : > { %v2166_v61 = vsub.f32 %v2102_v29, %v2134_v36 }
 0x2e7   : > { %v5266_v19 = vadd.f32 1e-05, %v2166_v61 }
 0x2e8   : > { %v1906_v37 = vpop.xlane.xlu0 %1905  ;;  %v1912_v25 = vpop.xlane.xlu2 %1911 }
 0x2e9   : > { %v2055_v44 = vmul.f32 0.015625, %v1906_v37  ;;  %3402 = vrsqrt.f32 %v5266_v19  ;;  %v5290_v20 = vmul.f32 0.015625, %v1912_v25  ;;  %vm2461_vm5 = vweird.f32 %v5266_v19 }
 0x2eb   : > { %v2119_v52 = vmul.f32 %v2055_v44, %v2055_v44 }
 0x2ed   : > { %v2151_v45 = vsub.f32 %v2087_v15, %v2119_v52 }
 0x2ef   : > { %v2183_v56 = vadd.f32 1e-05, %v2151_v45  ;;  %v5275_v3 = vpop.eup %3402 }
 0x2f0   : > { %v2004_v14 = vpop.xlane.xlu0 %2003  ;;  %v2456_v7 = vmul.f32 %v5275_v3, %v5266_v19  ;;  %vm2462_vm1 = vweird.f32 %v5275_v3 }
 0x2f1   : > { %3404 = vrsqrt.f32 %v2183_v56  ;;  %v2088_v28 = vmul.f32 0.015625, %v2004_v14  ;;  %vm2311_vm15 = vweird.f32 %v2183_v56  ;;  %vm5320_vm6 = vmor %vm2461_vm5, %vm2462_vm1 }
 0x2f2   : > { %v5273_v60 = vpop.xlane.xlu1 %1937  ;;  %v2457_v30 = vmul.f32 %v5275_v3, %v2456_v7  ;;  %v2535_v7 = vsub.f32 %v4898_v51, %v2055_v44  ;;  %v2536_v51 = vsub.f32 %v4887_v12, %v5269_v17 }
 0x2f3   : > { %v2152_v43 = vsub.f32 %v2088_v28, %v2120_v40  ;;  %v2122_v28 = vmul.f32 %v5290_v20, %v5290_v20 }
 0x2f4   : > { %v2458_v9 = vmul.f32 0.5, %v2457_v30 }
 0x2f5   : > { %v2184_v46 = vadd.f32 1e-05, %v2152_v43 }
 0x2f6   : > { %v2459_v15 = vsub.f32 1.5, %v2458_v9 }
 0x2f7   : > { %v3405_v11 = vpop.eup %3404  ;;  %3406 = vrsqrt.f32 %v2184_v46  ;;  %vm2321_vm3 = vweird.f32 %v2184_v46 }
 0x2f8   : > { %v2306_v21 = vmul.f32 %v3405_v11, %v2183_v56  ;;  %v2030_v5 = vpop.xlane.xlu0 %2029  ;;  %vm2312_vm14 = vweird.f32 %v3405_v11 }
 0x2f9   : > { %v2101_v10 = vmul.f32 0.015625, %v2030_v5  ;;  %vm5293_vm0 = vmor %vm2311_vm15, %vm2312_vm14 }
 0x2fa   : > { %v5281_v50 = vpop.xlane.xlu2 %1939  ;;  %v1910_v1 = vpop.xlane.xlu1 %1909  ;;  %v2307_v26 = vmul.f32 %v3405_v11, %v2306_v21 }
 0x2fb   : > { %v2165_v47 = vsub.f32 %v2101_v10, %v2133_v58  ;;  %v5288_v13 = vmul.f32 0.015625, %v1910_v1  ;;  %v2460_v10 = vmul.f32 %v5275_v3, %v2459_v15 }
 0x2fc   : > { %v2308_v2 = vmul.f32 0.5, %v2307_v26 }
 0x2fd   : > { %v3407_v16 = vpop.eup %3406  ;;  %v5286_v34 = vadd.f32 1e-05, %v2165_v47  ;;  %v2121_v45 = vmul.f32 %v5288_v13, %v5288_v13  ;;  %v2464_v19 = vsel %vm5320_vm6, %v5275_v3, %v2460_v10  ;;  %v5341_v3 = vmul.f32 0.015625, %v5281_v50 }
 0x2fe   : > { %v2309_v18 = vsub.f32 1.5, %v2308_v2  ;;  %v2316_v36 = vmul.f32 %v3407_v16, %v2184_v46  ;;  %vm2322_vm2 = vweird.f32 %v3407_v16  ;;  %v2549_v50 = vsub.f32 %v4894_v4, %v5277_v63 }
 0x2ff   : > { %3408 = vrsqrt.f32 %v5286_v34  ;;  %vm2323_vm4 = vmor %vm2321_vm3, %vm2322_vm2  ;;  %vm2451_vm8 = vweird.f32 %v5286_v34 }
 0x300   : > { %v2310_v29 = vmul.f32 %v3405_v11, %v2309_v18  ;;  %v2317_v61 = vmul.f32 %v3407_v16, %v2316_v36  ;;  %v2006_v35 = vpop.xlane.xlu0 %2005 }
 0x301   : > { %v2089_v14 = vmul.f32 0.015625, %v2006_v35 }
 0x302   : > { %v1914_v37 = vpop.xlane.xlu2 %1913  ;;  %v2008_v40 = vpop.xlane.xlu1 %2007  ;;  %v2314_v25 = vsel %vm5293_vm0, %v3405_v11, %v2310_v29  ;;  %v2318_v56 = vmul.f32 0.5, %v2317_v61 }
 0x303   : > { %v2090_v43 = vmul.f32 0.015625, %v2008_v40  ;;  %v2153_v21 = vsub.f32 %v2089_v14, %v2121_v45  ;;  %v2567_v1 = vmul.f32 %v2535_v7, %v2314_v25  ;;  %v5309_v2 = vmul.f32 0.015625, %v1914_v37 }
 0x304   : > { %v2319_v5 = vsub.f32 1.5, %v2318_v56  ;;  %v2550_v45 = vsub.f32 %v4903_v54, %v5262_v59  ;;  %v5335_v14 = vmul.f32 0.015625, %v5273_v60 }
 0x305   : > { %v2154_v58 = vsub.f32 %v2090_v43, %v2122_v28  ;;  %v3409_v30 = vpop.eup %3408  ;;  %v5306_v26 = vadd.f32 1e-05, %v2153_v21  ;;  %v2603_v37 = vmul.f32 %v5005_v24, %v2567_v1 }
 0x306   : > { %v2320_v11 = vmul.f32 %v3407_v16, %v2319_v5  ;;  %v2446_v47 = vmul.f32 %v3409_v30, %v5286_v34  ;;  %vm2452_vm7 = vweird.f32 %v3409_v30  ;;  %v2582_v7 = vmul.f32 %v2550_v45, %v2464_v19 }
 0x307   : > { %v5311_v9 = vadd.f32 1e-05, %v2154_v58  ;;  %3410 = vrsqrt.f32 %v5306_v26  ;;  %v2639_v54 = vadd.f32 %v5023_v33, %v2603_v37  ;;  %vm2453_vm9 = vmor %vm2451_vm8, %vm2452_vm7  ;;  %vm2331_vm11 = vweird.f32 %v5306_v26 }
 0x308   : > { %v2447_v44 = vmul.f32 %v3409_v30, %v2446_v47  ;;  %v1916_v46 = vpop.xlane.xlu0 %1915  ;;  %v2324_v36 = vsel %vm2323_vm4, %v3407_v16, %v2320_v11  ;;  %v2123_v16 = vmul.f32 %v5309_v2, %v5309_v2  ;;  %v2618_v29 = vmul.f32 %v5005_v24, %v2582_v7 }
 0x309   : > { %3412 = vrsqrt.f32 %v5311_v9  ;;  %v5324_v61 = vmul.f32 0.015625, %v1916_v46  ;;  %v2568_v35 = vmul.f32 %v2536_v51, %v2324_v36  ;;  %v2135_v51 = vmul.f32 %v5335_v14, %v5335_v14 }
 0x30a   : > { %v2012_v18 = vpop.xlane.xlu2 %2011  ;;  %v2010_v17 = vpop.xlane.xlu1 %2009  ;;  %v2448_v15 = vmul.f32 0.5, %v2447_v44  ;;  %vm2341_vm14 = vweird.f32 %v5311_v9 }
 0x30b   : > { %v2092_v12 = vmul.f32 0.015625, %v2012_v18  ;;  %v2091_v52 = vmul.f32 0.015625, %v2010_v17  ;;  %v2124_v40 = vmul.f32 %v5324_v61, %v5324_v61  ;;  %v2604_v25 = vmul.f32 %v5005_v24, %v2568_v35 }
 0x30c   : > { %v2449_v28 = vsub.f32 1.5, %v2448_v15 }
 0x30d   : > { %v2155_v56 = vsub.f32 %v2091_v52, %v2123_v16  ;;  %v5343_v43 = vpop.eup %3410  ;;  %v2156_v21 = vsub.f32 %v2092_v12, %v2124_v40  ;;  %v2640_v59 = vadd.f32 %v5023_v33, %v2604_v25  ;;  %v2136_v12 = vmul.f32 %v5341_v3, %v5341_v3 }
 0x30e   : > { %v2450_v5 = vmul.f32 %v3409_v30, %v2449_v28  ;;  %v2326_v58 = vmul.f32 %v5343_v43, %v5306_v26  ;;  %v2654_v25 = vadd.f32 %v5023_v33, %v2618_v29  ;;  %vm2332_vm10 = vweird.f32 %v5343_v43 }
 0x30f   : > { %v5347_v60 = vpop.eup %3412  ;;  %v5352_v10 = vadd.f32 1e-05, %v2155_v56  ;;  %v5358_v11 = vadd.f32 1e-05, %v2156_v21  ;;  %v2666_v47 = vpack.c.bf16 %v2640_v59, %v2639_v54  ;;  %vm5390_vm13 = vmor %vm2331_vm11, %vm2332_vm10 }
 0x310   : > { %v2336_v1 = vmul.f32 %v5347_v60, %v5311_v9  ;;  %v2454_v44 = vsel %vm2453_vm9, %v3409_v30, %v2450_v5  ;;  %v2327_v34 = vmul.f32 %v5343_v43, %v2326_v58  ;;  %v2036_v46 = vpop.xlane.xlu0 %2035  ;;  %vm2342_vm12 = vweird.f32 %v5347_v60 }
 0x311   : > { %3414 = vrsqrt.f32 %v5352_v10  ;;  %v2581_v36 = vmul.f32 %v2549_v50, %v2454_v44  ;;  %2778 = vmatmul.bf16.gmra.mxu2 %v2666_v47  ;;  %v2104_v30 = vmul.f32 0.015625, %v2036_v46  ;;  %vm5409_vm15 = vmor %vm2341_vm14, %vm2342_vm12  ;;  %vm2351_vm2 = vweird.f32 %v5352_v10 }
 0x312   : > { %v2034_v18 = vpop.xlane.xlu2 %2033  ;;  %v2337_v4 = vmul.f32 %v5347_v60, %v2336_v1  ;;  %3416 = vrsqrt.f32 %v5358_v11  ;;  %v2014_v63 = vpop.xlane.xlu1 %2013  ;;  %v2328_v17 = vmul.f32 0.5, %v2327_v34  ;;  %vm2361_vm3 = vweird.f32 %v5358_v11 }
 0x313   : > { %v2103_v35 = vmul.f32 0.015625, %v2034_v18  ;;  %v2617_v19 = vmul.f32 %v5005_v24, %v2581_v36  ;;  %v2168_v16 = vsub.f32 %v2104_v30, %v2136_v12 }
 0x314   : > { %v2338_v37 = vmul.f32 0.5, %v2337_v4  ;;  %v2329_v15 = vsub.f32 1.5, %v2328_v17  ;;  %v2537_v4 = vsub.f32 %v4950_v38, %v5288_v13  ;;  %v2093_v17 = vmul.f32 0.015625, %v2014_v63 }
 0x315   : > { %v2167_v52 = vsub.f32 %v2103_v35, %v2135_v51  ;;  %v2653_v40 = vadd.f32 %v5023_v33, %v2617_v19  ;;  %v5376_v7 = vadd.f32 1e-05, %v2168_v16  ;;  %v2538_v13 = vsub.f32 %v4912_v32, %v5290_v20 }
 0x316   : > { %v2339_v45 = vsub.f32 1.5, %v2338_v37  ;;  %v2330_v56 = vmul.f32 %v5343_v43, %v2329_v15 }
 0x317   : > { %v5372_v28 = vpop.eup %3414  ;;  %v5378_v21 = vadd.f32 1e-05, %v2167_v52  ;;  %v2673_v5 = vpack.c.bf16 %v2654_v25, %v2653_v40  ;;  %3418 = vrsqrt.f32 %v5376_v7  ;;  %vm2481_vm9 = vweird.f32 %v5376_v7 }
 0x318   : > { %v5380_v54 = vpop.eup %3416  ;;  %v2346_v59 = vmul.f32 %v5372_v28, %v5352_v10  ;;  %v2340_v58 = vmul.f32 %v5347_v60, %v2339_v45  ;;  %v1918_v1 = vpop.xlane.xlu0 %1917  ;;  %v2334_v36 = vsel %vm5390_vm13, %v5343_v43, %v2330_v56  ;;  %vm2352_vm0 = vweird.f32 %v5372_v28 }
 0x319   : > { %v2356_v50 = vmul.f32 %v5380_v54, %v5358_v11  ;;  %3420 = vrsqrt.f32 %v5378_v21  ;;  %v5396_v44 = vmul.f32 0.015625, %v1918_v1  ;;  %2813 = vmatmul.bf16.vlgmr.msra.gmra.mxu3 %v2673_v5  ;;  %v2569_v19 = vmul.f32 %v2537_v4, %v2334_v36  ;;  %vm5461_vm4 = vmor %vm2351_vm2, %vm2352_vm0 }
 0x31a   : > { %v2016_v47 = vpop.xlane.xlu2 %2015  ;;  %v2347_v26 = vmul.f32 %v5372_v28, %v2346_v59  ;;  %v1920_v34 = vpop.xlane.xlu1 %1919  ;;  %v2344_v38 = vsel %vm5409_vm15, %v5347_v60, %v2340_v58  ;;  %v5434_v60 = vld [vmem:[%s5914_s10] ss:$0 sm:$0xff]  ;;  %vm2362_vm1 = vweird.f32 %v5380_v54  ;;  %vm2471_vm8 = vweird.f32 %v5378_v21 }
 0x31b   : > { %v2357_v46 = vmul.f32 %v5380_v54, %v2356_v50  ;;  %v5400_v18 = vmul.f32 0.015625, %v1920_v34  ;;  %v2125_v9 = vmul.f32 %v5396_v44, %v5396_v44  ;;  %v2094_v35 = vmul.f32 0.015625, %v2016_v47  ;;  %vm5474_vm5 = vmor %vm2361_vm3, %vm2362_vm1 }
 0x31c   : > { %v2348_v12 = vmul.f32 0.5, %v2347_v26  ;;  %v2570_v32 = vmul.f32 %v2538_v13, %v2344_v38  ;;  %v2605_v1 = vmul.f32 %v5005_v24, %v2569_v19  ;;  %v2540_v19 = vsub.f32 %v4980_v23, %v5324_v61 }
 0x31d   : > { %v2358_v30 = vmul.f32 0.5, %v2357_v46  ;;  %v2126_v43 = vmul.f32 %v5400_v18, %v5400_v18  ;;  %v2157_v37 = vsub.f32 %v2093_v17, %v2125_v9  ;;  %v5422_v15 = vpop.eup %3418 }
 0x31e   : > { %v2349_v63 = vsub.f32 1.5, %v2348_v12  ;;  %v2476_v40 = vmul.f32 %v5422_v15, %v5376_v7  ;;  %v2606_v29 = vmul.f32 %v5005_v24, %v2570_v32  ;;  %v2641_v24 = vadd.f32 %v5023_v33, %v2605_v1  ;;  %v5522_v7 = vld [vmem:[%s5911_s7] ss:$0 sm:$0xff] }
 0x31f   : > { %v2158_v16 = vsub.f32 %v2094_v35, %v2126_v43  ;;  %v5424_v52 = vpop.eup %3420  ;;  %v2359_v45 = vsub.f32 1.5, %v2358_v30  ;;  %v5428_v25 = vadd.f32 1e-05, %v2157_v37  ;;  %v2539_v43 = vsub.f32 %v4963_v39, %v5309_v2 }
 0x320   : > { %v2466_v20 = vmul.f32 %v5424_v52, %v5378_v21  ;;  %v2018_v59 = vpop.xlane.xlu0 %2017  ;;  %v2477_v58 = vmul.f32 %v5422_v15, %v2476_v40  ;;  %v2350_v47 = vmul.f32 %v5372_v28, %v2349_v63  ;;  %v2642_v10 = vadd.f32 %v5023_v33, %v2606_v29 }
 0x321   : > { %v5439_v56 = vadd.f32 1e-05, %v2158_v16  ;;  %3422 = vrsqrt.f32 %v5428_v25  ;;  %v2360_v46 = vmul.f32 %v5380_v54, %v2359_v45  ;;  %v2095_v17 = vmul.f32 0.015625, %v2018_v59 }
 0x322   : > { %v1922_v5 = vpop.xlane.xlu2 %1921  ;;  %v5444_v50 = vpop.xlane.xlu1 %1943  ;;  %v2467_v51 = vmul.f32 %v5424_v52, %v2466_v20  ;;  %v2478_v36 = vmul.f32 0.5, %v2477_v58  ;;  %v2667_v63 = vpack.c.bf16 %v2642_v10, %v2641_v24  ;;  %v2354_v33 = vsel %vm5461_vm4, %v5372_v28, %v2350_v47 }
 0x323   : > { %3424 = vrsqrt.f32 %v5439_v56  ;;  %v5450_v26 = vmul.f32 0.015625, %v1922_v5  ;;  %v2754_v34 = vpop.f32.mrf.mxu2  ;;  %v2364_v39 = vsel %vm5474_vm5, %v5380_v54, %v2360_v46  ;;  %vm2472_vm6 = vweird.f32 %v5424_v52 }
 0x324   : > { %v2755_v4 = vadd.f32 %v5434_v60, %v2754_v34  ;;  %v2468_v12 = vmul.f32 0.5, %v2467_v51  ;;  %v2479_v35 = vsub.f32 1.5, %v2478_v36  ;;  %vm2482_vm7 = vweird.f32 %v5422_v15  ;;  %2783 = vmatmul.bf16.gmra.mxu2 %v2667_v63  ;;  %vm2473_vm10 = vmor %vm2471_vm8, %vm2472_vm6 }
 0x325   : > { %v2127_v9 = vmul.f32 %v5450_v26, %v5450_v26  ;;  %v2571_v5 = vmul.f32 %v2539_v43, %v2354_v33  ;;  %v2572_v58 = vmul.f32 %v2540_v19, %v2364_v39  ;;  %v2551_v1 = vsub.f32 %v4928_v6, %v5335_v14  ;;  %vm2483_vm11 = vmor %vm2481_vm9, %vm2482_vm7 }
 0x326   : > { %2834 = vst [vmem:[%s5465_s27] sm:$0xff] %v2755_v4  ;;  %v2469_v38 = vsub.f32 1.5, %v2468_v12  ;;  %v2480_v28 = vmul.f32 %v5422_v15, %v2479_v35  ;;  %v2552_v51 = vsub.f32 %v4945_v53, %v5341_v3  ;;  %vm2381_vm14 = vweird.f32 %v5439_v56 }
 0x327   : > { %v2159_v13 = vsub.f32 %v2095_v17, %v2127_v9  ;;  %v5478_v37 = vpop.eup %3422  ;;  %v2607_v4 = vmul.f32 %v5522_v7, %v2571_v5  ;;  %v2608_v53 = vmul.f32 %v5522_v7, %v2572_v58  ;;  %vm2371_vm15 = vweird.f32 %v5428_v25 }
 0x328   : > { %v2470_v16 = vmul.f32 %v5424_v52, %v2469_v38  ;;  %v2366_v45 = vmul.f32 %v5478_v37, %v5428_v25  ;;  %v1924_v23 = vpop.xlane.xlu0 %1923  ;;  %v2484_v6 = vsel %vm2483_vm11, %v5422_v15, %v2480_v28  ;;  %vm2372_vm13 = vweird.f32 %v5478_v37 }
 0x329   : > { %v5488_v2 = vpop.eup %3424  ;;  %v5494_v40 = vadd.f32 1e-05, %v2159_v13  ;;  %v2584_v3 = vmul.f32 %v2552_v51, %v2484_v6  ;;  %v5526_v12 = vmul.f32 0.015625, %v1924_v23  ;;  %v5539_v13 = vld [vmem:[%s5912_s8] ss:$0 sm:$0xff]  ;;  %v5553_v28 = vmul.f32 0.015625, %v5444_v50  ;;  %vm5576_vm1 = vmor %vm2371_vm15, %vm2372_vm13 }
 0x32a   : > { %v5496_v61 = vpop.xlane.xlu2 %2021  ;;  %v2376_v54 = vmul.f32 %v5488_v2, %v5439_v56  ;;  %v2038_v32 = vpop.xlane.xlu1 %2037  ;;  %v2367_v20 = vmul.f32 %v5478_v37, %v2366_v45  ;;  %v2474_v34 = vsel %vm2473_vm10, %v5424_v52, %v2470_v16  ;;  %vm2382_vm12 = vweird.f32 %v5488_v2 }
 0x32b   : > { %3426 = vrsqrt.f32 %v5494_v40  ;;  %v2756_v59 = vpop.f32.mrf.mxu2  ;;  %v2583_v14 = vmul.f32 %v2551_v1, %v2474_v34  ;;  %v2105_v24 = vmul.f32 0.015625, %v2038_v32  ;;  %v2643_v19 = vadd.f32 %v5539_v13, %v2607_v4  ;;  %vm5561_vm0 = vmor %vm2381_vm14, %vm2382_vm12 }
 0x32c   : > { %v2377_v21 = vmul.f32 %v5488_v2, %v2376_v54  ;;  %v2757_v47 = vadd.f32 %v5434_v60, %v2756_v59  ;;  %v2368_v46 = vmul.f32 0.5, %v2367_v20  ;;  %v2644_v63 = vadd.f32 %v5539_v13, %v2608_v53 }
 0x32d   : > { %v2619_v9 = vmul.f32 %v5522_v7, %v2583_v14  ;;  %v2620_v33 = vmul.f32 %v5522_v7, %v2584_v3  ;;  %v2128_v45 = vmul.f32 %v5526_v12, %v5526_v12  ;;  %v2542_v34 = vsub.f32 %v5071_v22, %v5400_v18 }
 0x32e   : > { %v2378_v36 = vmul.f32 0.5, %v2377_v21  ;;  %2835 = vst [vmem:[%s5465_s27 + $0x8] sm:$0xff] %v2757_v47  ;;  %v2369_v30 = vsub.f32 1.5, %v2368_v46  ;;  %v2668_v56 = vpack.c.bf16 %v2644_v63, %v2643_v19  ;;  %v2541_v14 = vsub.f32 %v5035_v8, %v5396_v44 }
 0x32f   : > { %v2655_v54 = vadd.f32 %v5539_v13, %v2619_v9  ;;  %v2656_v50 = vadd.f32 %v5539_v13, %v2620_v33  ;;  %v2138_v4 = vmul.f32 %v5553_v28, %v5553_v28  ;;  %v2097_v9 = vmul.f32 0.015625, %v5496_v61 }
 0x330   : > { %v2379_v29 = vsub.f32 1.5, %v2378_v36  ;;  %v1942_v17 = vpop.xlane.xlu0 %1941  ;;  %v2370_v32 = vmul.f32 %v5478_v37, %v2369_v30  ;;  %vm2391_vm3 = vweird.f32 %v5494_v40 }
 0x331   : > { %v5528_v52 = vpop.eup %3426  ;;  %v5534_v10 = vmul.f32 0.015625, %v1942_v17  ;;  %v2674_v46 = vpack.c.bf16 %v2656_v50, %v2655_v54 }
 0x332   : > { %v1928_v15 = vpop.xlane.xlu2 %1927  ;;  %v2386_v35 = vmul.f32 %v5528_v52, %v5494_v40  ;;  %v2020_v43 = vpop.xlane.xlu1 %2019  ;;  %v2380_v39 = vmul.f32 %v5488_v2, %v2379_v29  ;;  %vm2392_vm2 = vweird.f32 %v5528_v52 }
 0x333   : > { %v2759_v11 = vpop.f32.mrf.mxu2  ;;  %v2096_v38 = vmul.f32 0.015625, %v2020_v43  ;;  %v2137_v23 = vmul.f32 %v5534_v10, %v5534_v10  ;;  %2818 = vmatmul.bf16.gmra.mxu3 %v2674_v46  ;;  %v5595_v30 = vmul.f32 0.015625, %v1928_v15  ;;  %vm5620_vm4 = vmor %vm2391_vm3, %vm2392_vm2 }
 0x334   : > { %v2387_v16 = vmul.f32 %v5528_v52, %v2386_v35  ;;  %v2760_v59 = vadd.f32 %v5434_v60, %v2759_v11  ;;  %v2384_v1 = vsel %vm5561_vm0, %v5488_v2, %v2380_v39  ;;  %v2374_v2 = vsel %vm5576_vm1, %v5478_v37, %v2370_v32  ;;  %2788 = vmatmul.bf16.gmra.mxu2 %v2668_v56 }
 0x335   : > { %v2169_v20 = vsub.f32 %v2105_v24, %v2137_v23  ;;  %v2160_v5 = vsub.f32 %v2096_v38, %v2128_v45  ;;  %v2574_v3 = vmul.f32 %v2542_v34, %v2384_v1  ;;  %v2573_v8 = vmul.f32 %v2541_v14, %v2374_v2 }
 0x336   : > { %v2388_v21 = vmul.f32 0.5, %v2387_v16  ;;  %2836 = vst [vmem:[%s5465_s27 + $0x10] sm:$0xff] %v2760_v59  ;;  %v2130_v16 = vmul.f32 %v5595_v30, %v5595_v30  ;;  %v2544_v14 = vsub.f32 %v5164_v27, %v5526_v12 }
 0x337   : > { %v5569_v47 = vadd.f32 1e-05, %v2169_v20  ;;  %v5572_v51 = vadd.f32 1e-05, %v2160_v5  ;;  %v2610_v43 = vmul.f32 %v5522_v7, %v2574_v3  ;;  %v2609_v39 = vmul.f32 %v5522_v7, %v2573_v8 }
 0x338   : > { %v1948_v36 = vpop.xlane.xlu0 %1947  ;;  %v2389_v37 = vsub.f32 1.5, %v2388_v21  ;;  %v2543_v20 = vsub.f32 %v5085_v42, %v5450_v26 }
 0x339   : > { %3428 = vrsqrt.f32 %v5569_v47  ;;  %v2646_v58 = vadd.f32 %v5539_v13, %v2610_v43  ;;  %v5633_v25 = vmul.f32 0.015625, %v1948_v36  ;;  %v2645_v26 = vadd.f32 %v5539_v13, %v2609_v39 }
 0x33a   : > { %v2040_v6 = vpop.xlane.xlu2 %2039  ;;  %v1926_v53 = vpop.xlane.xlu1 %1925  ;;  %3430 = vrsqrt.f32 %v5572_v51  ;;  %v2390_v38 = vmul.f32 %v5528_v52, %v2389_v37  ;;  %vm2491_vm5 = vweird.f32 %v5569_v47  ;;  %vm2401_vm6 = vweird.f32 %v5572_v51 }
 0x33b   : > { %v2106_v22 = vmul.f32 0.015625, %v2040_v6  ;;  %v2761_v18 = vpop.f32.mrf.mxu2  ;;  %v5591_v29 = vmul.f32 0.015625, %v1926_v53 }
 0x33c   : > { %v2762_v17 = vadd.f32 %v5434_v60, %v2761_v18  ;;  %v2394_v56 = vsel %vm5620_vm4, %v5528_v52, %v2390_v38  ;;  %v2554_v52 = vsub.f32 %v5118_v41, %v5553_v28  ;;  %v5655_v18 = vmul.f32 %v5633_v25, %v5633_v25 }
 0x33d   : > { %v2170_v44 = vsub.f32 %v2106_v22, %v2138_v4  ;;  %v2129_v35 = vmul.f32 %v5591_v29, %v5591_v29  ;;  %v2575_v2 = vmul.f32 %v2543_v20, %v2394_v56  ;;  %v2669_v4 = vpack.c.bf16 %v2646_v58, %v2645_v26 }
 0x33e   : > { %2837 = vst [vmem:[%s5465_s27 + $0x18] sm:$0xff] %v2762_v17  ;;  %v2553_v22 = vsub.f32 %v5153_v49, %v5534_v10 }
 0x33f   : > { %v5600_v24 = vadd.f32 1e-05, %v2170_v44  ;;  %v5603_v11 = vpop.eup %3428  ;;  %v2161_v19 = vsub.f32 %v2097_v9, %v2129_v35  ;;  %v2611_v43 = vmul.f32 %v5522_v7, %v2575_v2 }
 0x340   : > { %v5607_v63 = vpop.eup %3430  ;;  %v2486_v61 = vmul.f32 %v5603_v11, %v5569_v47  ;;  %v2024_v15 = vpop.xlane.xlu0 %2023  ;;  %vm2492_vm8 = vweird.f32 %v5603_v11 }
 0x341   : > { %3432 = vrsqrt.f32 %v5600_v24  ;;  %v2396_v45 = vmul.f32 %v5607_v63, %v5572_v51  ;;  %v5618_v23 = vadd.f32 1e-05, %v2161_v19  ;;  %v2098_v54 = vmul.f32 0.015625, %v2024_v15  ;;  %vm5696_vm10 = vmor %vm2491_vm5, %vm2492_vm8 }
 0x342   : > { %v1946_v33 = vpop.xlane.xlu2 %1945  ;;  %v2026_v32 = vpop.xlane.xlu1 %2025  ;;  %v2487_v59 = vmul.f32 %v5603_v11, %v2486_v61  ;;  %vm2402_vm7 = vweird.f32 %v5607_v63  ;;  %vm2501_vm11 = vweird.f32 %v5600_v24  ;;  %v2647_v47 = vadd.f32 %v5539_v13, %v2611_v43 }
 0x343   : > { %v2764_v5 = vpop.f32.mrf.mxu2  ;;  %v2397_v50 = vmul.f32 %v5607_v63, %v2396_v45  ;;  %3434 = vrsqrt.f32 %v5618_v23  ;;  %v2162_v1 = vsub.f32 %v2098_v54, %v2130_v16  ;;  %v2099_v61 = vmul.f32 0.015625, %v2026_v32  ;;  %vm5677_vm9 = vmor %vm2401_vm6, %vm2402_vm7 }
 0x344   : > { %v2488_v21 = vmul.f32 0.5, %v2487_v59  ;;  %v2765_v42 = vadd.f32 %v5434_v60, %v2764_v5  ;;  %2793 = vmatmul.bf16.gmra.mxu2 %v2669_v4  ;;  %v5687_v59 = vmul.f32 0.015625, %v1946_v33  ;;  %vm2411_vm2 = vweird.f32 %v5618_v23 }
 0x345   : > { %v2398_v34 = vmul.f32 0.5, %v2397_v50  ;;  %v5637_v46 = vadd.f32 1e-05, %v2162_v1 }
 0x346   : > { %2838 = vst [vmem:[%s5465_s27 + $0x20] sm:$0xff] %v2765_v42  ;;  %v2489_v36 = vsub.f32 1.5, %v2488_v21  ;;  %v2139_v4 = vmul.f32 %v5687_v59, %v5687_v59 }
 0x347   : > { %v5639_v6 = vpop.eup %3432  ;;  %v2399_v53 = vsub.f32 1.5, %v2398_v34  ;;  %3436 = vrsqrt.f32 %v5637_v46  ;;  %vm2421_vm14 = vweird.f32 %v5637_v46 }
 0x348   : > { %v2496_v3 = vmul.f32 %v5639_v6, %v5600_v24  ;;  %v1930_v27 = vpop.xlane.xlu0 %1929  ;;  %v2490_v38 = vmul.f32 %v5603_v11, %v2489_v36  ;;  %vm2502_vm12 = vweird.f32 %v5639_v6 }
 0x349   : > { %v5657_v12 = vpop.eup %3434  ;;  %v2400_v37 = vmul.f32 %v5607_v63, %v2399_v53  ;;  %v5662_v8 = vmul.f32 0.015625, %v1930_v27  ;;  %vm5722_vm13 = vmor %vm2501_vm11, %vm2502_vm12 }
 0x34a   : > { %v2497_v17 = vmul.f32 %v5639_v6, %v2496_v3  ;;  %v2028_v44 = vpop.xlane.xlu2 %2027  ;;  %v1932_v49 = vpop.xlane.xlu1 %1931  ;;  %v2406_v10 = vmul.f32 %v5657_v12, %v5618_v23  ;;  %vm2412_vm0 = vweird.f32 %v5657_v12 }
 0x34b   : > { %v2766_v9 = vpop.f32.mrf.mxu2  ;;  %v5667_v35 = vmul.f32 0.015625, %v1932_v49  ;;  %v2131_v15 = vmul.f32 %v5662_v8, %v5662_v8  ;;  %v2100_v45 = vmul.f32 0.015625, %v2028_v44  ;;  %v2404_v51 = vsel %vm5677_vm9, %v5607_v63, %v2400_v37  ;;  %vm2413_vm3 = vmor %vm2411_vm2, %vm2412_vm0 }
 0x34c   : > { %v2498_v19 = vmul.f32 0.5, %v2497_v17  ;;  %v2407_v16 = vmul.f32 %v5657_v12, %v2406_v10  ;;  %v2767_v54 = vadd.f32 %v5434_v60, %v2766_v9  ;;  %v2494_v63 = vsel %vm5696_vm10, %v5603_v11, %v2490_v38 }
 0x34d   : > { %v2132_v32 = vmul.f32 %v5667_v35, %v5667_v35  ;;  %v5685_v40 = vpop.eup %3436  ;;  %v2163_v5 = vsub.f32 %v2099_v61, %v2131_v15  ;;  %v2576_v21 = vmul.f32 %v2544_v14, %v2404_v51  ;;  %v2585_v53 = vmul.f32 %v2553_v22, %v2494_v63 }
 0x34e   : > { %v2499_v20 = vsub.f32 1.5, %v2498_v19  ;;  %v2408_v56 = vmul.f32 0.5, %v2407_v16  ;;  %v2416_v33 = vmul.f32 %v5685_v40, %v5637_v46  ;;  %2839 = vst [vmem:[%s5465_s27 + $0x28] sm:$0xff] %v2767_v54  ;;  %vm2422_vm15 = vweird.f32 %v5685_v40 }
 0x34f   : > { %v2164_v50 = vsub.f32 %v2100_v45, %v2132_v32  ;;  %v5707_v1 = vadd.f32 1e-05, %v2163_v5  ;;  %v2612_v14 = vmul.f32 %v5522_v7, %v2576_v21  ;;  %v2621_v39 = vmul.f32 %v5522_v7, %v2585_v53  ;;  %vm5746_vm1 = vmor %vm2421_vm14, %vm2422_vm15 }
 0x350   : > { %v2500_v42 = vmul.f32 %v5639_v6, %v2499_v20  ;;  %v2417_v26 = vmul.f32 %v5685_v40, %v2416_v33  ;;  %v2042_v2 = vpop.xlane.xlu0 %2041  ;;  %v2409_v3 = vsub.f32 1.5, %v2408_v56  ;;  %v2546_v54 = vsub.f32 %v5190_v57, %v5595_v30 }
 0x351   : > { %v5713_v34 = vadd.f32 1e-05, %v2164_v50  ;;  %3438 = vrsqrt.f32 %v5707_v1  ;;  %v2107_v11 = vmul.f32 0.015625, %v2042_v2  ;;  %v2648_v9 = vadd.f32 %v5539_v13, %v2612_v14 }
 0x352   : > { %v2044_v36 = vpop.xlane.xlu1 %2043  ;;  %v2418_v27 = vmul.f32 0.5, %v2417_v26  ;;  %v2504_v22 = vsel %vm5722_vm13, %v5639_v6, %v2500_v42  ;;  %v2410_v61 = vmul.f32 %v5657_v12, %v2409_v3  ;;  %v2545_v57 = vsub.f32 %v5143_v62, %v5591_v29 }
 0x353   : > { %3440 = vrsqrt.f32 %v5713_v34  ;;  %v2769_v37 = vpop.f32.mrf.mxu2  ;;  %v2171_v44 = vsub.f32 %v2107_v11, %v2139_v4  ;;  %v2108_v10 = vmul.f32 0.015625, %v2044_v36  ;;  %v2670_v19 = vpack.c.bf16 %v2648_v9, %v2647_v47 }
 0x354   : > { %v2770_v49 = vadd.f32 %v5434_v60, %v2769_v37  ;;  %v2419_v43 = vsub.f32 1.5, %v2418_v27  ;;  %v2586_v46 = vmul.f32 %v2554_v52, %v2504_v22  ;;  %v2414_v23 = vsel %vm2413_vm3, %v5657_v12, %v2410_v61 }
 0x355   : > { %v5734_v24 = vadd.f32 1e-05, %v2171_v44  ;;  %v2172_v38 = vsub.f32 %v2108_v10, %v5655_v18  ;;  %2798 = vmatmul.bf16.gmra.mxu2 %v2670_v19  ;;  %v2577_v63 = vmul.f32 %v2545_v57, %v2414_v23  ;;  %vm2441_vm7 = vweird.f32 %v5713_v34 }
 0x356   : > { %2840 = vst [vmem:[%s5465_s27 + $0x30] sm:$0xff] %v2770_v49  ;;  %v2420_v15 = vmul.f32 %v5685_v40, %v2419_v43  ;;  %v2622_v28 = vmul.f32 %v5522_v7, %v2586_v46  ;;  %vm2431_vm11 = vweird.f32 %v5707_v1 }
 0x357   : > { %v5744_v16 = vpop.eup %3438  ;;  %3442 = vrsqrt.f32 %v5734_v24  ;;  %v5751_v18 = vadd.f32 1e-05, %v2172_v38  ;;  %v2613_v29 = vmul.f32 %v5522_v7, %v2577_v63  ;;  %vm2511_vm8 = vweird.f32 %v5734_v24 }
 0x358   : > { %v2426_v41 = vmul.f32 %v5744_v16, %v5707_v1  ;;  %v2424_v52 = vsel %vm5746_vm1, %v5685_v40, %v2420_v15  ;;  %v2657_v40 = vadd.f32 %v5539_v13, %v2621_v39  ;;  %v2658_v51 = vadd.f32 %v5539_v13, %v2622_v28 }
 0x359   : > { %v5753_v45 = vpop.eup %3440  ;;  %3444 = vrsqrt.f32 %v5751_v18  ;;  %v2578_v56 = vmul.f32 %v2546_v54, %v2424_v52  ;;  %vm2432_vm6 = vweird.f32 %v5744_v16  ;;  %v2649_v49 = vadd.f32 %v5539_v13, %v2613_v29 }
 0x35a   : > { %v2436_v32 = vmul.f32 %v5753_v45, %v5713_v34  ;;  %v2427_v20 = vmul.f32 %v5744_v16, %v2426_v41  ;;  %v2675_v33 = vpack.c.bf16 %v2658_v51, %v2657_v40  ;;  %vm2442_vm4 = vweird.f32 %v5753_v45  ;;  %vm5799_vm13 = vmor %vm2431_vm11, %vm2432_vm6 }
 0x35b   : > { %v2771_v5 = vpop.f32.mrf.mxu2  ;;  %v2614_v26 = vmul.f32 %v5522_v7, %v2578_v56  ;;  %vm5792_vm9 = vmor %vm2441_vm7, %vm2442_vm4  ;;  %v2555_v38 = vsub.f32 %v5231_v31, %v5687_v59  ;;  %vm2521_vm14 = vweird.f32 %v5751_v18  ;;  %v2556_v31 = vsub.f32 %v5216_v48, %v5633_v25 }
 0x35c   : > { %v2437_v30 = vmul.f32 %v5753_v45, %v2436_v32  ;;  %v2772_v58 = vadd.f32 %v5434_v60, %v2771_v5  ;;  %v2428_v12 = vmul.f32 0.5, %v2427_v20  ;;  %2823 = vmatmul.bf16.gmra.mxu3 %v2675_v33  ;;  %v2548_v59 = vsub.f32 %v5246_v55, %v5667_v35 }
 0x35d   : > { %v3443_v50 = vpop.eup %3442  ;;  %v2650_v27 = vadd.f32 %v5539_v13, %v2614_v26  ;;  %v2547_v39 = vsub.f32 %v5224_v0, %v5662_v8 }
 0x35e   : > { %v2438_v21 = vmul.f32 0.5, %v2437_v30  ;;  %2841 = vst [vmem:[%s5465_s27 + $0x38] sm:$0xff] %v2772_v58  ;;  %v2506_v47 = vmul.f32 %v3443_v50, %v5734_v24  ;;  %v2429_v11 = vsub.f32 1.5, %v2428_v12  ;;  %vm2512_vm5 = vweird.f32 %v3443_v50 }
 0x35f   : > { %v3445_v42 = vpop.eup %3444  ;;  %vm2513_vm12 = vmor %vm2511_vm8, %vm2512_vm5  ;;  %v2671_v34 = vpack.c.bf16 %v2650_v27, %v2649_v49 }
 0x360   : > { %v2439_v2 = vsub.f32 1.5, %v2438_v21  ;;  %v2507_v4 = vmul.f32 %v3443_v50, %v2506_v47  ;;  %v2516_v62 = vmul.f32 %v3445_v42, %v5751_v18  ;;  %v2430_v10 = vmul.f32 %v5744_v16, %v2429_v11 }
 0x361   : > { %vm2522_vm10 = vweird.f32 %v3445_v42 }
 0x362   : > { %v2508_v36 = vmul.f32 0.5, %v2507_v4  ;;  %v2517_v14 = vmul.f32 %v3445_v42, %v2516_v62  ;;  %v2440_v37 = vmul.f32 %v5753_v45, %v2439_v2  ;;  %vm2523_vm15 = vmor %vm2521_vm14, %vm2522_vm10  ;;  %v2434_v46 = vsel %vm5799_vm13, %v5744_v16, %v2430_v10 }
 0x363   : > { %v2774_v53 = vpop.f32.mrf.mxu2  ;;  %v2579_v55 = vmul.f32 %v2547_v39, %v2434_v46 }
 0x364   : > { %v2775_v3 = vadd.f32 %v5434_v60, %v2774_v53  ;;  %v2509_v17 = vsub.f32 1.5, %v2508_v36  ;;  %v2518_v44 = vmul.f32 0.5, %v2517_v14  ;;  %v2444_v19 = vsel %vm5792_vm9, %v5753_v45, %v2440_v37 }
 0x365   : > { %2803 = vmatmul.bf16.gmra.mxu2 %v2671_v34  ;;  %v2580_v45 = vmul.f32 %v2548_v59, %v2444_v19  ;;  %v2615_v8 = vmul.f32 %v5522_v7, %v2579_v55 }
 0x366   : > { %2842 = vst [vmem:[%s5465_s27 + $0x40] sm:$0xff] %v2775_v3  ;;  %v2510_v43 = vmul.f32 %v3443_v50, %v2509_v17  ;;  %v2519_v22 = vsub.f32 1.5, %v2518_v44 }
 0x367   : > { %v2616_v35 = vmul.f32 %v5522_v7, %v2580_v45  ;;  %v2651_v32 = vadd.f32 %v5539_v13, %v2615_v8 }
 0x368   : > { %v2520_v61 = vmul.f32 %v3445_v42, %v2519_v22  ;;  %v2514_v15 = vsel %vm2513_vm12, %v3443_v50, %v2510_v43 }
 0x369   : > { %v2587_v1 = vmul.f32 %v2555_v38, %v2514_v15  ;;  %v2652_v54 = vadd.f32 %v5539_v13, %v2616_v35 }
 0x36a   : > { %v2524_v18 = vsel %vm2523_vm15, %v3445_v42, %v2520_v61 }
 0x36b   : > { %v2776_v6 = vpop.f32.mrf.mxu2  ;;  %v2588_v28 = vmul.f32 %v2556_v31, %v2524_v18  ;;  %v2623_v48 = vmul.f32 %v5522_v7, %v2587_v1  ;;  %v2672_v23 = vpack.c.bf16 %v2652_v54, %v2651_v32 }
 0x36c   : > { %v2777_v41 = vadd.f32 %v5434_v60, %v2776_v6 }
 0x36d   : > { %v2624_v25 = vmul.f32 %v5522_v7, %v2588_v28  ;;  %v2659_v16 = vadd.f32 %v5539_v13, %v2623_v48 }
 0x36e   : > { %2843 = vst [vmem:[%s5465_s27 + $0x48] sm:$0xff] %v2777_v41 }
 0x36f   : > { %v2660_v0 = vadd.f32 %v5539_v13, %v2624_v25 }
 0x371   : > { %v2676_v52 = vpack.c.bf16 %v2660_v0, %v2659_v16 }
 0x373   : > { %2828 = vmatmul.bf16.gmra.mxu3 %v2676_v52 }
 0x375   : > { %2808 = vmatmul.bf16.gmra.mxu2 %v2672_v23 }
 0x394   : > { %v2779_v20 = vpop.f32.mrf.mxu2 }
 0x395   : > { %v2780_v5 = vadd.f32 %v5434_v60, %v2779_v20 }
 0x397   : > { %2844 = vst [vmem:[%s5465_s27 + $0x50] sm:$0xff] %v2780_v5 }
 0x39c   : > { %v2781_v40 = vpop.f32.mrf.mxu2  ;;  %v2814_v51 = vpop.f32.mrf.mxu3 }
 0x39d   : > { %v2782_v57 = vadd.f32 %v5434_v60, %v2781_v40  ;;  %v2815_v7 = vadd.f32 %v5434_v60, %v2814_v51 }
 0x39f   : > { %2845 = vst [vmem:[%s5465_s27 + $0x58] sm:$0xff] %v2782_v57 }
 0x3a0   : > { %2858 = vst [vmem:[%s5465_s27 + $0xc0] sm:$0xff] %v2815_v7 }
 0x3a4   : > { %v2816_v30 = vpop.f32.mrf.mxu3 }
 0x3a5   : > { %v2817_v13 = vadd.f32 %v5434_v60, %v2816_v30 }
 0x3a7   : > { %2859 = vst [vmem:[%s5465_s27 + $0xc8] sm:$0xff] %v2817_v13  ;;  %v2784_v58 = vpop.f32.mrf.mxu2 }
 0x3a8   : > { %v2785_v56 = vadd.f32 %v5434_v60, %v2784_v58 }
 0x3aa   : > { %2846 = vst [vmem:[%s5465_s27 + $0x60] sm:$0xff] %v2785_v56 }
 0x3af   : > { %v2786_v33 = vpop.f32.mrf.mxu2 }
 0x3b0   : > { %v2787_v50 = vadd.f32 %v5434_v60, %v2786_v33 }
 0x3b2   : > { %2847 = vst [vmem:[%s5465_s27 + $0x68] sm:$0xff] %v2787_v50 }
 0x3b6   : > { %v2819_v12 = vpop.f32.mrf.mxu3 }
 0x3b7   : > { %v2789_v63 = vpop.f32.mrf.mxu2  ;;  %v2820_v47 = vadd.f32 %v5434_v60, %v2819_v12 }
 0x3b8   : > { %v2790_v21 = vadd.f32 %v5434_v60, %v2789_v63 }
 0x3b9   : > { %2860 = vst [vmem:[%s5465_s27 + $0xd0] sm:$0xff] %v2820_v47 }
 0x3ba   : > { %2848 = vst [vmem:[%s5465_s27 + $0x70] sm:$0xff] %v2790_v21 }
 0x3be   : > { %v2821_v2 = vpop.f32.mrf.mxu3 }
 0x3bf   : > { %v2791_v42 = vpop.f32.mrf.mxu2  ;;  %v2822_v4 = vadd.f32 %v5434_v60, %v2821_v2 }
 0x3c0   : > { %v2792_v26 = vadd.f32 %v5434_v60, %v2791_v42 }
 0x3c1   : > { %2861 = vst [vmem:[%s5465_s27 + $0xd8] sm:$0xff] %v2822_v4 }
 0x3c2   : > { %2849 = vst [vmem:[%s5465_s27 + $0x78] sm:$0xff] %v2792_v26 }
 0x3c7   : > { %v2794_v62 = vpop.f32.mrf.mxu2 }
 0x3c8   : > { %v2795_v29 = vadd.f32 %v5434_v60, %v2794_v62 }
 0x3ca   : > { %2850 = vst [vmem:[%s5465_s27 + $0x80] sm:$0xff] %v2795_v29 }
 0x3cf   : > { %v2796_v11 = vpop.f32.mrf.mxu2 }
 0x3d0   : > { %v2797_v36 = vadd.f32 %v5434_v60, %v2796_v11 }
 0x3d2   : > { %2851 = vst [vmem:[%s5465_s27 + $0x88] sm:$0xff] %v2797_v36 }
 0x3d8   : > { %v2799_v14 = vpop.f32.mrf.mxu2 }
 0x3d9   : > { %v2800_v53 = vadd.f32 %v5434_v60, %v2799_v14 }
 0x3db   : > { %2852 = vst [vmem:[%s5465_s27 + $0x90] sm:$0xff] %v2800_v53 }
 0x3df   : > { %v2824_v3 = vpop.f32.mrf.mxu3 }
 0x3e0   : > { %v2825_v27 = vadd.f32 %v5434_v60, %v2824_v3  ;;  %v2801_v37 = vpop.f32.mrf.mxu2 }
 0x3e1   : > { %v2802_v17 = vadd.f32 %v5434_v60, %v2801_v37 }
 0x3e2   : > { %2862 = vst [vmem:[%s5465_s27 + $0xe0] sm:$0xff] %v2825_v27 }
 0x3e3   : > { %2853 = vst [vmem:[%s5465_s27 + $0x98] sm:$0xff] %v2802_v17 }
 0x3e7   : > { %v2826_v44 = vpop.f32.mrf.mxu3 }
 0x3e8   : > { %v2827_v49 = vadd.f32 %v5434_v60, %v2826_v44  ;;  %v2804_v10 = vpop.f32.mrf.mxu2 }
 0x3e9   : > { %v2805_v9 = vadd.f32 %v5434_v60, %v2804_v10 }
 0x3ea   : > { %2863 = vst [vmem:[%s5465_s27 + $0xe8] sm:$0xff] %v2827_v49 }
 0x3eb   : > { %2854 = vst [vmem:[%s5465_s27 + $0xa0] sm:$0xff] %v2805_v9 }
 0x3f0   : > { %v2806_v43 = vpop.f32.mrf.mxu2 }
 0x3f1   : > { %v2807_v22 = vadd.f32 %v5434_v60, %v2806_v43 }
 0x3f3   : > { %2855 = vst [vmem:[%s5465_s27 + $0xa8] sm:$0xff] %v2807_v22 }
 0x3f6   : > { %v2829_v38 = vpop.f32.mrf.mxu3 }
 0x3f7   : > { %v2830_v34 = vadd.f32 %v5434_v60, %v2829_v38 }
 0x3f8   : > { %v2809_v24 = vpop.f32.mrf.mxu2 }
 0x3f9   : > { %2864 = vst [vmem:[%s5465_s27 + $0xf0] sm:$0xff] %v2830_v34  ;;  %v2810_v19 = vadd.f32 %v5434_v60, %v2809_v24 }
 0x3fb   : > { %2856 = vst [vmem:[%s5465_s27 + $0xb0] sm:$0xff] %v2810_v19 }
 0x3fe   : > { %v2831_v61 = vpop.f32.mrf.mxu3 }
 0x3ff   : > { %v2832_v15 = vadd.f32 %v5434_v60, %v2831_v61 }
 0x400   : > { %v2811_v31 = vpop.f32.mrf.mxu2 }
 0x401   : > { %2865 = vst [vmem:[%s5465_s27 + $0xf8] sm:$0xff] %v2832_v15  ;;  %v2812_v59 = vadd.f32 %v5434_v60, %v2811_v31 }
 0x403   : > { %2857 = vst [vmem:[%s5465_s27 + $0xb8] sm:$0xff] %v2812_v59 }
 0x404   : > { %3598 = shalt.err (!%p3595_p10)
}
 0x405   : > { %s3652_s5 = smov 128   ;;  %s3653_s27 = smov 8  }
 0x406   : > { %3244 = dma.vmem_to_hbm [thread:$0]  (%p3805_p3), %s2880_s16, 4096, %s2882_s22, %s2867_s21, %s3652_s5, %s3652_s5, %s3653_s27  }
 0x407 PF: > { %s2896_s19 = sand.u32 1, %s3633_s17   ;;  %p6021_p12 = scmp.ge.s32.totalorder %s3645_s20, 2 }
 0x408   : > { %s2897_s9 = scalar_lea.sflag [#allocation4], %s2896_s19 }
 0x409   : > { %p3261_p13 = pnand %p6021_p12, %p3749_p6 }
 0x40b   : > { %p3262_p0 = pneg %p3261_p13 }
 0x40d   : > { %3628 = dma.done.wait (%p3262_p0), %s2897_s9, 4096  }
 0x40e   : > { %3630 = vsyncadd (%p3262_p0), %s2897_s9, 4294963200  ;;  %s6022_s23 = sld [smem:[#allocation15_spill]]  ;;  %p26_p5 = scmp.ge.s32.totalorder %s3787_s1, 4  }
 0x40f   : > { %s6023_s19 = sld [smem:[#allocation16_spill]]  ;;  %s6024_s17 = smov %s3637_s18 }
 0x410   : > { %s6026_s20 = smov %s3787_s1  ;;  %28 = sbr.rel (!%p26_p5) target bundleno = 11 (0xb), region = 121 }
 0x414   : > { %s6025_s18 = smov %s6022_s23 }
 0x415   :  { %2903 = vsyncpa [#allocation3], 1 }
 0x416   :  { %2905 = vsyncpa [#allocation3 + $0x1], 1 }
 0x417   :  { %2906 = vsyncpa [#allocation6], 1 }
 0x418   :  { %2907 = vsyncpa [#allocation9], 1 }
 0x419   :  { %2908 = vsyncpa [#allocation4], 1 }
 0x41a   :  { %2910 = vsyncpa [#allocation4 + $0x1], 1 }

</bundles_post_ra>
